<compile_context>
chip_gen: v7x
topology: tpu7x:2x2x1
jax: 0.10.0
libtpu: 0.0.40
codegen_flags: <defaults>
</compile_context>

<pallas_src>
import jax
import jax.numpy as jnp
import numpy as np
from jax.experimental import pallas as pl
from jax.experimental.pallas import tpu as pltpu

# ----------------------------- config -------------------------------------
B = 2                   # real batch (no padding rows inside the kernel)
IMG_C, IMG_H, IMG_W = 3, 16, 16
CIN_PAD = 128           # image channels zero-padded -> every K is 128-aligned
HW_IN = IMG_H * IMG_W   # 256 input pixels per image
KH = KW = 3
STRIDE, PAD = 2, 1
OH = (IMG_H + 2 * PAD - KH) // STRIDE + 1   # 8
OW = (IMG_W + 2 * PAD - KW) // STRIDE + 1   # 8
HW_OUT = OH * OW        # 64 output positions per image
NTAPS = KH * KW         # 9
C_FEAT = 128            # stand-in for resnet50's 2048 final channels
DIST_DIM = 397          # fixed by fc_pos1 in_features
DIST_PAD = 512          # lane/contraction aligned (zero-padded -> exact)
MID = 128               # middle_fc_features
POS_HID = 256           # fc_pos1 out_features
N_CLASSES = 10
NC_PAD = 128            # folded head weight padded lane-dense
GEM_P = 3.0
GEM_EPS = 1e-6

VMEM_SPEC = pl.BlockSpec(memory_space=pltpu.MemorySpace.VMEM)


# --------------------------- fused Pallas kernel ----------------------------
def fused_model_kernel(img_ref, sel_ref, convw_ref, convb_ref,
                       dist_ref, w1_ref, b1_ref,
                       whead_ref, ball_ref, o_ref):
    # ---- backbone stand-in (conv3x3 s2 p1 + ReLU) + GeM pooling, per image --
    pooled = []
    for b in range(B):
        img_b = img_ref[b * HW_IN:(b + 1) * HW_IN, :]        # [256, 128] bf16
        # Gather the input pixel feeding every (tap, output position): the
        # selection matrix is 0/1 so this is an exact copy (bf16 in, f32 out).
        pix = jnp.dot(sel_ref[...], img_b,
                      preferred_element_type=jnp.float32)    # [576, 128]
        pix = pix.astype(jnp.bfloat16)                        # exact (copies)
        feat = jnp.zeros((HW_OUT, C_FEAT), jnp.float32)
        for k in range(NTAPS):                                # unrolled, 9 taps
            feat += jnp.dot(pix[k * HW_OUT:(k + 1) * HW_OUT, :], convw_ref[k],
                            preferred_element_type=jnp.float32)  # [64, 128]
        feat += convb_ref[...]
        # ReLU + GeM clamp collapsed: max(max(x, 0), eps) == max(x, eps).
        z = jnp.maximum(feat, GEM_EPS)
        z = z * z * z                                         # x^p, p = 3 (VPU)
        # Exact f32 mean over the 64 spatial rows (XLU sublane reduce).
        pooled.append(jnp.sum(z, axis=0, keepdims=True) * (1.0 / HW_OUT))
    gem_p = jnp.concatenate(pooled, axis=0)                   # [B, C_FEAT] f32
    # ^(1/p) only on the tiny reduced tensor (EUP); gem_p >= eps^3 > 0.
    x = jnp.exp(jnp.log(jnp.maximum(gem_p, 1e-30)) * (1.0 / GEM_P))
    # post-pool ReLU dropped (x > 0); dropout(p=0.5) is identity in eval.

    # ---- distance branch: fc_pos1 -> ReLU (dropout identity) ----------------
    d = jnp.dot(dist_ref[...], w1_ref[...],
                preferred_element_type=jnp.float32) + b1_ref[...]
    d = jnp.maximum(d, 0.0)                                   # [B, POS_HID]

    # ---- fused head: concat(x, d) @ [fc_w@Wf_x ; w2@Wf_d] + folded bias -----
    cat = jnp.concatenate([x.astype(jnp.bfloat16), d.astype(jnp.bfloat16)],
                          axis=1)                             # [B, 384]
    out = jnp.dot(cat, whead_ref[...],
                  preferred_element_type=jnp.float32) + ball_ref[...]
    o_ref[...] = out[:, :N_CLASSES]                           # [B, n_classes]


# ----------------------------- parameter prep -------------------------------
def build_tap_select():
    """sel[k*HW_OUT + q, p] = 1 iff input pixel p feeds output position q at tap k."""
    sel = np.zeros((NTAPS * HW_OUT, HW_IN), np.float32)
    for i in range(KH):
        for j in range(KW):
            k = i * KW + j
            for oh in range(OH):
                for ow in range(OW):
                    ih = oh * STRIDE - PAD + i
                    iw = ow * STRIDE - PAD + j
                    if 0 <= ih < IMG_H and 0 <= iw < IMG_W:
                        sel[k * HW_OUT + oh * OW + ow, ih * IMG_W + iw] = 1.0
    return jnp.asarray(sel, dtype=jnp.bfloat16)               # 0/1 -> exact


def prepare_kernel_params(p):
    """One-time fold / pad / cast of the original-layout parameters."""
    # Exact fold: no nonlinearity between fc / fc_pos2 and final_fc.
    w_img = p["fc_w"] @ p["wf_x"]                             # [C_FEAT, NC]
    w_d = p["w2"] @ p["wf_d"]                                 # [POS_HID, NC]
    b_all = p["fc_b"] @ p["wf_x"] + p["b2"] @ p["wf_d"] + p["bf"]
    w_head = jnp.concatenate([w_img, w_d], axis=0)            # [384, NC]
    w_head = jnp.pad(w_head, ((0, 0), (0, NC_PAD - N_CLASSES)))
    b_all = jnp.pad(b_all.reshape(1, N_CLASSES),
                    ((0, 0), (0, NC_PAD - N_CLASSES)))

    # Per-tap conv weights, channel rows zero-padded 3 -> 128 (aligned K, exact).
    conv_w_taps = p["conv_w"].reshape(NTAPS, IMG_C, C_FEAT)
    conv_w_taps = jnp.pad(conv_w_taps, ((0, 0), (0, CIN_PAD - IMG_C), (0, 0)))

    # Distance weights zero-padded 397 -> 512 rows (aligned K, exact).
    w1_pad = jnp.pad(p["w1"], ((0, DIST_PAD - DIST_DIM), (0, 0)))

    return {
        "sel":    build_tap_select(),                         # [576, 256] bf16
        "conv_w": conv_w_taps.astype(jnp.bfloat16),           # [9, 128, 128]
        "conv_b": p["conv_b"].reshape(1, C_FEAT),             # [1, 128] f32
        "w1":     w1_pad.astype(jnp.bfloat16),                # [512, 256]
        "b1":     p["b1"].reshape(1, POS_HID),                # [1, 256] f32
        "w_head": w_head.astype(jnp.bfloat16),                # [384, 128]
        "b_all":  b_all,                                      # [1, 128] f32
    }


# ------------------------------- wrapper -------------------------------------
def custom_model_forward(image_nchw, distance, kp):
    # One producer fusion per input; everything else happens in the kernel.
    img = jnp.transpose(image_nchw, (0, 2, 3, 1)).reshape(B * HW_IN, IMG_C)
    img = jnp.pad(img, ((0, 0), (0, CIN_PAD - IMG_C))).astype(jnp.bfloat16)
    dist = jnp.pad(distance, ((0, 0), (0, DIST_PAD - DIST_DIM))
                   ).astype(jnp.bfloat16)

    return pl.pallas_call(
        fused_model_kernel,
        out_shape=jax.ShapeDtypeStruct((B, N_CLASSES), jnp.float32),
        in_specs=[VMEM_SPEC] * 9,
        out_specs=VMEM_SPEC,
    )(img, kp["sel"], kp["conv_w"], kp["conv_b"], dist,
      kp["w1"], kp["b1"], kp["w_head"], kp["b_all"])


# --------------------------- pure-JAX reference -------------------------------
def im2col_nhwc(x_nhwc, kh, kw, stride, pad):
    x = jnp.pad(x_nhwc, ((0, 0), (pad, pad), (pad, pad), (0, 0)))
    b, h, w, c = x.shape
    oh = (h - kh) // stride + 1
    ow = (w - kw) // stride + 1
    patches = []
    for i in range(kh):
        for j in range(kw):
            patches.append(
                x[:, i:i + oh * stride:stride, j:j + ow * stride:stride, :])
    patches = jnp.stack(patches, axis=3)                      # [b,oh,ow,taps,c]
    return patches.reshape(b * oh * ow, kh * kw * c)


def reference_forward(image_nchw, distance, p):
    """Unfolded pure-JAX f32 reference mirroring the PyTorch forward."""
    x_nhwc = jnp.transpose(image_nchw, (0, 2, 3, 1))
    patches = im2col_nhwc(x_nhwc, KH, KW, STRIDE, PAD)
    feat = jnp.maximum(patches @ p["conv_w"] + p["conv_b"], 0.0)
    feat = feat.reshape(B, HW_OUT, C_FEAT)
    gem = jnp.power(jnp.mean(jnp.maximum(feat, GEM_EPS) ** 3, axis=1),
                    1.0 / GEM_P)
    x = jnp.maximum(gem, 0.0)
    x = x @ p["fc_w"] + p["fc_b"]
    d = jnp.maximum(distance @ p["w1"] + p["b1"], 0.0)
    d = d @ p["w2"] + p["b2"]
    cat = jnp.concatenate([x, d], axis=1)
    wf = jnp.concatenate([p["wf_x"], p["wf_d"]], axis=0)
    return cat @ wf + p["bf"]


# ------------------------------- main ---------------------------------------
if __name__ == "__main__":
    key = jax.random.PRNGKey(0)
    keys = jax.random.split(key, 12)

    image = jax.random.normal(keys[0], (B, IMG_C, IMG_H, IMG_W), jnp.float32)
    distance = jax.random.normal(keys[1], (B, DIST_DIM), jnp.float32)

    s = 0.05
    params = {
        "conv_w": s * jax.random.normal(keys[2], (KH * KW * IMG_C, C_FEAT), jnp.float32),
        "conv_b": s * jax.random.normal(keys[3], (C_FEAT,), jnp.float32),
        "fc_w":   s * jax.random.normal(keys[4], (C_FEAT, MID), jnp.float32),
        "fc_b":   s * jax.random.normal(keys[5], (MID,), jnp.float32),
        "w1":     s * jax.random.normal(keys[6], (DIST_DIM, POS_HID), jnp.float32),
        "b1":     s * jax.random.normal(keys[7], (POS_HID,), jnp.float32),
        "w2":     s * jax.random.normal(keys[8], (POS_HID, MID), jnp.float32),
        "b2":     s * jax.random.normal(keys[9], (MID,), jnp.float32),
        "wf_x":   s * jax.random.normal(keys[10], (MID, N_CLASSES), jnp.float32),
        "wf_d":   s * jax.random.normal(keys[11], (MID, N_CLASSES), jnp.float32),
        "bf":     jnp.zeros((N_CLASSES,), jnp.float32),
    }

    kparams = prepare_kernel_params(params)   # one-time fold / pad / bf16 cast

    out = jax.jit(custom_model_forward)(image, distance, kparams)
    jax.block_until_ready(out)
    assert out.shape == (B, N_CLASSES)

    # Self-check against the unfolded f32 reference (bf16 MXU operands -> loose tol).
    ref = reference_forward(image, distance, params)
    assert bool(jnp.allclose(out, ref, rtol=5e-2, atol=2e-2)), (
        "mismatch vs reference: max abs err "
        f"{float(jnp.max(jnp.abs(out - ref)))}")

    print("KERNEL_OK")
</pallas_src>

<mosaic_0001>
module attributes {stable_mosaic.version = 11 : i64} {
  func.func @fused_model_kernel(%arg0: memref<512x128xbf16, #tpu.memory_space<vmem>>, %arg1: memref<576x256xbf16, #tpu.memory_space<vmem>>, %arg2: memref<9x128x128xbf16, #tpu.memory_space<vmem>>, %arg3: memref<1x128xf32, #tpu.memory_space<vmem>>, %arg4: memref<2x512xbf16, #tpu.memory_space<vmem>>, %arg5: memref<512x256xbf16, #tpu.memory_space<vmem>>, %arg6: memref<1x256xf32, #tpu.memory_space<vmem>>, %arg7: memref<384x128xbf16, #tpu.memory_space<vmem>>, %arg8: memref<1x128xf32, #tpu.memory_space<vmem>>, %arg9: memref<2x10xf32, #tpu.memory_space<vmem>>) attributes {dimension_semantics = [], scalar_prefetch = 0 : i64, scratch_operands = 0 : i64, tpu.core_type = #tpu.core_type<tc>} {
    %c0 = arith.constant 0 : index
    %c0_0 = arith.constant 0 : index
    %0 = vector.load %arg0[%c0, %c0_0] : memref<512x128xbf16, #tpu.memory_space<vmem>>, vector<256x128xbf16>
    %c0_1 = arith.constant 0 : index
    %c0_2 = arith.constant 0 : index
    %1 = vector.load %arg1[%c0_1, %c0_2] : memref<576x256xbf16, #tpu.memory_space<vmem>>, vector<576x256xbf16>
    %cst = arith.constant dense<0.000000e+00> : vector<576x128xf32>
    %2 = tpu.matmul %1, %0, %cst {dimension_numbers = #tpu.dot_dimension_numbers<[1], [0], [0], [1], [0, 0, 1, 1], [], []>} : vector<576x256xbf16>, vector<256x128xbf16>, vector<576x128xf32> -> vector<576x128xf32>
    %3 = arith.truncf %2 : vector<576x128xf32> to vector<576x128xbf16>
    %cst_3 = arith.constant 0.000000e+00 : f32
    %4 = vector.broadcast %cst_3 : f32 to vector<64x128xf32>
    %5 = vector.extract_strided_slice %3 {offsets = [0, 0], sizes = [64, 128], strides = [1, 1]} : vector<576x128xbf16> to vector<64x128xbf16>
    %c0_4 = arith.constant 0 : index
    %c0_5 = arith.constant 0 : index
    %c0_6 = arith.constant 0 : index
    %6 = vector.load %arg2[%c0_4, %c0_5, %c0_6] : memref<9x128x128xbf16, #tpu.memory_space<vmem>>, vector<1x128x128xbf16>
    %7 = vector.shape_cast %6 : vector<1x128x128xbf16> to vector<128x128xbf16>
    %cst_7 = arith.constant dense<0.000000e+00> : vector<64x128xf32>
    %8 = tpu.matmul %5, %7, %cst_7 {dimension_numbers = #tpu.dot_dimension_numbers<[1], [0], [0], [1], [0, 0, 1, 1], [], []>} : vector<64x128xbf16>, vector<128x128xbf16>, vector<64x128xf32> -> vector<64x128xf32>
    %9 = arith.addf %4, %8 : vector<64x128xf32>
    %10 = vector.extract_strided_slice %3 {offsets = [64, 0], sizes = [64, 128], strides = [1, 1]} : vector<576x128xbf16> to vector<64x128xbf16>
    %c1 = arith.constant 1 : index
    %c0_8 = arith.constant 0 : index
    %c0_9 = arith.constant 0 : index
    %11 = vector.load %arg2[%c1, %c0_8, %c0_9] : memref<9x128x128xbf16, #tpu.memory_space<vmem>>, vector<1x128x128xbf16>
    %12 = vector.shape_cast %11 : vector<1x128x128xbf16> to vector<128x128xbf16>
    %cst_10 = arith.constant dense<0.000000e+00> : vector<64x128xf32>
    %13 = tpu.matmul %10, %12, %cst_10 {dimension_numbers = #tpu.dot_dimension_numbers<[1], [0], [0], [1], [0, 0, 1, 1], [], []>} : vector<64x128xbf16>, vector<128x128xbf16>, vector<64x128xf32> -> vector<64x128xf32>
    %14 = arith.addf %9, %13 : vector<64x128xf32>
    %15 = vector.extract_strided_slice %3 {offsets = [128, 0], sizes = [64, 128], strides = [1, 1]} : vector<576x128xbf16> to vector<64x128xbf16>
    %c2 = arith.constant 2 : index
    %c0_11 = arith.constant 0 : index
    %c0_12 = arith.constant 0 : index
    %16 = vector.load %arg2[%c2, %c0_11, %c0_12] : memref<9x128x128xbf16, #tpu.memory_space<vmem>>, vector<1x128x128xbf16>
    %17 = vector.shape_cast %16 : vector<1x128x128xbf16> to vector<128x128xbf16>
    %cst_13 = arith.constant dense<0.000000e+00> : vector<64x128xf32>
    %18 = tpu.matmul %15, %17, %cst_13 {dimension_numbers = #tpu.dot_dimension_numbers<[1], [0], [0], [1], [0, 0, 1, 1], [], []>} : vector<64x128xbf16>, vector<128x128xbf16>, vector<64x128xf32> -> vector<64x128xf32>
    %19 = arith.addf %14, %18 : vector<64x128xf32>
    %20 = vector.extract_strided_slice %3 {offsets = [192, 0], sizes = [64, 128], strides = [1, 1]} : vector<576x128xbf16> to vector<64x128xbf16>
    %c3 = arith.constant 3 : index
    %c0_14 = arith.constant 0 : index
    %c0_15 = arith.constant 0 : index
    %21 = vector.load %arg2[%c3, %c0_14, %c0_15] : memref<9x128x128xbf16, #tpu.memory_space<vmem>>, vector<1x128x128xbf16>
    %22 = vector.shape_cast %21 : vector<1x128x128xbf16> to vector<128x128xbf16>
    %cst_16 = arith.constant dense<0.000000e+00> : vector<64x128xf32>
    %23 = tpu.matmul %20, %22, %cst_16 {dimension_numbers = #tpu.dot_dimension_numbers<[1], [0], [0], [1], [0, 0, 1, 1], [], []>} : vector<64x128xbf16>, vector<128x128xbf16>, vector<64x128xf32> -> vector<64x128xf32>
    %24 = arith.addf %19, %23 : vector<64x128xf32>
    %25 = vector.extract_strided_slice %3 {offsets = [256, 0], sizes = [64, 128], strides = [1, 1]} : vector<576x128xbf16> to vector<64x128xbf16>
    %c4 = arith.constant 4 : index
    %c0_17 = arith.constant 0 : index
    %c0_18 = arith.constant 0 : index
    %26 = vector.load %arg2[%c4, %c0_17, %c0_18] : memref<9x128x128xbf16, #tpu.memory_space<vmem>>, vector<1x128x128xbf16>
    %27 = vector.shape_cast %26 : vector<1x128x128xbf16> to vector<128x128xbf16>
    %cst_19 = arith.constant dense<0.000000e+00> : vector<64x128xf32>
    %28 = tpu.matmul %25, %27, %cst_19 {dimension_numbers = #tpu.dot_dimension_numbers<[1], [0], [0], [1], [0, 0, 1, 1], [], []>} : vector<64x128xbf16>, vector<128x128xbf16>, vector<64x128xf32> -> vector<64x128xf32>
    %29 = arith.addf %24, %28 : vector<64x128xf32>
    %30 = vector.extract_strided_slice %3 {offsets = [320, 0], sizes = [64, 128], strides = [1, 1]} : vector<576x128xbf16> to vector<64x128xbf16>
    %c5 = arith.constant 5 : index
    %c0_20 = arith.constant 0 : index
    %c0_21 = arith.constant 0 : index
    %31 = vector.load %arg2[%c5, %c0_20, %c0_21] : memref<9x128x128xbf16, #tpu.memory_space<vmem>>, vector<1x128x128xbf16>
    %32 = vector.shape_cast %31 : vector<1x128x128xbf16> to vector<128x128xbf16>
    %cst_22 = arith.constant dense<0.000000e+00> : vector<64x128xf32>
    %33 = tpu.matmul %30, %32, %cst_22 {dimension_numbers = #tpu.dot_dimension_numbers<[1], [0], [0], [1], [0, 0, 1, 1], [], []>} : vector<64x128xbf16>, vector<128x128xbf16>, vector<64x128xf32> -> vector<64x128xf32>
    %34 = arith.addf %29, %33 : vector<64x128xf32>
    %35 = vector.extract_strided_slice %3 {offsets = [384, 0], sizes = [64, 128], strides = [1, 1]} : vector<576x128xbf16> to vector<64x128xbf16>
    %c6 = arith.constant 6 : index
    %c0_23 = arith.constant 0 : index
    %c0_24 = arith.constant 0 : index
    %36 = vector.load %arg2[%c6, %c0_23, %c0_24] : memref<9x128x128xbf16, #tpu.memory_space<vmem>>, vector<1x128x128xbf16>
    %37 = vector.shape_cast %36 : vector<1x128x128xbf16> to vector<128x128xbf16>
    %cst_25 = arith.constant dense<0.000000e+00> : vector<64x128xf32>
    %38 = tpu.matmul %35, %37, %cst_25 {dimension_numbers = #tpu.dot_dimension_numbers<[1], [0], [0], [1], [0, 0, 1, 1], [], []>} : vector<64x128xbf16>, vector<128x128xbf16>, vector<64x128xf32> -> vector<64x128xf32>
    %39 = arith.addf %34, %38 : vector<64x128xf32>
    %40 = vector.extract_strided_slice %3 {offsets = [448, 0], sizes = [64, 128], strides = [1, 1]} : vector<576x128xbf16> to vector<64x128xbf16>
    %c7 = arith.constant 7 : index
    %c0_26 = arith.constant 0 : index
    %c0_27 = arith.constant 0 : index
    %41 = vector.load %arg2[%c7, %c0_26, %c0_27] : memref<9x128x128xbf16, #tpu.memory_space<vmem>>, vector<1x128x128xbf16>
    %42 = vector.shape_cast %41 : vector<1x128x128xbf16> to vector<128x128xbf16>
    %cst_28 = arith.constant dense<0.000000e+00> : vector<64x128xf32>
    %43 = tpu.matmul %40, %42, %cst_28 {dimension_numbers = #tpu.dot_dimension_numbers<[1], [0], [0], [1], [0, 0, 1, 1], [], []>} : vector<64x128xbf16>, vector<128x128xbf16>, vector<64x128xf32> -> vector<64x128xf32>
    %44 = arith.addf %39, %43 : vector<64x128xf32>
    %45 = vector.extract_strided_slice %3 {offsets = [512, 0], sizes = [64, 128], strides = [1, 1]} : vector<576x128xbf16> to vector<64x128xbf16>
    %c8 = arith.constant 8 : index
    %c0_29 = arith.constant 0 : index
    %c0_30 = arith.constant 0 : index
    %46 = vector.load %arg2[%c8, %c0_29, %c0_30] : memref<9x128x128xbf16, #tpu.memory_space<vmem>>, vector<1x128x128xbf16>
    %47 = vector.shape_cast %46 : vector<1x128x128xbf16> to vector<128x128xbf16>
    %cst_31 = arith.constant dense<0.000000e+00> : vector<64x128xf32>
    %48 = tpu.matmul %45, %47, %cst_31 {dimension_numbers = #tpu.dot_dimension_numbers<[1], [0], [0], [1], [0, 0, 1, 1], [], []>} : vector<64x128xbf16>, vector<128x128xbf16>, vector<64x128xf32> -> vector<64x128xf32>
    %49 = arith.addf %44, %48 : vector<64x128xf32>
    %c0_32 = arith.constant 0 : index
    %c0_33 = arith.constant 0 : index
    %50 = vector.load %arg3[%c0_32, %c0_33] : memref<1x128xf32, #tpu.memory_space<vmem>>, vector<1x128xf32>
    %51 = vector.broadcast %50 : vector<1x128xf32> to vector<64x128xf32>
    %52 = arith.addf %49, %51 : vector<64x128xf32>
    %cst_34 = arith.constant 9.99999997E-7 : f32
    %53 = vector.broadcast %cst_34 : f32 to vector<64x128xf32>
    %54 = arith.maximumf %52, %53 : vector<64x128xf32>
    %55 = arith.mulf %54, %54 : vector<64x128xf32>
    %56 = arith.mulf %55, %54 : vector<64x128xf32>
    %cst_35 = arith.constant dense<0.000000e+00> : vector<128xf32>
    %57 = vector.multi_reduction <add>, %56, %cst_35 [0] : vector<64x128xf32> to vector<128xf32>
    %58 = vector.shape_cast %57 : vector<128xf32> to vector<1x128xf32>
    %cst_36 = arith.constant 1.562500e-02 : f32
    %59 = vector.broadcast %cst_36 : f32 to vector<1x128xf32>
    %60 = arith.mulf %58, %59 : vector<1x128xf32>
    %c256 = arith.constant 256 : index
    %c0_37 = arith.constant 0 : index
    %61 = vector.load %arg0[%c256, %c0_37] : memref<512x128xbf16, #tpu.memory_space<vmem>>, vector<256x128xbf16>
    %c0_38 = arith.constant 0 : index
    %c0_39 = arith.constant 0 : index
    %62 = vector.load %arg1[%c0_38, %c0_39] : memref<576x256xbf16, #tpu.memory_space<vmem>>, vector<576x256xbf16>
    %cst_40 = arith.constant dense<0.000000e+00> : vector<576x128xf32>
    %63 = tpu.matmul %62, %61, %cst_40 {dimension_numbers = #tpu.dot_dimension_numbers<[1], [0], [0], [1], [0, 0, 1, 1], [], []>} : vector<576x256xbf16>, vector<256x128xbf16>, vector<576x128xf32> -> vector<576x128xf32>
    %64 = arith.truncf %63 : vector<576x128xf32> to vector<576x128xbf16>
    %cst_41 = arith.constant 0.000000e+00 : f32
    %65 = vector.broadcast %cst_41 : f32 to vector<64x128xf32>
    %66 = vector.extract_strided_slice %64 {offsets = [0, 0], sizes = [64, 128], strides = [1, 1]} : vector<576x128xbf16> to vector<64x128xbf16>
    %c0_42 = arith.constant 0 : index
    %c0_43 = arith.constant 0 : index
    %c0_44 = arith.constant 0 : index
    %67 = vector.load %arg2[%c0_42, %c0_43, %c0_44] : memref<9x128x128xbf16, #tpu.memory_space<vmem>>, vector<1x128x128xbf16>
    %68 = vector.shape_cast %67 : vector<1x128x128xbf16> to vector<128x128xbf16>
    %cst_45 = arith.constant dense<0.000000e+00> : vector<64x128xf32>
    %69 = tpu.matmul %66, %68, %cst_45 {dimension_numbers = #tpu.dot_dimension_numbers<[1], [0], [0], [1], [0, 0, 1, 1], [], []>} : vector<64x128xbf16>, vector<128x128xbf16>, vector<64x128xf32> -> vector<64x128xf32>
    %70 = arith.addf %65, %69 : vector<64x128xf32>
    %71 = vector.extract_strided_slice %64 {offsets = [64, 0], sizes = [64, 128], strides = [1, 1]} : vector<576x128xbf16> to vector<64x128xbf16>
    %c1_46 = arith.constant 1 : index
    %c0_47 = arith.constant 0 : index
    %c0_48 = arith.constant 0 : index
    %72 = vector.load %arg2[%c1_46, %c0_47, %c0_48] : memref<9x128x128xbf16, #tpu.memory_space<vmem>>, vector<1x128x128xbf16>
    %73 = vector.shape_cast %72 : vector<1x128x128xbf16> to vector<128x128xbf16>
    %cst_49 = arith.constant dense<0.000000e+00> : vector<64x128xf32>
    %74 = tpu.matmul %71, %73, %cst_49 {dimension_numbers = #tpu.dot_dimension_numbers<[1], [0], [0], [1], [0, 0, 1, 1], [], []>} : vector<64x128xbf16>, vector<128x128xbf16>, vector<64x128xf32> -> vector<64x128xf32>
    %75 = arith.addf %70, %74 : vector<64x128xf32>
    %76 = vector.extract_strided_slice %64 {offsets = [128, 0], sizes = [64, 128], strides = [1, 1]} : vector<576x128xbf16> to vector<64x128xbf16>
    %c2_50 = arith.constant 2 : index
    %c0_51 = arith.constant 0 : index
    %c0_52 = arith.constant 0 : index
    %77 = vector.load %arg2[%c2_50, %c0_51, %c0_52] : memref<9x128x128xbf16, #tpu.memory_space<vmem>>, vector<1x128x128xbf16>
    %78 = vector.shape_cast %77 : vector<1x128x128xbf16> to vector<128x128xbf16>
    %cst_53 = arith.constant dense<0.000000e+00> : vector<64x128xf32>
    %79 = tpu.matmul %76, %78, %cst_53 {dimension_numbers = #tpu.dot_dimension_numbers<[1], [0], [0], [1], [0, 0, 1, 1], [], []>} : vector<64x128xbf16>, vector<128x128xbf16>, vector<64x128xf32> -> vector<64x128xf32>
    %80 = arith.addf %75, %79 : vector<64x128xf32>
    %81 = vector.extract_strided_slice %64 {offsets = [192, 0], sizes = [64, 128], strides = [1, 1]} : vector<576x128xbf16> to vector<64x128xbf16>
    %c3_54 = arith.constant 3 : index
    %c0_55 = arith.constant 0 : index
    %c0_56 = arith.constant 0 : index
    %82 = vector.load %arg2[%c3_54, %c0_55, %c0_56] : memref<9x128x128xbf16, #tpu.memory_space<vmem>>, vector<1x128x128xbf16>
    %83 = vector.shape_cast %82 : vector<1x128x128xbf16> to vector<128x128xbf16>
    %cst_57 = arith.constant dense<0.000000e+00> : vector<64x128xf32>
    %84 = tpu.matmul %81, %83, %cst_57 {dimension_numbers = #tpu.dot_dimension_numbers<[1], [0], [0], [1], [0, 0, 1, 1], [], []>} : vector<64x128xbf16>, vector<128x128xbf16>, vector<64x128xf32> -> vector<64x128xf32>
    %85 = arith.addf %80, %84 : vector<64x128xf32>
    %86 = vector.extract_strided_slice %64 {offsets = [256, 0], sizes = [64, 128], strides = [1, 1]} : vector<576x128xbf16> to vector<64x128xbf16>
    %c4_58 = arith.constant 4 : index
    %c0_59 = arith.constant 0 : index
    %c0_60 = arith.constant 0 : index
    %87 = vector.load %arg2[%c4_58, %c0_59, %c0_60] : memref<9x128x128xbf16, #tpu.memory_space<vmem>>, vector<1x128x128xbf16>
    %88 = vector.shape_cast %87 : vector<1x128x128xbf16> to vector<128x128xbf16>
    %cst_61 = arith.constant dense<0.000000e+00> : vector<64x128xf32>
    %89 = tpu.matmul %86, %88, %cst_61 {dimension_numbers = #tpu.dot_dimension_numbers<[1], [0], [0], [1], [0, 0, 1, 1], [], []>} : vector<64x128xbf16>, vector<128x128xbf16>, vector<64x128xf32> -> vector<64x128xf32>
    %90 = arith.addf %85, %89 : vector<64x128xf32>
    %91 = vector.extract_strided_slice %64 {offsets = [320, 0], sizes = [64, 128], strides = [1, 1]} : vector<576x128xbf16> to vector<64x128xbf16>
    %c5_62 = arith.constant 5 : index
    %c0_63 = arith.constant 0 : index
    %c0_64 = arith.constant 0 : index
    %92 = vector.load %arg2[%c5_62, %c0_63, %c0_64] : memref<9x128x128xbf16, #tpu.memory_space<vmem>>, vector<1x128x128xbf16>
    %93 = vector.shape_cast %92 : vector<1x128x128xbf16> to vector<128x128xbf16>
    %cst_65 = arith.constant dense<0.000000e+00> : vector<64x128xf32>
    %94 = tpu.matmul %91, %93, %cst_65 {dimension_numbers = #tpu.dot_dimension_numbers<[1], [0], [0], [1], [0, 0, 1, 1], [], []>} : vector<64x128xbf16>, vector<128x128xbf16>, vector<64x128xf32> -> vector<64x128xf32>
    %95 = arith.addf %90, %94 : vector<64x128xf32>
    %96 = vector.extract_strided_slice %64 {offsets = [384, 0], sizes = [64, 128], strides = [1, 1]} : vector<576x128xbf16> to vector<64x128xbf16>
    %c6_66 = arith.constant 6 : index
    %c0_67 = arith.constant 0 : index
    %c0_68 = arith.constant 0 : index
    %97 = vector.load %arg2[%c6_66, %c0_67, %c0_68] : memref<9x128x128xbf16, #tpu.memory_space<vmem>>, vector<1x128x128xbf16>
    %98 = vector.shape_cast %97 : vector<1x128x128xbf16> to vector<128x128xbf16>
    %cst_69 = arith.constant dense<0.000000e+00> : vector<64x128xf32>
    %99 = tpu.matmul %96, %98, %cst_69 {dimension_numbers = #tpu.dot_dimension_numbers<[1], [0], [0], [1], [0, 0, 1, 1], [], []>} : vector<64x128xbf16>, vector<128x128xbf16>, vector<64x128xf32> -> vector<64x128xf32>
    %100 = arith.addf %95, %99 : vector<64x128xf32>
    %101 = vector.extract_strided_slice %64 {offsets = [448, 0], sizes = [64, 128], strides = [1, 1]} : vector<576x128xbf16> to vector<64x128xbf16>
    %c7_70 = arith.constant 7 : index
    %c0_71 = arith.constant 0 : index
    %c0_72 = arith.constant 0 : index
    %102 = vector.load %arg2[%c7_70, %c0_71, %c0_72] : memref<9x128x128xbf16, #tpu.memory_space<vmem>>, vector<1x128x128xbf16>
    %103 = vector.shape_cast %102 : vector<1x128x128xbf16> to vector<128x128xbf16>
    %cst_73 = arith.constant dense<0.000000e+00> : vector<64x128xf32>
    %104 = tpu.matmul %101, %103, %cst_73 {dimension_numbers = #tpu.dot_dimension_numbers<[1], [0], [0], [1], [0, 0, 1, 1], [], []>} : vector<64x128xbf16>, vector<128x128xbf16>, vector<64x128xf32> -> vector<64x128xf32>
    %105 = arith.addf %100, %104 : vector<64x128xf32>
    %106 = vector.extract_strided_slice %64 {offsets = [512, 0], sizes = [64, 128], strides = [1, 1]} : vector<576x128xbf16> to vector<64x128xbf16>
    %c8_74 = arith.constant 8 : index
    %c0_75 = arith.constant 0 : index
    %c0_76 = arith.constant 0 : index
    %107 = vector.load %arg2[%c8_74, %c0_75, %c0_76] : memref<9x128x128xbf16, #tpu.memory_space<vmem>>, vector<1x128x128xbf16>
    %108 = vector.shape_cast %107 : vector<1x128x128xbf16> to vector<128x128xbf16>
    %cst_77 = arith.constant dense<0.000000e+00> : vector<64x128xf32>
    %109 = tpu.matmul %106, %108, %cst_77 {dimension_numbers = #tpu.dot_dimension_numbers<[1], [0], [0], [1], [0, 0, 1, 1], [], []>} : vector<64x128xbf16>, vector<128x128xbf16>, vector<64x128xf32> -> vector<64x128xf32>
    %110 = arith.addf %105, %109 : vector<64x128xf32>
    %c0_78 = arith.constant 0 : index
    %c0_79 = arith.constant 0 : index
    %111 = vector.load %arg3[%c0_78, %c0_79] : memref<1x128xf32, #tpu.memory_space<vmem>>, vector<1x128xf32>
    %112 = vector.broadcast %111 : vector<1x128xf32> to vector<64x128xf32>
    %113 = arith.addf %110, %112 : vector<64x128xf32>
    %cst_80 = arith.constant 9.99999997E-7 : f32
    %114 = vector.broadcast %cst_80 : f32 to vector<64x128xf32>
    %115 = arith.maximumf %113, %114 : vector<64x128xf32>
    %116 = arith.mulf %115, %115 : vector<64x128xf32>
    %117 = arith.mulf %116, %115 : vector<64x128xf32>
    %cst_81 = arith.constant dense<0.000000e+00> : vector<128xf32>
    %118 = vector.multi_reduction <add>, %117, %cst_81 [0] : vector<64x128xf32> to vector<128xf32>
    %119 = vector.shape_cast %118 : vector<128xf32> to vector<1x128xf32>
    %cst_82 = arith.constant 1.562500e-02 : f32
    %120 = vector.broadcast %cst_82 : f32 to vector<1x128xf32>
    %121 = arith.mulf %119, %120 : vector<1x128xf32>
    %122 = tpu.concatenate %60, %121 in 0 : vector<1x128xf32>, vector<1x128xf32> -> vector<2x128xf32>
    %cst_83 = arith.constant 1.000000e-30 : f32
    %123 = vector.broadcast %cst_83 : f32 to vector<2x128xf32>
    %124 = arith.maximumf %122, %123 : vector<2x128xf32>
    %125 = math.log %124 : vector<2x128xf32>
    %cst_84 = arith.constant 0.333333343 : f32
    %126 = vector.broadcast %cst_84 : f32 to vector<2x128xf32>
    %127 = arith.mulf %125, %126 : vector<2x128xf32>
    %128 = math.exp %127 : vector<2x128xf32>
    %c0_85 = arith.constant 0 : index
    %c0_86 = arith.constant 0 : index
    %129 = vector.load %arg4[%c0_85, %c0_86] : memref<2x512xbf16, #tpu.memory_space<vmem>>, vector<2x512xbf16>
    %c0_87 = arith.constant 0 : index
    %c0_88 = arith.constant 0 : index
    %130 = vector.load %arg5[%c0_87, %c0_88] : memref<512x256xbf16, #tpu.memory_space<vmem>>, vector<512x256xbf16>
    %cst_89 = arith.constant dense<0.000000e+00> : vector<2x256xf32>
    %131 = tpu.matmul %129, %130, %cst_89 {dimension_numbers = #tpu.dot_dimension_numbers<[1], [0], [0], [1], [0, 0, 1, 1], [], []>} : vector<2x512xbf16>, vector<512x256xbf16>, vector<2x256xf32> -> vector<2x256xf32>
    %c0_90 = arith.constant 0 : index
    %c0_91 = arith.constant 0 : index
    %132 = vector.load %arg6[%c0_90, %c0_91] : memref<1x256xf32, #tpu.memory_space<vmem>>, vector<1x256xf32>
    %133 = vector.broadcast %132 : vector<1x256xf32> to vector<2x256xf32>
    %134 = arith.addf %131, %133 : vector<2x256xf32>
    %cst_92 = arith.constant 0.000000e+00 : f32
    %135 = vector.broadcast %cst_92 : f32 to vector<2x256xf32>
    %136 = arith.maximumf %134, %135 : vector<2x256xf32>
    %137 = arith.truncf %128 : vector<2x128xf32> to vector<2x128xbf16>
    %138 = arith.truncf %136 : vector<2x256xf32> to vector<2x256xbf16>
    %139 = tpu.concatenate %137, %138 in 1 : vector<2x128xbf16>, vector<2x256xbf16> -> vector<2x384xbf16>
    %c0_93 = arith.constant 0 : index
    %c0_94 = arith.constant 0 : index
    %140 = vector.load %arg7[%c0_93, %c0_94] : memref<384x128xbf16, #tpu.memory_space<vmem>>, vector<384x128xbf16>
    %cst_95 = arith.constant dense<0.000000e+00> : vector<2x128xf32>
    %141 = tpu.matmul %139, %140, %cst_95 {dimension_numbers = #tpu.dot_dimension_numbers<[1], [0], [0], [1], [0, 0, 1, 1], [], []>} : vector<2x384xbf16>, vector<384x128xbf16>, vector<2x128xf32> -> vector<2x128xf32>
    %c0_96 = arith.constant 0 : index
    %c0_97 = arith.constant 0 : index
    %142 = vector.load %arg8[%c0_96, %c0_97] : memref<1x128xf32, #tpu.memory_space<vmem>>, vector<1x128xf32>
    %143 = vector.broadcast %142 : vector<1x128xf32> to vector<2x128xf32>
    %144 = arith.addf %141, %143 : vector<2x128xf32>
    %145 = vector.extract_strided_slice %144 {offsets = [0, 0], sizes = [2, 10], strides = [1, 1]} : vector<2x128xf32> to vector<2x10xf32>
    %c0_98 = arith.constant 0 : index
    %c0_99 = arith.constant 0 : index
    %146 = vector.load %arg9[%c0_98, %c0_99] : memref<2x10xf32, #tpu.memory_space<vmem>>, vector<2x10xf32>
    tpu.vector_store %arg9[%c0_98, %c0_99], %145 {strides = array<i32>} : memref<2x10xf32, #tpu.memory_space<vmem>>, vector<2x10xf32>,
    return
  }
}

</mosaic_0001>

<bundles_post_ra>
// kernel: custom_model_forward.1
= control target key start
LH: loop header
LB: loop body
LE: loop exit
PB: predicated region body
PF: predicated region fallthrough
CT: control target
= control target key end

     0   :  { %14 = vsyncpa [#allocation3], 0  ;;  %s6950_s0 = inlined_call_operand.vmem [shape: bf16[512,128], index: 0, kind: input, shape index: {}]   ;;  %s6951_s1 = inlined_call_operand.vmem [shape: bf16[576,256], index: 1, kind: input, shape index: {}]   ;;  %s6952_s2 = inlined_call_operand.hbm [shape: bf16[9,128,128], index: 2, kind: input, shape index: {}]   ;;  %s6953_s3 = inlined_call_operand.vmem [shape: f32[1,128], index: 3, kind: input, shape index: {}]   ;;  %s6954_s4 = inlined_call_operand.vmem [shape: bf16[2,512], index: 4, kind: input, shape index: {}]   ;;  %s6955_s5 = inlined_call_operand.hbm [shape: bf16[512,256], index: 5, kind: input, shape index: {}]   ;;  %s6956_s6 = inlined_call_operand.vmem [shape: f32[1,256], index: 6, kind: input, shape index: {}]   ;;  %s6957_s7 = inlined_call_operand.vmem [shape: bf16[384,128], index: 7, kind: input, shape index: {}]   ;;  %s6958_s8 = inlined_call_operand.vmem [shape: f32[1,128], index: 8, kind: input, shape index: {}]   ;;  %s6959_s9 = inlined_call_operand.hbm [shape: f32[2,10], index: 9, kind: output, shape index: {}]  }
   0x1   :  { %15 = vsyncpa [#allocation6], 0 }
   0x2   :  { %16 = vsyncpa [#allocation4], 0  ;;  %s5866_s30 = smov [#allocation2]   ;;  %s5794_s13 = scalar_lea.hbm %s6952_s2, 9216 }
   0x3   :  { %s26_s10 = sshll.u32 %s5866_s30, 4  ;;  %p5795_p0 = scmp.ne.s32.totalorder %s6952_s2, %s5794_s13  ;;  %s27_s10 = int_to_ptr.vmem [resolvable:$true] %s26_s10 }
   0x4   :  { %p5798_p1 = scmp.lt.u32.totalorder %s5794_s13, %s6952_s2 }
   0x6   :  { %p5800_p2 = pnand %p5798_p1, %p5795_p0 }
   0x8   :  { %5803 = shalt.err (!%p5800_p2)
}
   0x9   :  { %s5804_s18 = scalar_lea.vmem %s27_s10, 9216  ;;  %p5809_p4 = scmp.lt.s32.totalorder %s27_s10, %s27_s10 }
   0xa   :  { %p5805_p3 = scmp.ne.s32.totalorder %s27_s10, %s5804_s18  ;;  %p5810_p5 = scmp.lt.s32.totalorder %s5804_s18, %s5804_s18 }
   0xc   :  { %p5811_p6 = por %p5810_p5, %p5809_p4 }
   0xe   :  { %p5812_p7 = pnand %p5811_p6, %p5805_p3 }
  0x10   :  { %5815 = shalt.err (!%p5812_p7)
}
  0x11   :  { %s5867_s19 = smov 64   ;;  %s5868_s20 = smov 4  }
  0x12   :  { %32 = dma.hbm_to_vmem [thread:$0]  %s6952_s2, 9216, %s27_s10, [#allocation3], %s5867_s19, %s5867_s19, %s5868_s20  }
  0x13   :  { %s5869_s23 = smov [#allocation5]   ;;  %s5816_s27 = scalar_lea.hbm %s6955_s5, 8192 }
  0x14   :  { %s42_s24 = sshll.u32 %s5869_s23, 4  ;;  %p5817_p8 = scmp.ne.s32.totalorder %s6955_s5, %s5816_s27  ;;  %s43_s24 = int_to_ptr.vmem [resolvable:$true] %s42_s24 }
  0x15   :  { %p5820_p9 = scmp.lt.u32.totalorder %s5816_s27, %s6955_s5 }
  0x17   :  { %p5822_p10 = pnand %p5820_p9, %p5817_p8 }
  0x19   :  { %5825 = shalt.err (!%p5822_p10)
}
  0x1a   :  { %s5826_s12 = scalar_lea.vmem %s43_s24, 8192  ;;  %p5831_p12 = scmp.lt.s32.totalorder %s43_s24, %s43_s24 }
  0x1b   :  { %p5827_p11 = scmp.ne.s32.totalorder %s43_s24, %s5826_s12  ;;  %p5832_p13 = scmp.lt.s32.totalorder %s5826_s12, %s5826_s12 }
  0x1d   :  { %p5833_p0 = por %p5832_p13, %p5831_p12 }
  0x1f   :  { %p5834_p1 = pnand %p5833_p0, %p5827_p11 }
  0x21   :  { %5837 = shalt.err (!%p5834_p1)
}
  0x22   :  { %s5870_s2 = smov 128   ;;  %s5871_s10 = smov 8  }
  0x23   :  { %48 = dma.hbm_to_vmem [thread:$0]  %s6955_s5, 8192, %s43_s24, [#allocation6], %s5870_s2, %s5870_s2, %s5871_s10  }
  0x24   :  { %5860 = dma.done.wait [#allocation3], 9216  }
  0x25   :  { %5861 = vsyncadd [#allocation3], 4294958080 }
  0x26   :  { %5862 = dma.done.wait [#allocation6], 8192  }
  0x27   :  { %5863 = vsyncadd [#allocation6], 4294959104  ;;  %v5872_v0 = vmov 0   ;;  %v5358_v1 = vld [vmem:[%s6950_s0] sm:$0xff]   ;;  %v5359_v2 = vld [vmem:[%s6950_s0 + $0x8] sm:$0xff]   ;;  %vm3429_vm0 = vcmask 1040384  }
  0x28   :  { %622 = vmatprep.subr.bf16.mxu0 %v5872_v0  ;;  %v5360_v3 = vld [vmem:[%s6950_s0 + $0x10] sm:$0xff]   ;;  %v5361_v4 = vld [vmem:[%s6950_s0 + $0x18] sm:$0xff]   ;;  %v5362_v5 = vld [vmem:[%s6950_s0 + $0x20] sm:$0xff]   ;;  %vm5875_vm1 = vmmov 0   ;;  %vm4229_vm2 = vcmask 74752  }
  0x29   :  { %623 = vmatpush1.bf16.msra.mxu0 %v5358_v1  ;;  %v5376_v6 = vld [vmem:[%s6951_s1 + $0x4] ss:$8 sps:$4 sm:$0xff]   ;;  %v5364_v8 = vld [vmem:[%s6950_s0 + $0x30] sm:$0xff]   ;;  %v5365_v9 = vld [vmem:[%s6950_s0 + $0x38] sm:$0xff]  }
  0x2a   :  { %624 = vmatprep.subr.bf16.mxu0 %v5872_v0  ;;  %v5363_v7 = vld [vmem:[%s6950_s0 + $0x28] sm:$0xff]   ;;  %654 = vmatprep.mubr.bf16.mxu0 %v5376_v6  ;;  %v5366_v10 = vld [vmem:[%s6950_s0 + $0x40] sm:$0xff]   ;;  %v5368_v12 = vld [vmem:[%s6950_s0 + $0x50] sm:$0xff]  }
  0x2b   :  { %v5367_v11 = vld [vmem:[%s6950_s0 + $0x48] sm:$0xff]   ;;  %v5369_v13 = vld [vmem:[%s6950_s0 + $0x58] sm:$0xff]   ;;  %v5370_v14 = vld [vmem:[%s6950_s0 + $0x60] sm:$0xff]  }
  0x2c   :  { %v5371_v15 = vld [vmem:[%s6950_s0 + $0x68] sm:$0xff]   ;;  %v5372_v16 = vld [vmem:[%s6950_s0 + $0x70] sm:$0xff]   ;;  %v5373_v17 = vld [vmem:[%s6950_s0 + $0x78] sm:$0xff]  }
  0x2d   :  { %625 = vmatpush1.bf16.msra.mxu0 %v5359_v2  ;;  %v5374_v18 = vld [vmem:[%s6951_s1] ss:$8 sps:$4 sm:$0xff]   ;;  %v5378_v20 = vld [vmem:[%s6951_s1 + $0x14] ss:$8 sps:$4 sm:$0xff]   ;;  %v5380_v22 = vld [vmem:[%s6951_s1 + $0x10] ss:$8 sps:$4 sm:$0xff]  }
  0x2e   :  { %626 = vmatprep.subr.bf16.mxu0 %v5872_v0  ;;  %v5377_v19 = vld [vmem:[%s6950_s0 + $0x80] sm:$0xff]   ;;  %v5384_v21 = vld [vmem:[%s6950_s0 + $0x88] sm:$0xff]   ;;  %v5391_v24 = vld [vmem:[%s6950_s0 + $0x90] sm:$0xff]  }
  0x2f   :  { %v5381_v23 = vld [vmem:[%s6951_s1 + $0x24] ss:$8 sps:$4 sm:$0xff]   ;;  %v5400_v25 = vld [vmem:[%s6950_s0 + $0x98] sm:$0xff]   ;;  %v5383_v26 = vld [vmem:[%s6951_s1 + $0x20] ss:$8 sps:$4 sm:$0xff]  }
  0x30   :  { %v5385_v27 = vld [vmem:[%s6951_s1 + $0x34] ss:$8 sps:$4 sm:$0xff]   ;;  %v5408_v28 = vld [vmem:[%s6950_s0 + $0xa0] sm:$0xff]   ;;  %v5415_v29 = vld [vmem:[%s6950_s0 + $0xa8] sm:$0xff]  }
  0x31   :  { %627 = vmatpush1.bf16.msra.mxu0 %v5360_v3  ;;  %v5387_v30 = vld [vmem:[%s6951_s1 + $0x30] ss:$8 sps:$4 sm:$0xff]   ;;  %v5388_v31 = vld [vmem:[%s6951_s1 + $0x44] ss:$8 sps:$4 sm:$0xff]   ;;  %v6076_v34 = vld [vmem:[%s6951_s1 + $0x40] ss:$8 sps:$4 sm:$0xff]  }
  0x32   :  { %628 = vmatprep.subr.bf16.mxu0 %v5872_v0  ;;  %v5422_v32 = vld [vmem:[%s6950_s0 + $0xb0] sm:$0xff]   ;;  %v5431_v33 = vld [vmem:[%s6950_s0 + $0xb8] sm:$0xff]   ;;  %v5439_v36 = vld [vmem:[%s6950_s0 + $0xc0] sm:$0xff]  }
  0x33   :  { %v6082_v35 = vld [vmem:[%s6951_s1 + $0x54] ss:$8 sps:$4 sm:$0xff]   ;;  %v5446_v37 = vld [vmem:[%s6950_s0 + $0xc8] sm:$0xff]   ;;  %v6096_v38 = vld [vmem:[%s6951_s1 + $0x50] ss:$8 sps:$4 sm:$0xff]  }
  0x34   :  { %v6102_v39 = vld [vmem:[%s6951_s1 + $0x64] ss:$8 sps:$4 sm:$0xff]   ;;  %v6110_v40 = vld [vmem:[%s6951_s1 + $0x60] ss:$8 sps:$4 sm:$0xff]   ;;  %v6115_v41 = vld [vmem:[%s6951_s1 + $0x74] ss:$8 sps:$4 sm:$0xff]  }
  0x35   :  { %629 = vmatpush1.bf16.msra.mxu0 %v5361_v4  ;;  %v5453_v42 = vld [vmem:[%s6950_s0 + $0xd0] sm:$0xff]   ;;  %v6130_v44 = vld [vmem:[%s6951_s1 + $0x84] ss:$8 sps:$4 sm:$0xff]   ;;  %v6138_v45 = vld [vmem:[%s6951_s1 + $0x80] ss:$8 sps:$4 sm:$0xff]  }
  0x36   :  { %630 = vmatprep.subr.bf16.mxu0 %v5872_v0  ;;  %v6125_v43 = vld [vmem:[%s6951_s1 + $0x70] ss:$8 sps:$4 sm:$0xff]   ;;  %v6143_v46 = vld [vmem:[%s6951_s1 + $0x94] ss:$8 sps:$4 sm:$0xff]   ;;  %v6158_v49 = vld [vmem:[%s6951_s1 + $0xa4] ss:$8 sps:$4 sm:$0xff]  }
  0x37   :  { %v5462_v47 = vld [vmem:[%s6950_s0 + $0xd8] sm:$0xff]   ;;  %v6166_v50 = vld [vmem:[%s6951_s1 + $0xa0] ss:$8 sps:$4 sm:$0xff]   ;;  %v6183_v53 = vld [vmem:[%s6951_s1 + $0xc4] ss:$8 sps:$4 sm:$0xff]  }
  0x38   :  { %v6153_v48 = vld [vmem:[%s6951_s1 + $0x90] ss:$8 sps:$4 sm:$0xff]   ;;  %v6171_v51 = vld [vmem:[%s6951_s1 + $0xb4] ss:$8 sps:$4 sm:$0xff]   ;;  %v5470_v54 = vld [vmem:[%s6950_s0 + $0xe0] sm:$0xff]  }
  0x39   :  { %631 = vmatpush1.bf16.msra.mxu0 %v5362_v5  ;;  %v6178_v52 = vld [vmem:[%s6951_s1 + $0xb0] ss:$8 sps:$4 sm:$0xff]   ;;  %v6193_v55 = vld [vmem:[%s6951_s1 + $0xc0] ss:$8 sps:$4 sm:$0xff]   ;;  %v6199_v56 = vld [vmem:[%s6951_s1 + $0xd4] ss:$8 sps:$4 sm:$0xff]  }
  0x3a   :  { %632 = vmatprep.subr.bf16.mxu0 %v5872_v0  ;;  %v5473_v57 = vld [vmem:[#allocation2 + $0x40] sm:$0xff]   ;;  %v5475_v58 = vld [vmem:[#allocation2 + $0x48] sm:$0xff]   ;;  %v6206_v59 = vld [vmem:[%s6951_s1 + $0xd0] ss:$8 sps:$4 sm:$0xff]  }
  0x3b   :  { %4761 = vmatprep.subr.bf16.mxu1 %v5473_v57  ;;  %v6211_v60 = vld [vmem:[%s6951_s1 + $0xe4] ss:$8 sps:$4 sm:$0xff]   ;;  %v5478_v61 = vld [vmem:[#allocation2 + $0x50] sm:$0xff]   ;;  %v5480_v62 = vld [vmem:[#allocation2 + $0x58] sm:$0xff]  }
  0x3c   :  { %4762 = vmatpush3.bf16.msra.mxu1 %v5473_v57  ;;  %v5481_v63 = vld [vmem:[%s6950_s0 + $0xe8] sm:$0xff]   ;;  %v6226_v2 = vld [vmem:[%s6951_s1 + $0xf4] ss:$8 sps:$4 sm:$0xff]   ;;  %v5484_v3 = vld [vmem:[#allocation2 + $0x60] sm:$0xff]  }
  0x3d   :  { %633 = vmatpush1.bf16.msra.mxu0 %v5363_v7  ;;  %4763 = vmatprep.subr.bf16.mxu1 %v5475_v58  ;;  %v6221_v1 = vld [vmem:[%s6951_s1 + $0xe0] ss:$8 sps:$4 sm:$0xff]   ;;  %v6234_v5 = vld [vmem:[%s6951_s1 + $0xf0] ss:$8 sps:$4 sm:$0xff]   ;;  %v6239_v6 = vld [vmem:[%s6951_s1 + $0x104] ss:$8 sps:$4 sm:$0xff]  }
  0x3e   :  { %634 = vmatprep.subr.bf16.mxu0 %v5872_v0  ;;  %v5486_v4 = vld [vmem:[#allocation2 + $0x68] sm:$0xff]   ;;  %v5489_v7 = vld [vmem:[#allocation2 + $0x70] sm:$0xff]  }
  0x40   :  { %4764 = vmatpush3.bf16.msra.mxu1 %v5475_v58 }
  0x41   :  { %635 = vmatpush1.bf16.msra.mxu0 %v5364_v8  ;;  %4765 = vmatprep.subr.bf16.mxu1 %v5478_v61  ;;  %v5491_v8 = vld [vmem:[#allocation2 + $0x78] sm:$0xff]  }
  0x42   :  { %636 = vmatprep.subr.bf16.mxu0 %v5872_v0 }
  0x44   :  { %4766 = vmatpush3.bf16.msra.mxu1 %v5478_v61 }
  0x45   :  { %637 = vmatpush1.bf16.msra.mxu0 %v5365_v9  ;;  %4767 = vmatprep.subr.bf16.mxu1 %v5480_v62  ;;  %v6246_v9 = vld [vmem:[%s6951_s1 + $0x100] ss:$8 sps:$4 sm:$0xff]  }
  0x46   :  { %638 = vmatprep.subr.bf16.mxu0 %v5872_v0 }
  0x48   :  { %4768 = vmatpush3.bf16.msra.mxu1 %v5480_v62  ;;  %v5474_v62 = vld [vmem:[%s6951_s1 + $0x1c0] ss:$8 sps:$4 sm:$0xff]  }
  0x49   :  { %639 = vmatpush1.bf16.msra.mxu0 %v5366_v10  ;;  %4769 = vmatprep.subr.bf16.mxu1 %v5484_v3  ;;  %v6251_v10 = vld [vmem:[%s6951_s1 + $0x114] ss:$8 sps:$4 sm:$0xff]  }
  0x4a   :  { %640 = vmatprep.subr.bf16.mxu0 %v5872_v0 }
  0x4c   :  { %4770 = vmatpush3.bf16.msra.mxu1 %v5484_v3  ;;  %v5476_v3 = vld [vmem:[%s6951_s1 + $0x1d4] ss:$8 sps:$4 sm:$0xff]  }
  0x4d   :  { %641 = vmatpush1.bf16.msra.mxu0 %v5367_v11  ;;  %4771 = vmatprep.subr.bf16.mxu1 %v5486_v4  ;;  %v6253_v11 = vld [vmem:[#allocation2] sm:$0xff]  }
  0x4e   :  { %642 = vmatprep.subr.bf16.mxu0 %v5872_v0 }
  0x50   :  { %4772 = vmatpush3.bf16.msra.mxu1 %v5486_v4 }
  0x51   :  { %643 = vmatpush1.bf16.msra.mxu0 %v5368_v12  ;;  %4773 = vmatprep.subr.bf16.mxu1 %v5489_v7  ;;  %v5492_v12 = vld [vmem:[%s6950_s0 + $0xf0] sm:$0xff]  }
  0x52   :  { %644 = vmatprep.subr.bf16.mxu0 %v5872_v0 }
  0x54   :  { %4774 = vmatpush3.bf16.msra.mxu1 %v5489_v7 }
  0x55   :  { %645 = vmatpush1.bf16.msra.mxu0 %v5369_v13  ;;  %4775 = vmatprep.subr.bf16.mxu1 %v5491_v8  ;;  %v6265_v13 = vld [vmem:[%s6951_s1 + $0x110] ss:$8 sps:$4 sm:$0xff]  }
  0x56   :  { %646 = vmatprep.subr.bf16.mxu0 %v5872_v0 }
  0x58   :  { %4776 = vmatpush3.bf16.msra.mxu1 %v5491_v8 }
  0x59   :  { %647 = vmatpush1.bf16.msra.mxu0 %v5370_v14  ;;  %4785 = vmatprep.subr.bf16.mxu1 %v6253_v11  ;;  %v6270_v14 = vld [vmem:[%s6951_s1 + $0x124] ss:$8 sps:$4 sm:$0xff]  }
  0x5a   :  { %648 = vmatprep.subr.bf16.mxu0 %v5872_v0 }
  0x5d   :  { %649 = vmatpush1.bf16.msra.mxu0 %v5371_v15  ;;  %v6277_v15 = vld [vmem:[%s6951_s1 + $0x120] ss:$8 sps:$4 sm:$0xff]  }
  0x5e   :  { %650 = vmatprep.subr.bf16.mxu0 %v5872_v0 }
  0x61   :  { %651 = vmatpush1.bf16.msra.mxu0 %v5372_v16  ;;  %v5506_v16 = vld [vmem:[%s6950_s0 + $0xf8] sm:$0xff]  }
  0x62   :  { %652 = vmatprep.subr.bf16.mxu0 %v5872_v0 }
  0x65   :  { %653 = vmatpush1.bf16.msra.mxu0 %v5373_v17  ;;  %v6292_v17 = vld [vmem:[%s6951_s1 + $0x130] ss:$8 sps:$4 sm:$0xff]  }
  0x66   :  { %2385 = vmatprep.subr.bf16.mxu0 %v5872_v0 }
  0x68   :  { %655 = vmatmul.mubr.bf16.vlgmr.msra.gmra.mrb[0].mxu0 %v5374_v18  ;;  %v6297_v18 = vld [vmem:[%s6951_s1 + $0x144] ss:$8 sps:$4 sm:$0xff]  }
  0x69   :  { %2386 = vmatpush1.bf16.msra.mxu0 %v5377_v19  ;;  %662 = vmatprep.mubr.bf16.mxu0 %v5378_v20  ;;  %v6304_v19 = vld [vmem:[%s6951_s1 + $0x140] ss:$8 sps:$4 sm:$0xff]   ;;  %v6309_v20 = vld [vmem:[%s6951_s1 + $0x154] ss:$8 sps:$4 sm:$0xff]  }
  0x6a   :  { %2387 = vmatprep.subr.bf16.mxu0 %v5872_v0 }
  0x6d   :  { %2388 = vmatpush1.bf16.msra.mxu0 %v5384_v21  ;;  %v6316_v21 = vld [vmem:[%s6951_s1 + $0x150] ss:$8 sps:$4 sm:$0xff]  }
  0x6e   :  { %2389 = vmatprep.subr.bf16.mxu0 %v5872_v0 }
  0x70   :  { %663 = vmatmul.mubr.bf16.gmra.mrb[4].mxu0 %v5380_v22  ;;  %v6321_v22 = vld [vmem:[%s6951_s1 + $0x164] ss:$8 sps:$4 sm:$0xff]  }
  0x71   :  { %670 = vmatprep.mubr.bf16.mxu0 %v5381_v23  ;;  %2390 = vmatpush1.bf16.msra.mxu0 %v5391_v24  ;;  %v6328_v23 = vld [vmem:[%s6951_s1 + $0x160] ss:$8 sps:$4 sm:$0xff]   ;;  %v6333_v24 = vld [vmem:[%s6951_s1 + $0x174] ss:$8 sps:$4 sm:$0xff]  }
  0x72   :  { %2391 = vmatprep.subr.bf16.mxu0 %v5872_v0 }
  0x75   :  { %2392 = vmatpush1.bf16.msra.mxu0 %v5400_v25  ;;  %v6340_v25 = vld [vmem:[%s6951_s1 + $0x170] ss:$8 sps:$4 sm:$0xff]  }
  0x76   :  { %2393 = vmatprep.subr.bf16.mxu0 %v5872_v0 }
  0x78   :  { %671 = vmatmul.mubr.bf16.gmra.mrb[8].mxu0 %v5383_v26  ;;  %v6345_v26 = vld [vmem:[%s6951_s1 + $0x184] ss:$8 sps:$4 sm:$0xff]  }
  0x79   :  { %678 = vmatprep.mubr.bf16.mxu0 %v5385_v27  ;;  %2394 = vmatpush1.bf16.msra.mxu0 %v5408_v28  ;;  %v6352_v27 = vld [vmem:[%s6951_s1 + $0x180] ss:$8 sps:$4 sm:$0xff]   ;;  %v6357_v28 = vld [vmem:[%s6951_s1 + $0x194] ss:$8 sps:$4 sm:$0xff]  }
  0x7a   :  { %2395 = vmatprep.subr.bf16.mxu0 %v5872_v0  ;;  %6963 = vst [vmem:[#allocation11_spill] sm:$0xff] %v6357_v28 }
  0x7d   :  { %2396 = vmatpush1.bf16.msra.mxu0 %v5415_v29  ;;  %v6364_v29 = vld [vmem:[%s6951_s1 + $0x190] ss:$8 sps:$4 sm:$0xff]  }
  0x7e   :  { %2397 = vmatprep.subr.bf16.mxu0 %v5872_v0  ;;  %6964 = vst [vmem:[#allocation12_spill] sm:$0xff] %v6364_v29 }
  0x80   :  { %679 = vmatmul.mubr.bf16.gmra.mrb[12].mxu0 %v5387_v30  ;;  %v6369_v30 = vld [vmem:[%s6951_s1 + $0x1a4] ss:$8 sps:$4 sm:$0xff]  }
  0x81   :  { %686 = vmatprep.mubr.bf16.mxu0 %v5388_v31  ;;  %2398 = vmatpush1.bf16.msra.mxu0 %v5422_v32  ;;  %6965 = vst [vmem:[#allocation13_spill] sm:$0xff] %v6369_v30  ;;  %v5466_v31 = vld [vmem:[%s6951_s1 + $0x1a0] ss:$8 sps:$4 sm:$0xff]   ;;  %v5467_v32 = vld [vmem:[%s6951_s1 + $0x1b4] ss:$8 sps:$4 sm:$0xff]  }
  0x82   :  { %2399 = vmatprep.subr.bf16.mxu0 %v5872_v0 }
  0x85   :  { %2400 = vmatpush1.bf16.msra.mxu0 %v5431_v33 }
  0x86   :  { %2401 = vmatprep.subr.bf16.mxu0 %v5872_v0 }
  0x88   :  { %687 = vmatmul.mubr.bf16.gmra.mrb[16].mxu0 %v6076_v34 }
  0x89   :  { %694 = vmatprep.mubr.bf16.mxu0 %v6082_v35  ;;  %2402 = vmatpush1.bf16.msra.mxu0 %v5439_v36 }
  0x8a   :  { %2403 = vmatprep.subr.bf16.mxu0 %v5872_v0 }
  0x8d   :  { %2404 = vmatpush1.bf16.msra.mxu0 %v5446_v37  ;;  %v5469_v37 = vld [vmem:[%s6951_s1 + $0x1b0] ss:$8 sps:$4 sm:$0xff]  }
  0x8e   :  { %2405 = vmatprep.subr.bf16.mxu0 %v5872_v0 }
  0x90   :  { %695 = vmatmul.mubr.bf16.gmra.mrb[20].mxu0 %v6096_v38 }
  0x91   :  { %702 = vmatprep.mubr.bf16.mxu0 %v6102_v39  ;;  %2406 = vmatpush1.bf16.msra.mxu0 %v5453_v42 }
  0x92   :  { %2407 = vmatprep.subr.bf16.mxu0 %v5872_v0 }
  0x95   :  { %2408 = vmatpush1.bf16.msra.mxu0 %v5462_v47  ;;  %v5471_v47 = vld [vmem:[%s6951_s1 + $0x1c4] ss:$8 sps:$4 sm:$0xff]  }
  0x96   :  { %2409 = vmatprep.subr.bf16.mxu0 %v5872_v0 }
  0x98   :  { %703 = vmatmul.mubr.bf16.gmra.mrb[24].mxu0 %v6110_v40 }
  0x99   :  { %710 = vmatprep.mubr.bf16.mxu0 %v6115_v41  ;;  %2410 = vmatpush1.bf16.msra.mxu0 %v5470_v54 }
  0x9a   :  { %2411 = vmatprep.subr.bf16.mxu0 %v5872_v0 }
  0x9d   :  { %2412 = vmatpush1.bf16.msra.mxu0 %v5481_v63 }
  0x9e   :  { %2413 = vmatprep.subr.bf16.mxu0 %v5872_v0 }
  0xa0   :  { %711 = vmatmul.mubr.bf16.gmra.mrb[28].mxu0 %v6125_v43 }
  0xa1   :  { %718 = vmatprep.mubr.bf16.mxu0 %v6130_v44  ;;  %2414 = vmatpush1.bf16.msra.mxu0 %v5492_v12 }
  0xa2   :  { %2415 = vmatprep.subr.bf16.mxu0 %v5872_v0  ;;  %v6282_v0 = vld [vmem:[%s6951_s1 + $0x134] ss:$8 sps:$4 sm:$0xff]  }
  0xa5   :  { %2416 = vmatpush1.bf16.msra.mxu0 %v5506_v16  ;;  %v5479_v16 = vld [vmem:[%s6951_s1 + $0x1d0] ss:$8 sps:$4 sm:$0xff]  }
  0xa8   :  { %719 = vmatmul.mubr.bf16.gmra.mrb[32].mxu0 %v6138_v45 }
  0xa9   :  { %726 = vmatprep.mubr.bf16.mxu0 %v6143_v46 }
  0xb0   :  { %727 = vmatmul.mubr.bf16.gmra.mrb[36].mxu0 %v6153_v48 }
  0xb1   :  { %734 = vmatprep.mubr.bf16.mxu0 %v6158_v49 }
  0xb8   :  { %735 = vmatmul.mubr.bf16.gmra.mrb[40].mxu0 %v6166_v50 }
  0xb9   :  { %742 = vmatprep.mubr.bf16.mxu0 %v6171_v51 }
  0xc0   :  { %743 = vmatmul.mubr.bf16.gmra.mrb[44].mxu0 %v6178_v52 }
  0xc1   :  { %750 = vmatprep.mubr.bf16.mxu0 %v6183_v53 }
  0xc8   :  { %751 = vmatmul.mubr.bf16.gmra.mrb[48].mxu0 %v6193_v55 }
  0xc9   :  { %758 = vmatprep.mubr.bf16.mxu0 %v6199_v56 }
  0xd0   :  { %759 = vmatmul.mubr.bf16.gmra.mrb[52].mxu0 %v6206_v59 }
  0xd1   :  { %766 = vmatprep.mubr.bf16.mxu0 %v6211_v60 }
  0xd8   :  { %767 = vmatmul.mubr.bf16.gmra.mrb[56].mxu0 %v6221_v1 }
  0xd9   :  { %774 = vmatprep.mubr.bf16.mxu0 %v6226_v2 }
  0xe0   :  { %775 = vmatmul.mubr.bf16.gmra.mrb[60].mxu0 %v6234_v5 }
  0xe1   :  { %782 = vmatprep.mubr.bf16.mxu0 %v6239_v6 }
  0xe8   :  { %783 = vmatmul.mubr.bf16.gmra.mrb[64].mxu0 %v6246_v9 }
  0xe9   :  { %790 = vmatprep.mubr.bf16.mxu0 %v6251_v10 }
  0xf0   :  { %791 = vmatmul.mubr.bf16.gmra.mrb[68].mxu0 %v6265_v13 }
  0xf1   :  { %798 = vmatprep.mubr.bf16.mxu0 %v6270_v14 }
  0xf8   :  { %799 = vmatmul.mubr.bf16.gmra.mrb[72].mxu0 %v6277_v15 }
  0xf9   :  { %806 = vmatprep.mubr.bf16.mxu0 %v6282_v0 }
 0x100   :  { %807 = vmatmul.mubr.bf16.gmra.mrb[76].mxu0 %v6292_v17 }
 0x101   :  { %814 = vmatprep.mubr.bf16.mxu0 %v6297_v18 }
 0x108   :  { %815 = vmatmul.mubr.bf16.gmra.mrb[80].mxu0 %v6304_v19 }
 0x109   :  { %822 = vmatprep.mubr.bf16.mxu0 %v6309_v20 }
 0x110   :  { %823 = vmatmul.mubr.bf16.gmra.mrb[84].mxu0 %v6316_v21 }
 0x111   :  { %830 = vmatprep.mubr.bf16.mxu0 %v6321_v22 }
 0x118   :  { %831 = vmatmul.mubr.bf16.gmra.mrb[88].mxu0 %v6328_v23 }
 0x119   :  { %838 = vmatprep.mubr.bf16.mxu0 %v6333_v24 }
 0x120   :  { %839 = vmatmul.mubr.bf16.gmra.mrb[92].mxu0 %v6340_v25 }
 0x121   :  { %846 = vmatprep.mubr.bf16.mxu0 %v6345_v26 }
 0x128   :  { %847 = vmatmul.mubr.bf16.gmra.mrb[96].mxu0 %v6352_v27 }
 0x129   :  { %854 = vmatprep.mubr.bf16.mxu0 %v6357_v28  ;;  %v5497_v28 = vld [vmem:[#allocation2 + $0x8] sm:$0xff]  }
 0x130   :  { %855 = vmatmul.mubr.bf16.gmra.mrb[100].mxu0 %v6364_v29 }
 0x131   :  { %862 = vmatprep.mubr.bf16.mxu0 %v6369_v30 }
 0x138   :  { %863 = vmatmul.mubr.bf16.gmra.mrb[104].mxu0 %v5466_v31 }
 0x139   :  { %870 = vmatprep.mubr.bf16.mxu0 %v5467_v32  ;;  %v5482_v32 = vld [vmem:[%s6951_s1 + $0x1e4] ss:$8 sps:$4 sm:$0xff]  }
 0x13b   :  { %v6379_v33 = vpop.f32.mrb[0].mxu0 }
 0x13c   :  { %v658_v36 = vpop.f32.mrb[1].mxu0 }
 0x13d   :  { %v6384_v42 = vpop.f32.mrb[2].mxu0  ;;  %v5493_v36 = vld [vmem:[%s6951_s1 + $0x204] ss:$8 sps:$4 sm:$0xff]  }
 0x13e   :  { %v661_v57 = vpop.f32.mrb[3].mxu0 }
 0x140   :  { %871 = vmatmul.mubr.bf16.gmra.mrb[108].mxu0 %v5469_v37 }
 0x141   :  { %878 = vmatprep.mubr.bf16.mxu0 %v5471_v47 }
 0x143   :  { %v6391_v58 = vpop.f32.mrb[4].mxu0 }
 0x144   :  { %v666_v61 = vpop.f32.mrb[5].mxu0 }
 0x145   :  { %v6396_v63 = vpop.f32.mrb[6].mxu0  ;;  %v5485_v61 = vld [vmem:[%s6951_s1 + $0x1e0] ss:$8 sps:$4 sm:$0xff]  }
 0x146   :  { %v669_v7 = vpop.f32.mrb[7].mxu0 }
 0x148   :  { %879 = vmatmul.mubr.bf16.gmra.mrb[112].mxu0 %v5474_v62 }
 0x149   :  { %886 = vmatprep.mubr.bf16.mxu0 %v5476_v3  ;;  %v5487_v3 = vld [vmem:[%s6951_s1 + $0x1f4] ss:$8 sps:$4 sm:$0xff]  }
 0x14b   :  { %v6403_v8 = vpop.f32.mrb[8].mxu0 }
 0x14c   :  { %v674_v12 = vpop.f32.mrb[9].mxu0 }
 0x14d   :  { %v6408_v31 = vpop.f32.mrb[10].mxu0 }
 0x14e   :  { %v677_v37 = vpop.f32.mrb[11].mxu0 }
 0x14f   :  { %v5490_v37 = vld [vmem:[%s6951_s1 + $0x1f0] ss:$8 sps:$4 sm:$0xff]  }
 0x150   :  { %887 = vmatmul.mubr.bf16.gmra.mrb[116].mxu0 %v5479_v16 }
 0x151   :  { %894 = vmatprep.mubr.bf16.mxu0 %v5482_v32 }
 0x153   :  { %v6415_v47 = vpop.f32.mrb[12].mxu0 }
 0x154   :  { %v682_v57 = vpop.f32.mrb[13].mxu0 }
 0x155   :  { %v6420_v62 = vpop.f32.mrb[14].mxu0 }
 0x156   :  { %v685_v12 = vpop.f32.mrb[15].mxu0 }
 0x158   :  { %895 = vmatmul.mubr.bf16.gmra.mrb[120].mxu0 %v5485_v61  ;;  %v5496_v61 = vld [vmem:[%s6951_s1 + $0x200] ss:$8 sps:$4 sm:$0xff]  }
 0x159   :  { %902 = vmatprep.mubr.bf16.mxu0 %v5487_v3 }
 0x15b   :  { %v688_v16 = vpop.f32.mrb[16].mxu0 }
 0x15c   :  { %v690_v32 = vpop.f32.mrb[17].mxu0 }
 0x15d   :  { %v691_v57 = vpop.f32.mrb[18].mxu0  ;;  %v5498_v32 = vld [vmem:[%s6951_s1 + $0x214] ss:$8 sps:$4 sm:$0xff]  }
 0x15e   :  { %v693_v4 = vpop.f32.mrb[19].mxu0  ;;  %v947_v54 = vpack.c.bf16 %v691_v57, %v688_v16  ;;  %v5501_v16 = vld [vmem:[%s6951_s1 + $0x210] ss:$8 sps:$4 sm:$0xff]  }
 0x160   :  { %903 = vmatmul.mubr.bf16.gmra.mrb[124].mxu0 %v5490_v37  ;;  %4777 = vmatprep.mubr.bf16.mxu1 %v947_v54  ;;  %v5500_v54 = vld [vmem:[#allocation2 + $0x10] sm:$0xff]  }
 0x161   :  { %910 = vmatprep.mubr.bf16.mxu0 %v5493_v36 }
 0x163   :  { %v696_v7 = vpop.f32.mrb[20].mxu0 }
 0x164   :  { %v698_v12 = vpop.f32.mrb[21].mxu0 }
 0x165   :  { %v699_v3 = vpop.f32.mrb[22].mxu0 }
 0x166   :  { %v948_v30 = vpack.c.bf16 %v699_v3, %v696_v7  ;;  %v701_v29 = vpop.f32.mrb[23].mxu0 }
 0x167   :  { %v5503_v29 = vld [vmem:[%s6951_s1 + $0x224] ss:$8 sps:$4 sm:$0xff]  }
 0x168   :  { %911 = vmatmul.mubr.bf16.gmra.mrb[128].mxu0 %v5496_v61  ;;  %4778 = vmatmul.mubr.bf16.vlgmr.msra.gmra.mrb[0].mxu1 %v948_v30  ;;  %v5502_v30 = vld [vmem:[#allocation2 + $0x18] sm:$0xff]  }
 0x169   :  { %4786 = vmatpush3.bf16.msra.mxu1 %v6253_v11  ;;  %918 = vmatprep.mubr.bf16.mxu0 %v5498_v32  ;;  %v5505_v11 = vld [vmem:[#allocation2 + $0x20] sm:$0xff]  }
 0x16a   :  { %4787 = vmatprep.subr.bf16.mxu1 %v5497_v28 }
 0x16b   :  { %v704_v4 = vpop.f32.mrb[24].mxu0 }
 0x16c   :  { %v706_v36 = vpop.f32.mrb[25].mxu0 }
 0x16d   :  { %4788 = vmatpush3.bf16.msra.mxu1 %v5497_v28  ;;  %v707_v37 = vpop.f32.mrb[26].mxu0  ;;  %v5507_v28 = vld [vmem:[%s6951_s1 + $0x220] ss:$8 sps:$4 sm:$0xff]  }
 0x16e   :  { %v949_v7 = vpack.c.bf16 %v707_v37, %v704_v4  ;;  %v709_v57 = vpop.f32.mrb[27].mxu0  ;;  %4789 = vmatprep.subr.bf16.mxu1 %v5500_v54  ;;  %v5508_v4 = vld [vmem:[#allocation2 + $0x28] sm:$0xff]   ;;  %v5511_v37 = vld [vmem:[#allocation2 + $0x30] sm:$0xff]  }
 0x16f   :  { %v5512_v57 = vld [vmem:[%s6951_s1 + $0x230] ss:$8 sps:$4 sm:$0xff]  }
 0x170   :  { %919 = vmatmul.mubr.bf16.gmra.mrb[132].mxu0 %v5501_v16  ;;  %4781 = vmatprep.mubr.bf16.mxu1 %v949_v7  ;;  %v5509_v16 = vld [vmem:[%s6951_s1 + $0x234] ss:$8 sps:$4 sm:$0xff]  }
 0x171   :  { %4790 = vmatpush3.bf16.msra.mxu1 %v5500_v54  ;;  %926 = vmatprep.mubr.bf16.mxu0 %v5503_v29  ;;  %v6966_v54 = vpack.c.bf16 %v6384_v42, %v6379_v33  ;;  %v5694_v33 = vld [vmem:[%s6951_s1 + $0x4] ss:$8 sps:$4 sm:$0xff]  }
 0x172   :  { %4791 = vmatprep.subr.bf16.mxu1 %v5502_v30  ;;  %v5514_v42 = vld [vmem:[#allocation2 + $0x80] sm:$0xff]  }
 0x173   :  { %v712_v12 = vpop.f32.mrb[28].mxu0 }
 0x174   :  { %v714_v61 = vpop.f32.mrb[29].mxu0 }
 0x175   :  { %4792 = vmatpush3.bf16.msra.mxu1 %v5502_v30  ;;  %v715_v3 = vpop.f32.mrb[30].mxu0  ;;  %v5513_v61 = vld [vmem:[#allocation2 + $0x38] sm:$0xff]  }
 0x176   :  { %v950_v32 = vpack.c.bf16 %v715_v3, %v712_v12  ;;  %v717_v36 = vpop.f32.mrb[31].mxu0  ;;  %4793 = vmatprep.subr.bf16.mxu1 %v5505_v11 }
 0x178   :  { %927 = vmatmul.mubr.bf16.gmra.mrb[136].mxu0 %v5507_v28  ;;  %4782 = vmatmul.mubr.bf16.gmra.mrb[4].mxu1 %v950_v32 }
 0x179   :  { %4794 = vmatpush3.bf16.msra.mxu1 %v5505_v11  ;;  %4801 = vmatprep.mubr.bf16.mxu1 %v6966_v54  ;;  %v6967_v54 = vpack.c.bf16 %v6396_v63, %v6391_v58 }
 0x17a   :  { %4795 = vmatprep.subr.bf16.mxu1 %v5508_v4  ;;  %934 = vmatprep.mubr.bf16.mxu0 %v5509_v16  ;;  %v5515_v16 = vld [vmem:[#allocation2 + $0x88] sm:$0xff]  }
 0x17b   :  { %v720_v29 = vpop.f32.mrb[32].mxu0 }
 0x17c   :  { %v722_v7 = vpop.f32.mrb[33].mxu0 }
 0x17d   :  { %4796 = vmatpush3.bf16.msra.mxu1 %v5508_v4  ;;  %v723_v30 = vpop.f32.mrb[34].mxu0  ;;  %v5516_v7 = vld [vmem:[#allocation2 + $0x90] sm:$0xff]  }
 0x17e   :  { %v725_v12 = vpop.f32.mrb[35].mxu0  ;;  %4797 = vmatprep.subr.bf16.mxu1 %v5511_v37  ;;  %v951_v28 = vpack.c.bf16 %v723_v30, %v720_v29  ;;  %v6968_v29 = vpack.c.bf16 %v6408_v31, %v6403_v8  ;;  %v6969_v8 = vpack.c.bf16 %v6420_v62, %v6415_v47  ;;  %v5697_v31 = vld [vmem:[%s6951_s1 + $0x10] ss:$8 sps:$4 sm:$0xff]  }
 0x180   :  { %935 = vmatmul.mubr.bf16.gmra.mrb[140].mxu0 %v5512_v57  ;;  %v5696_v57 = vld [vmem:[%s6951_s1 + $0x14] ss:$8 sps:$4 sm:$0xff]  }
 0x181   :  { %4798 = vmatpush3.bf16.msra.mxu1 %v5511_v37  ;;  %2417 = vmatprep.mubr.bf16.mxu0 %v5694_v33  ;;  %v5695_v37 = vld [vmem:[%s6951_s1] ss:$8 sps:$4 sm:$0xff]   ;;  %v5517_v33 = vld [vmem:[#allocation2 + $0x98] sm:$0xff]  }
 0x182   :  { %4799 = vmatprep.subr.bf16.mxu1 %v5513_v61 }
 0x183   :  { %v6461_v11 = vpop.f32.mrb[36].mxu0 }
 0x184   :  { %v730_v3 = vpop.f32.mrb[37].mxu0 }
 0x185   :  { %4800 = vmatpush3.bf16.msra.mxu1 %v5513_v61  ;;  %v6463_v32 = vpop.f32.mrb[38].mxu0  ;;  %v5698_v3 = vld [vmem:[%s6951_s1 + $0x24] ss:$8 sps:$4 sm:$0xff]  }
 0x186   :  { %v952_v36 = vpack.c.bf16 %v6463_v32, %v6461_v11  ;;  %v733_v4 = vpop.f32.mrb[39].mxu0  ;;  %4809 = vmatprep.subr.bf16.mxu1 %v5514_v42 }
 0x188   :  { %4802 = vmatmul.mubr.bf16.vlgmr.msra.gmra.mrb[0].mxu1 %v6967_v54  ;;  %2418 = vmatmul.mubr.bf16.vlgmr.msra.gmra.mrb[144].mxu0 %v5695_v37  ;;  %v5519_v37 = vld [vmem:[#allocation2 + $0xa8] sm:$0xff]  }
 0x189   :  { %4805 = vmatprep.mubr.bf16.mxu1 %v6968_v29  ;;  %4810 = vmatpush3.bf16.msra.mxu1 %v5514_v42  ;;  %v5518_v42 = vld [vmem:[#allocation2 + $0xa0] sm:$0xff]  }
 0x18a   :  { %4811 = vmatprep.subr.bf16.mxu1 %v5515_v16  ;;  %2425 = vmatprep.mubr.bf16.mxu0 %v5696_v57  ;;  %v5699_v29 = vld [vmem:[%s6951_s1 + $0x20] ss:$8 sps:$4 sm:$0xff]  }
 0x18b   :  { %v736_v30 = vpop.f32.mrb[40].mxu0 }
 0x18c   :  { %v738_v58 = vpop.f32.mrb[41].mxu0 }
 0x18d   :  { %4812 = vmatpush3.bf16.msra.mxu1 %v5515_v16  ;;  %v739_v63 = vpop.f32.mrb[42].mxu0 }
 0x18e   :  { %v953_v12 = vpack.c.bf16 %v739_v63, %v736_v30  ;;  %v741_v61 = vpop.f32.mrb[43].mxu0  ;;  %4813 = vmatprep.subr.bf16.mxu1 %v5516_v7 }
 0x190   :  { %4806 = vmatmul.mubr.bf16.gmra.mrb[4].mxu1 %v6969_v8  ;;  %2426 = vmatmul.mubr.bf16.gmra.mrb[148].mxu0 %v5697_v31  ;;  %v5701_v8 = vld [vmem:[%s6951_s1 + $0x30] ss:$8 sps:$4 sm:$0xff]   ;;  %v5702_v31 = vld [vmem:[%s6951_s1 + $0x44] ss:$8 sps:$4 sm:$0xff]  }
 0x191   :  { %4814 = vmatpush3.bf16.msra.mxu1 %v5516_v7  ;;  %4825 = vmatprep.mubr.bf16.mxu1 %v951_v28  ;;  %v5700_v28 = vld [vmem:[%s6951_s1 + $0x34] ss:$8 sps:$4 sm:$0xff]  }
 0x192   :  { %4815 = vmatprep.subr.bf16.mxu1 %v5517_v33  ;;  %2433 = vmatprep.mubr.bf16.mxu0 %v5698_v3  ;;  %v5520_v7 = vld [vmem:[#allocation2 + $0xb0] sm:$0xff]  }
 0x193   :  { %v744_v4 = vpop.f32.mrb[44].mxu0 }
 0x194   :  { %v746_v16 = vpop.f32.mrb[45].mxu0 }
 0x195   :  { %4816 = vmatpush3.bf16.msra.mxu1 %v5517_v33  ;;  %v747_v54 = vpop.f32.mrb[46].mxu0  ;;  %v5521_v33 = vld [vmem:[#allocation2 + $0xb8] sm:$0xff]  }
 0x196   :  { %v954_v47 = vpack.c.bf16 %v747_v54, %v744_v4  ;;  %v749_v62 = vpop.f32.mrb[47].mxu0  ;;  %4817 = vmatprep.subr.bf16.mxu1 %v5518_v42 }
 0x198   :  { %2434 = vmatmul.mubr.bf16.gmra.mrb[152].mxu0 %v5699_v29  ;;  %v5524_v29 = vld [vmem:[#allocation2 + $0xd0] sm:$0xff]  }
 0x199   :  { %4818 = vmatpush3.bf16.msra.mxu1 %v5518_v42  ;;  %2441 = vmatprep.mubr.bf16.mxu0 %v5700_v28  ;;  %v5522_v42 = vld [vmem:[#allocation2 + $0xc0] sm:$0xff]  }
 0x19a   :  { %4819 = vmatprep.subr.bf16.mxu1 %v5519_v37 }
 0x19b   :  { %v752_v57 = vpop.f32.mrb[48].mxu0 }
 0x19c   :  { %v754_v30 = vpop.f32.mrb[49].mxu0 }
 0x19d   :  { %4820 = vmatpush3.bf16.msra.mxu1 %v5519_v37  ;;  %v755_v58 = vpop.f32.mrb[50].mxu0  ;;  %v5523_v37 = vld [vmem:[#allocation2 + $0xc8] sm:$0xff]  }
 0x19e   :  { %v955_v63 = vpack.c.bf16 %v755_v58, %v752_v57  ;;  %v757_v61 = vpop.f32.mrb[51].mxu0  ;;  %4821 = vmatprep.subr.bf16.mxu1 %v5520_v7 }
 0x19f   :  { %v5525_v61 = vld [vmem:[#allocation2 + $0xd8] sm:$0xff]  }
 0x1a0   :  { %2442 = vmatmul.mubr.bf16.gmra.mrb[156].mxu0 %v5701_v8 }
 0x1a1   :  { %4822 = vmatpush3.bf16.msra.mxu1 %v5520_v7  ;;  %2449 = vmatprep.mubr.bf16.mxu0 %v5702_v31 }
 0x1a2   :  { %4823 = vmatprep.subr.bf16.mxu1 %v5521_v33 }
 0x1a3   :  { %v6500_v3 = vpop.f32.mrb[52].mxu0 }
 0x1a4   :  { %v762_v4 = vpop.f32.mrb[53].mxu0 }
 0x1a5   :  { %4824 = vmatpush3.bf16.msra.mxu1 %v5521_v33  ;;  %v763_v16 = vpop.f32.mrb[54].mxu0  ;;  %v5527_v33 = vld [vmem:[#allocation2 + $0xe8] sm:$0xff]  }
 0x1a6   :  { %v956_v54 = vpack.c.bf16 %v763_v16, %v6500_v3  ;;  %v765_v62 = vpop.f32.mrb[55].mxu0  ;;  %4833 = vmatprep.subr.bf16.mxu1 %v5522_v42 }
 0x1a8   :  { %4826 = vmatmul.mubr.bf16.vlgmr.msra.gmra.mrb[0].mxu1 %v952_v36  ;;  %2450 = vmatmul.mubr.bf16.gmra.mrb[160].mxu0 %v6076_v34  ;;  %v5526_v34 = vld [vmem:[#allocation2 + $0xe0] sm:$0xff]  }
 0x1a9   :  { %4829 = vmatprep.mubr.bf16.mxu1 %v953_v12  ;;  %4834 = vmatpush3.bf16.msra.mxu1 %v5522_v42  ;;  %v5529_v42 = vld [vmem:[#allocation2 + $0xf8] sm:$0xff]  }
 0x1aa   :  { %4835 = vmatprep.subr.bf16.mxu1 %v5523_v37  ;;  %2457 = vmatprep.mubr.bf16.mxu0 %v6082_v35 }
 0x1ab   :  { %v768_v28 = vpop.f32.mrb[56].mxu0 }
 0x1ac   :  { %v770_v7 = vpop.f32.mrb[57].mxu0 }
 0x1ad   :  { %4836 = vmatpush3.bf16.msra.mxu1 %v5523_v37  ;;  %v771_v57 = vpop.f32.mrb[58].mxu0  ;;  %v5531_v37 = vld [vmem:[#allocation2 + $0x108] sm:$0xff]  }
 0x1ae   :  { %v957_v30 = vpack.c.bf16 %v771_v57, %v768_v28  ;;  %v773_v58 = vpop.f32.mrb[59].mxu0  ;;  %4837 = vmatprep.subr.bf16.mxu1 %v5524_v29 }
 0x1af   :  { %v5533_v58 = vld [vmem:[#allocation2 + $0x118] sm:$0xff]  }
 0x1b0   :  { %4830 = vmatmul.mubr.bf16.gmra.mrb[4].mxu1 %v954_v47  ;;  %2458 = vmatmul.mubr.bf16.gmra.mrb[164].mxu0 %v6096_v38  ;;  %v5528_v38 = vld [vmem:[#allocation2 + $0xf0] sm:$0xff]  }
 0x1b1   :  { %4838 = vmatpush3.bf16.msra.mxu1 %v5524_v29  ;;  %4849 = vmatprep.mubr.bf16.mxu1 %v955_v63 }
 0x1b2   :  { %4839 = vmatprep.subr.bf16.mxu1 %v5525_v61  ;;  %2465 = vmatprep.mubr.bf16.mxu0 %v6102_v39 }
 0x1b3   :  { %v776_v11 = vpop.f32.mrb[60].mxu0 }
 0x1b4   :  { %v778_v32 = vpop.f32.mrb[61].mxu0 }
 0x1b5   :  { %4840 = vmatpush3.bf16.msra.mxu1 %v5525_v61  ;;  %v779_v35 = vpop.f32.mrb[62].mxu0 }
 0x1b6   :  { %v958_v36 = vpack.c.bf16 %v779_v35, %v776_v11  ;;  %v781_v12 = vpop.f32.mrb[63].mxu0  ;;  %4841 = vmatprep.subr.bf16.mxu1 %v5526_v34  ;;  %v5535_v11 = vld [vmem:[#allocation2 + $0x128] sm:$0xff]  }
 0x1b8   :  { %2466 = vmatmul.mubr.bf16.gmra.mrb[168].mxu0 %v6110_v40  ;;  %v5530_v40 = vld [vmem:[#allocation2 + $0x100] sm:$0xff]  }
 0x1b9   :  { %4842 = vmatpush3.bf16.msra.mxu1 %v5526_v34  ;;  %2473 = vmatprep.mubr.bf16.mxu0 %v6115_v41 }
 0x1ba   :  { %4843 = vmatprep.subr.bf16.mxu1 %v5527_v33 }
 0x1bb   :  { %v784_v47 = vpop.f32.mrb[64].mxu0 }
 0x1bc   :  { %v786_v63 = vpop.f32.mrb[65].mxu0 }
 0x1bd   :  { %4844 = vmatpush3.bf16.msra.mxu1 %v5527_v33  ;;  %v787_v8 = vpop.f32.mrb[66].mxu0  ;;  %v5537_v33 = vld [vmem:[#allocation2 + $0x138] sm:$0xff]  }
 0x1be   :  { %v959_v39 = vpack.c.bf16 %v787_v8, %v784_v47  ;;  %v789_v31 = vpop.f32.mrb[67].mxu0  ;;  %4845 = vmatprep.subr.bf16.mxu1 %v5528_v38 }
 0x1bf   :  { %v5540_v31 = vld [vmem:[#allocation2 + $0x150] sm:$0xff]  }
 0x1c0   :  { %2474 = vmatmul.mubr.bf16.gmra.mrb[172].mxu0 %v6125_v43  ;;  %v5532_v43 = vld [vmem:[#allocation2 + $0x110] sm:$0xff]  }
 0x1c1   :  { %4846 = vmatpush3.bf16.msra.mxu1 %v5528_v38  ;;  %2481 = vmatprep.mubr.bf16.mxu0 %v6130_v44 }
 0x1c2   :  { %4847 = vmatprep.subr.bf16.mxu1 %v5529_v42 }
 0x1c3   :  { %v6514_v3 = vpop.f32.mrb[68].mxu0 }
 0x1c4   :  { %v794_v41 = vpop.f32.mrb[69].mxu0 }
 0x1c5   :  { %4848 = vmatpush3.bf16.msra.mxu1 %v5529_v42  ;;  %v795_v4 = vpop.f32.mrb[70].mxu0 }
 0x1c6   :  { %v960_v16 = vpack.c.bf16 %v795_v4, %v6514_v3  ;;  %v797_v62 = vpop.f32.mrb[71].mxu0  ;;  %4857 = vmatprep.subr.bf16.mxu1 %v5530_v40 }
 0x1c8   :  { %4850 = vmatmul.mubr.bf16.vlgmr.msra.gmra.mrb[0].mxu1 %v956_v54  ;;  %2482 = vmatmul.mubr.bf16.gmra.mrb[176].mxu0 %v6138_v45  ;;  %v5534_v45 = vld [vmem:[#allocation2 + $0x120] sm:$0xff]  }
 0x1c9   :  { %4853 = vmatprep.mubr.bf16.mxu1 %v957_v30  ;;  %4858 = vmatpush3.bf16.msra.mxu1 %v5530_v40 }
 0x1ca   :  { %4859 = vmatprep.subr.bf16.mxu1 %v5531_v37  ;;  %2489 = vmatprep.mubr.bf16.mxu0 %v6143_v46 }
 0x1cb   :  { %v800_v44 = vpop.f32.mrb[72].mxu0 }
 0x1cc   :  { %v802_v29 = vpop.f32.mrb[73].mxu0 }
 0x1cd   :  { %4860 = vmatpush3.bf16.msra.mxu1 %v5531_v37  ;;  %v803_v28 = vpop.f32.mrb[74].mxu0  ;;  %v5543_v29 = vld [vmem:[#allocation2 + $0x168] sm:$0xff]  }
 0x1ce   :  { %v961_v7 = vpack.c.bf16 %v803_v28, %v800_v44  ;;  %v805_v57 = vpop.f32.mrb[75].mxu0  ;;  %4861 = vmatprep.subr.bf16.mxu1 %v5532_v43 }
 0x1cf   :  { %v5575_v57 = vld [vmem:[#allocation5 + $0x14] ss:$8 sps:$4 sm:$0xff]  }
 0x1d0   :  { %4854 = vmatmul.mubr.bf16.gmra.mrb[4].mxu1 %v958_v36  ;;  %2490 = vmatmul.mubr.bf16.gmra.mrb[180].mxu0 %v6153_v48  ;;  %v5536_v48 = vld [vmem:[#allocation2 + $0x130] sm:$0xff]  }
 0x1d1   :  { %4862 = vmatpush3.bf16.msra.mxu1 %v5532_v43  ;;  %4873 = vmatprep.mubr.bf16.mxu1 %v959_v39  ;;  %v5539_v39 = vld [vmem:[#allocation2 + $0x148] sm:$0xff]  }
 0x1d2   :  { %4863 = vmatprep.subr.bf16.mxu1 %v5533_v58  ;;  %2497 = vmatprep.mubr.bf16.mxu0 %v6158_v49 }
 0x1d3   :  { %v808_v54 = vpop.f32.mrb[76].mxu0 }
 0x1d4   :  { %v810_v30 = vpop.f32.mrb[77].mxu0 }
 0x1d5   :  { %4864 = vmatpush3.bf16.msra.mxu1 %v5533_v58  ;;  %v811_v46 = vpop.f32.mrb[78].mxu0  ;;  %v5545_v30 = vld [vmem:[#allocation2 + $0x178] sm:$0xff]  }
 0x1d6   :  { %v962_v61 = vpack.c.bf16 %v811_v46, %v808_v54  ;;  %v813_v34 = vpop.f32.mrb[79].mxu0  ;;  %4865 = vmatprep.subr.bf16.mxu1 %v5534_v45 }
 0x1d8   :  { %2498 = vmatmul.mubr.bf16.gmra.mrb[184].mxu0 %v6166_v50  ;;  %v5538_v50 = vld [vmem:[#allocation2 + $0x140] sm:$0xff]  }
 0x1d9   :  { %4866 = vmatpush3.bf16.msra.mxu1 %v5534_v45  ;;  %2505 = vmatprep.mubr.bf16.mxu0 %v6171_v51 }
 0x1da   :  { %4867 = vmatprep.subr.bf16.mxu1 %v5535_v11 }
 0x1db   :  { %v816_v32 = vpop.f32.mrb[80].mxu0 }
 0x1dc   :  { %v818_v35 = vpop.f32.mrb[81].mxu0 }
 0x1dd   :  { %4868 = vmatpush3.bf16.msra.mxu1 %v5535_v11  ;;  %v819_v36 = vpop.f32.mrb[82].mxu0 }
 0x1de   :  { %v963_v49 = vpack.c.bf16 %v819_v36, %v816_v32  ;;  %v821_v12 = vpop.f32.mrb[83].mxu0  ;;  %4869 = vmatprep.subr.bf16.mxu1 %v5536_v48  ;;  %v5578_v36 = vld [vmem:[#allocation5 + $0x24] ss:$8 sps:$4 sm:$0xff]  }
 0x1e0   :  { %2506 = vmatmul.mubr.bf16.gmra.mrb[188].mxu0 %v6178_v52  ;;  %v5570_v52 = vld [vmem:[#allocation5] ss:$8 sps:$4 sm:$0xff]  }
 0x1e1   :  { %4870 = vmatpush3.bf16.msra.mxu1 %v5536_v48  ;;  %2513 = vmatprep.mubr.bf16.mxu0 %v6183_v53  ;;  %v5572_v53 = vld [vmem:[#allocation5 + $0x4] ss:$8 sps:$4 sm:$0xff]  }
 0x1e2   :  { %4871 = vmatprep.subr.bf16.mxu1 %v5537_v33  ;;  %3863 = vmatprep.subr.bf16.mxu0 %v5572_v53  ;;  %v5547_v48 = vld [vmem:[#allocation2 + $0x188] sm:$0xff]  }
 0x1e3   :  { %v6525_v38 = vpop.f32.mrb[84].mxu0  ;;  %3864 = vmatpush1.bf16.msra.mxu0 %v5570_v52 }
 0x1e4   :  { %v826_v51 = vpop.f32.mrb[85].mxu0  ;;  %3865 = vmatprep.subr.bf16.mxu0 %v5575_v57 }
 0x1e5   :  { %4872 = vmatpush3.bf16.msra.mxu1 %v5537_v33  ;;  %v6527_v47 = vpop.f32.mrb[86].mxu0  ;;  %v5549_v33 = vld [vmem:[#allocation2 + $0x198] sm:$0xff]  }
 0x1e6   :  { %v964_v63 = vpack.c.bf16 %v6527_v47, %v6525_v38  ;;  %v829_v8 = vpop.f32.mrb[87].mxu0  ;;  %4881 = vmatprep.subr.bf16.mxu1 %v5538_v50 }
 0x1e7   :  { %v5551_v8 = vld [vmem:[#allocation2 + $0x1a8] sm:$0xff]  }
 0x1e8   :  { %4874 = vmatmul.mubr.bf16.vlgmr.msra.gmra.mrb[0].mxu1 %v960_v16  ;;  %2514 = vmatmul.mubr.bf16.gmra.mrb[192].mxu0 %v6193_v55  ;;  %v5541_v16 = vld [vmem:[#allocation2 + $0x158] sm:$0xff]   ;;  %v5542_v55 = vld [vmem:[#allocation2 + $0x160] sm:$0xff]  }
 0x1e9   :  { %4877 = vmatprep.mubr.bf16.mxu1 %v961_v7  ;;  %4882 = vmatpush3.bf16.msra.mxu1 %v5538_v50  ;;  %v5573_v7 = vld [vmem:[#allocation5 + $0x10] ss:$8 sps:$4 sm:$0xff]   ;;  %v5576_v50 = vld [vmem:[#allocation5 + $0x20] ss:$8 sps:$4 sm:$0xff]  }
 0x1ea   :  { %4883 = vmatprep.subr.bf16.mxu1 %v5539_v39  ;;  %2521 = vmatprep.mubr.bf16.mxu0 %v6199_v56 }
 0x1eb   :  { %v832_v42 = vpop.f32.mrb[88].mxu0  ;;  %3866 = vmatpush1.bf16.msra.mxu0 %v5573_v7 }
 0x1ec   :  { %v834_v40 = vpop.f32.mrb[89].mxu0  ;;  %3867 = vmatprep.subr.bf16.mxu0 %v5578_v36 }
 0x1ed   :  { %4884 = vmatpush3.bf16.msra.mxu1 %v5539_v39  ;;  %v835_v3 = vpop.f32.mrb[90].mxu0  ;;  %v5579_v40 = vld [vmem:[#allocation5 + $0x30] ss:$8 sps:$4 sm:$0xff]  }
 0x1ee   :  { %v965_v41 = vpack.c.bf16 %v835_v3, %v832_v42  ;;  %v837_v4 = vpop.f32.mrb[91].mxu0  ;;  %4885 = vmatprep.subr.bf16.mxu1 %v5540_v31  ;;  %v5553_v42 = vld [vmem:[#allocation2 + $0x1b8] sm:$0xff]  }
 0x1ef   :  { %3868 = vmatpush1.bf16.msra.mxu0 %v5576_v50  ;;  %v5581_v3 = vld [vmem:[#allocation5 + $0x34] ss:$8 sps:$4 sm:$0xff]  }
 0x1f0   :  { %4878 = vmatmul.mubr.bf16.gmra.mrb[4].mxu1 %v962_v61  ;;  %2522 = vmatmul.mubr.bf16.gmra.mrb[196].mxu0 %v6206_v59  ;;  %v5544_v59 = vld [vmem:[#allocation2 + $0x170] sm:$0xff]   ;;  %v5565_v50 = vld [vmem:[#allocation2 + $0x218] sm:$0xff]  }
 0x1f1   :  { %4886 = vmatpush3.bf16.msra.mxu1 %v5540_v31  ;;  %4897 = vmatprep.mubr.bf16.mxu1 %v963_v49 }
 0x1f2   :  { %4887 = vmatprep.subr.bf16.mxu1 %v5541_v16  ;;  %2529 = vmatprep.mubr.bf16.mxu0 %v6211_v60 }
 0x1f3   :  { %v840_v56 = vpop.f32.mrb[92].mxu0  ;;  %3869 = vmatprep.subr.bf16.mxu0 %v5581_v3 }
 0x1f4   :  { %v842_v62 = vpop.f32.mrb[93].mxu0  ;;  %3870 = vmatpush1.bf16.msra.mxu0 %v5579_v40 }
 0x1f5   :  { %4888 = vmatpush3.bf16.msra.mxu1 %v5541_v16  ;;  %v843_v37 = vpop.f32.mrb[94].mxu0 }
 0x1f6   :  { %v966_v43 = vpack.c.bf16 %v843_v37, %v840_v56  ;;  %v845_v44 = vpop.f32.mrb[95].mxu0  ;;  %4889 = vmatprep.subr.bf16.mxu1 %v5542_v55  ;;  %v5555_v56 = vld [vmem:[#allocation2 + $0x1c8] sm:$0xff]  }
 0x1f8   :  { %2530 = vmatmul.mubr.bf16.gmra.mrb[200].mxu0 %v6221_v1  ;;  %v5546_v1 = vld [vmem:[#allocation2 + $0x180] sm:$0xff]  }
 0x1f9   :  { %4890 = vmatpush3.bf16.msra.mxu1 %v5542_v55  ;;  %2537 = vmatprep.mubr.bf16.mxu0 %v6226_v2 }
 0x1fa   :  { %4891 = vmatprep.subr.bf16.mxu1 %v5543_v29 }
 0x1fb   :  { %v848_v28 = vpop.f32.mrb[96].mxu0 }
 0x1fc   :  { %v850_v58 = vpop.f32.mrb[97].mxu0 }
 0x1fd   :  { %4892 = vmatpush3.bf16.msra.mxu1 %v5543_v29  ;;  %v851_v60 = vpop.f32.mrb[98].mxu0  ;;  %v5557_v29 = vld [vmem:[#allocation2 + $0x1d8] sm:$0xff]  }
 0x1fe   :  { %v967_v45 = vpack.c.bf16 %v851_v60, %v848_v28  ;;  %v853_v54 = vpop.f32.mrb[99].mxu0  ;;  %4893 = vmatprep.subr.bf16.mxu1 %v5544_v59  ;;  %v5558_v28 = vld [vmem:[#allocation2 + $0x1e0] sm:$0xff]  }
 0x200   :  { %2538 = vmatmul.mubr.bf16.gmra.mrb[204].mxu0 %v6234_v5  ;;  %v5548_v5 = vld [vmem:[#allocation2 + $0x190] sm:$0xff]  }
 0x201   :  { %4894 = vmatpush3.bf16.msra.mxu1 %v5544_v59  ;;  %2545 = vmatprep.mubr.bf16.mxu0 %v6239_v6  ;;  %v5584_v59 = vld [vmem:[#allocation5 + $0x44] ss:$8 sps:$4 sm:$0xff]  }
 0x202   :  { %4895 = vmatprep.subr.bf16.mxu1 %v5545_v30  ;;  %3871 = vmatprep.subr.bf16.mxu0 %v5584_v59  ;;  %v5710_v59 = vld [vmem:[%s6951_s1 + $0x1d4] ss:$8 sps:$4 sm:$0xff]  }
 0x203   :  { %v6539_v2 = vpop.f32.mrb[100].mxu0 }
 0x204   :  { %v858_v46 = vpop.f32.mrb[101].mxu0 }
 0x205   :  { %4896 = vmatpush3.bf16.msra.mxu1 %v5545_v30  ;;  %v6541_v61 = vpop.f32.mrb[102].mxu0  ;;  %v5561_v46 = vld [vmem:[#allocation2 + $0x1f8] sm:$0xff]  }
 0x206   :  { %v968_v34 = vpack.c.bf16 %v6541_v61, %v6539_v2  ;;  %v861_v11 = vpop.f32.mrb[103].mxu0  ;;  %4905 = vmatprep.subr.bf16.mxu1 %v5546_v1  ;;  %v5585_v61 = vld [vmem:[#allocation5 + $0x50] ss:$8 sps:$4 sm:$0xff]  }
 0x208   :  { %4898 = vmatmul.mubr.bf16.vlgmr.msra.gmra.mrb[0].mxu1 %v964_v63  ;;  %2546 = vmatmul.mubr.bf16.gmra.mrb[208].mxu0 %v6246_v9  ;;  %v5550_v9 = vld [vmem:[#allocation2 + $0x1a0] sm:$0xff]  }
 0x209   :  { %4901 = vmatprep.mubr.bf16.mxu1 %v965_v41  ;;  %4906 = vmatpush3.bf16.msra.mxu1 %v5546_v1 }
 0x20a   :  { %4907 = vmatprep.subr.bf16.mxu1 %v5547_v48  ;;  %2553 = vmatprep.mubr.bf16.mxu0 %v6251_v10 }
 0x20b   :  { %v864_v6 = vpop.f32.mrb[104].mxu0 }
 0x20c   :  { %v866_v32 = vpop.f32.mrb[105].mxu0 }
 0x20d   :  { %4908 = vmatpush3.bf16.msra.mxu1 %v5547_v48  ;;  %v867_v35 = vpop.f32.mrb[106].mxu0  ;;  %v6970_v32 = vld [vmem:[#allocation11_spill] sm:$0xff] }
 0x20e   :  { %v969_v49 = vpack.c.bf16 %v867_v35, %v864_v6  ;;  %v869_v12 = vpop.f32.mrb[107].mxu0  ;;  %4909 = vmatprep.subr.bf16.mxu1 %v5548_v5 }
 0x210   :  { %4902 = vmatmul.mubr.bf16.gmra.mrb[4].mxu1 %v966_v43  ;;  %2554 = vmatmul.mubr.bf16.gmra.mrb[212].mxu0 %v6265_v13  ;;  %v5552_v13 = vld [vmem:[#allocation2 + $0x1b0] sm:$0xff]  }
 0x211   :  { %4910 = vmatpush3.bf16.msra.mxu1 %v5548_v5  ;;  %4921 = vmatprep.mubr.bf16.mxu1 %v967_v45  ;;  %v5559_v45 = vld [vmem:[#allocation2 + $0x1e8] sm:$0xff]  }
 0x212   :  { %4911 = vmatprep.subr.bf16.mxu1 %v5549_v33  ;;  %2561 = vmatprep.mubr.bf16.mxu0 %v6270_v14 }
 0x213   :  { %v872_v10 = vpop.f32.mrb[108].mxu0 }
 0x214   :  { %v874_v38 = vpop.f32.mrb[109].mxu0 }
 0x215   :  { %4912 = vmatpush3.bf16.msra.mxu1 %v5549_v33  ;;  %v875_v51 = vpop.f32.mrb[110].mxu0 }
 0x216   :  { %v970_v47 = vpack.c.bf16 %v875_v51, %v872_v10  ;;  %v877_v63 = vpop.f32.mrb[111].mxu0  ;;  %4913 = vmatprep.subr.bf16.mxu1 %v5550_v9  ;;  %v6972_v10 = vld [vmem:[#allocation13_spill] sm:$0xff] }
 0x217   :  { %v5590_v63 = vld [vmem:[#allocation5 + $0x64] ss:$8 sps:$4 sm:$0xff]  }
 0x218   :  { %2562 = vmatmul.mubr.bf16.gmra.mrb[216].mxu0 %v6277_v15  ;;  %v5554_v15 = vld [vmem:[#allocation2 + $0x1c0] sm:$0xff]  }
 0x219   :  { %4914 = vmatpush3.bf16.msra.mxu1 %v5550_v9  ;;  %2569 = vmatprep.mubr.bf16.mxu0 %v6282_v0  ;;  %v6971_v9 = vld [vmem:[#allocation12_spill] sm:$0xff] }
 0x21a   :  { %4915 = vmatprep.subr.bf16.mxu1 %v5551_v8 }
 0x21b   :  { %v880_v39 = vpop.f32.mrb[112].mxu0 }
 0x21c   :  { %v882_v52 = vpop.f32.mrb[113].mxu0 }
 0x21d   :  { %4916 = vmatpush3.bf16.msra.mxu1 %v5551_v8  ;;  %v883_v14 = vpop.f32.mrb[114].mxu0  ;;  %v5588_v52 = vld [vmem:[#allocation5 + $0x60] ss:$8 sps:$4 sm:$0xff]  }
 0x21e   :  { %v971_v53 = vpack.c.bf16 %v883_v14, %v880_v39  ;;  %v885_v31 = vpop.f32.mrb[115].mxu0  ;;  %4917 = vmatprep.subr.bf16.mxu1 %v5552_v13  ;;  %v5567_v39 = vld [vmem:[#allocation2 + $0x228] sm:$0xff]  }
 0x21f   :  { %v5703_v14 = vld [vmem:[%s6951_s1 + $0x1a0] ss:$8 sps:$4 sm:$0xff]   ;;  %v5568_v31 = vld [vmem:[#allocation2 + $0x230] sm:$0xff]  }
 0x220   :  { %2570 = vmatmul.mubr.bf16.gmra.mrb[220].mxu0 %v6292_v17  ;;  %v5556_v17 = vld [vmem:[#allocation2 + $0x1d0] sm:$0xff]  }
 0x221   :  { %4918 = vmatpush3.bf16.msra.mxu1 %v5552_v13  ;;  %2577 = vmatprep.mubr.bf16.mxu0 %v6297_v18 }
 0x222   :  { %4919 = vmatprep.subr.bf16.mxu1 %v5553_v42 }
 0x223   :  { %v6556_v0 = vpop.f32.mrb[116].mxu0 }
 0x224   :  { %v890_v41 = vpop.f32.mrb[117].mxu0 }
 0x225   :  { %4920 = vmatpush3.bf16.msra.mxu1 %v5553_v42  ;;  %v6558_v4 = vpop.f32.mrb[118].mxu0  ;;  %v5569_v41 = vld [vmem:[#allocation2 + $0x238] sm:$0xff]  }
 0x226   :  { %v972_v16 = vpack.c.bf16 %v6558_v4, %v6556_v0  ;;  %v893_v55 = vpop.f32.mrb[119].mxu0  ;;  %4929 = vmatprep.subr.bf16.mxu1 %v5554_v15  ;;  %v5705_v4 = vld [vmem:[%s6951_s1 + $0x1b0] ss:$8 sps:$4 sm:$0xff]  }
 0x228   :  { %4922 = vmatmul.mubr.bf16.vlgmr.msra.gmra.mrb[0].mxu1 %v968_v34  ;;  %2578 = vmatmul.mubr.bf16.gmra.mrb[224].mxu0 %v6304_v19  ;;  %v5582_v19 = vld [vmem:[#allocation5 + $0x40] ss:$8 sps:$4 sm:$0xff]   ;;  %v5587_v34 = vld [vmem:[#allocation5 + $0x54] ss:$8 sps:$4 sm:$0xff]  }
 0x229   :  { %4925 = vmatprep.mubr.bf16.mxu1 %v969_v49  ;;  %4930 = vmatpush3.bf16.msra.mxu1 %v5554_v15 }
 0x22a   :  { %4931 = vmatprep.subr.bf16.mxu1 %v5555_v56  ;;  %2585 = vmatprep.mubr.bf16.mxu0 %v6309_v20 }
 0x22b   :  { %v896_v18 = vpop.f32.mrb[120].mxu0  ;;  %3872 = vmatpush1.bf16.msra.mxu0 %v5582_v19  ;;  %v5709_v19 = vld [vmem:[#allocation2 + $0x48] sm:$0xff]  }
 0x22c   :  { %v898_v62 = vpop.f32.mrb[121].mxu0  ;;  %3873 = vmatprep.subr.bf16.mxu0 %v5587_v34  ;;  %v5717_v34 = vld [vmem:[%s6951_s1 + $0x1f4] ss:$8 sps:$4 sm:$0xff]  }
 0x22d   :  { %4932 = vmatpush3.bf16.msra.mxu1 %v5555_v56  ;;  %v899_v37 = vpop.f32.mrb[122].mxu0 }
 0x22e   :  { %v973_v43 = vpack.c.bf16 %v899_v37, %v896_v18  ;;  %v901_v44 = vpop.f32.mrb[123].mxu0  ;;  %4933 = vmatprep.subr.bf16.mxu1 %v5556_v17  ;;  %v5707_v37 = vld [vmem:[#allocation2 + $0x40] sm:$0xff]  }
 0x22f   :  { %3874 = vmatpush1.bf16.msra.mxu0 %v5585_v61  ;;  %v5591_v44 = vld [vmem:[#allocation5 + $0x70] ss:$8 sps:$4 sm:$0xff]   ;;  %v5716_v61 = vld [vmem:[%s6951_s1 + $0x1e0] ss:$8 sps:$4 sm:$0xff]  }
 0x230   :  { %4926 = vmatmul.mubr.bf16.gmra.mrb[4].mxu1 %v970_v47  ;;  %2586 = vmatmul.mubr.bf16.gmra.mrb[228].mxu0 %v6316_v21  ;;  %v5560_v21 = vld [vmem:[#allocation2 + $0x1f0] sm:$0xff]  }
 0x231   :  { %4934 = vmatpush3.bf16.msra.mxu1 %v5556_v17  ;;  %4945 = vmatprep.mubr.bf16.mxu1 %v971_v53  ;;  %v5704_v53 = vld [vmem:[%s6951_s1 + $0x1b4] ss:$8 sps:$4 sm:$0xff]  }
 0x232   :  { %4935 = vmatprep.subr.bf16.mxu1 %v5557_v29  ;;  %2593 = vmatprep.mubr.bf16.mxu0 %v6321_v22 }
 0x233   :  { %v904_v20 = vpop.f32.mrb[124].mxu0  ;;  %3875 = vmatprep.subr.bf16.mxu0 %v5590_v63  ;;  %v5726_v63 = vld [vmem:[#allocation2 + $0x8] sm:$0xff]  }
 0x234   :  { %v906_v7 = vpop.f32.mrb[125].mxu0  ;;  %3876 = vmatpush1.bf16.msra.mxu0 %v5588_v52 }
 0x235   :  { %4936 = vmatpush3.bf16.msra.mxu1 %v5557_v29  ;;  %v907_v57 = vpop.f32.mrb[126].mxu0  ;;  %v5593_v29 = vld [vmem:[#allocation5 + $0x74] ss:$8 sps:$4 sm:$0xff]  }
 0x236   :  { %v974_v58 = vpack.c.bf16 %v907_v57, %v904_v20  ;;  %v909_v60 = vpop.f32.mrb[127].mxu0  ;;  %4937 = vmatprep.subr.bf16.mxu1 %v5558_v28  ;;  %3877 = vmatprep.subr.bf16.mxu0 %v5593_v29  ;;  %v5732_v29 = vld [vmem:[%s6951_s1 + $0x220] ss:$8 sps:$4 sm:$0xff]  }
 0x237   :  { %v5711_v60 = vld [vmem:[#allocation2 + $0x50] sm:$0xff]  }
 0x238   :  { %2594 = vmatmul.mubr.bf16.gmra.mrb[232].mxu0 %v6328_v23  ;;  %v5562_v23 = vld [vmem:[#allocation2 + $0x200] sm:$0xff]  }
 0x239   :  { %4938 = vmatpush3.bf16.msra.mxu1 %v5558_v28  ;;  %2601 = vmatprep.mubr.bf16.mxu0 %v6333_v24 }
 0x23a   :  { %4939 = vmatprep.subr.bf16.mxu1 %v5559_v45  ;;  %3878 = vmatpush1.bf16.msra.mxu0 %v5591_v44 }
 0x23b   :  { %v912_v54 = vpop.f32.mrb[128].mxu0 }
 0x23c   :  { %v914_v30 = vpop.f32.mrb[129].mxu0 }
 0x23d   :  { %4940 = vmatpush3.bf16.msra.mxu1 %v5559_v45  ;;  %v915_v22 = vpop.f32.mrb[130].mxu0  ;;  %v5712_v45 = vld [vmem:[%s6951_s1 + $0x1d0] ss:$8 sps:$4 sm:$0xff]  }
 0x23e   :  { %v975_v1 = vpack.c.bf16 %v915_v22, %v912_v54  ;;  %v917_v2 = vpop.f32.mrb[131].mxu0  ;;  %4941 = vmatprep.subr.bf16.mxu1 %v5560_v21  ;;  %v5714_v54 = vld [vmem:[#allocation2 + $0x58] sm:$0xff]  }
 0x240   :  { %2602 = vmatmul.mubr.bf16.gmra.mrb[236].mxu0 %v6340_v25  ;;  %v5563_v25 = vld [vmem:[#allocation2 + $0x208] sm:$0xff]  }
 0x241   :  { %4942 = vmatpush3.bf16.msra.mxu1 %v5560_v21  ;;  %2609 = vmatprep.mubr.bf16.mxu0 %v6345_v26  ;;  %v5564_v26 = vld [vmem:[#allocation2 + $0x210] sm:$0xff]   ;;  %v5713_v21 = vld [vmem:[%s6951_s1 + $0x1e4] ss:$8 sps:$4 sm:$0xff]  }
 0x242   :  { %4943 = vmatprep.subr.bf16.mxu1 %v5561_v46 }
 0x243   :  { %v6573_v24 = vpop.f32.mrb[132].mxu0 }
 0x244   :  { %v922_v11 = vpop.f32.mrb[133].mxu0 }
 0x245   :  { %4944 = vmatpush3.bf16.msra.mxu1 %v5561_v46  ;;  %v6575_v48 = vpop.f32.mrb[134].mxu0  ;;  %v5596_v11 = vld [vmem:[#allocation5 + $0x84] ss:$8 sps:$4 sm:$0xff]  }
 0x246   :  { %v976_v5 = vpack.c.bf16 %v6575_v48, %v6573_v24  ;;  %v925_v6 = vpop.f32.mrb[135].mxu0  ;;  %4953 = vmatprep.subr.bf16.mxu1 %v5562_v23  ;;  %v5594_v24 = vld [vmem:[#allocation5 + $0x80] ss:$8 sps:$4 sm:$0xff]   ;;  %3879 = vmatprep.subr.bf16.mxu0 %v5596_v11 }
 0x247   :  { %v5718_v48 = vld [vmem:[#allocation2 + $0x68] sm:$0xff]   ;;  %3880 = vmatpush1.bf16.msra.mxu0 %v5594_v24 }
 0x248   :  { %4946 = vmatmul.mubr.bf16.vlgmr.msra.gmra.mrb[0].mxu1 %v972_v16  ;;  %2610 = vmatmul.mubr.bf16.gmra.mrb[240].mxu0 %v6352_v27  ;;  %v5566_v27 = vld [vmem:[#allocation2 + $0x220] sm:$0xff]  }
 0x249   :  { %4949 = vmatprep.mubr.bf16.mxu1 %v973_v43  ;;  %4954 = vmatpush3.bf16.msra.mxu1 %v5562_v23  ;;  %v5706_v16 = vld [vmem:[%s6951_s1 + $0x1c4] ss:$8 sps:$4 sm:$0xff]   ;;  %v5708_v43 = vld [vmem:[%s6951_s1 + $0x1c0] ss:$8 sps:$4 sm:$0xff]  }
 0x24a   :  { %4955 = vmatprep.subr.bf16.mxu1 %v5563_v25  ;;  %2617 = vmatprep.mubr.bf16.mxu0 %v6970_v32  ;;  %v5715_v23 = vld [vmem:[#allocation2 + $0x60] sm:$0xff]  }
 0x24b   :  { %v928_v35 = vpop.f32.mrb[136].mxu0 }
 0x24c   :  { %v930_v36 = vpop.f32.mrb[137].mxu0 }
 0x24d   :  { %4956 = vmatpush3.bf16.msra.mxu1 %v5563_v25  ;;  %v931_v49 = vpop.f32.mrb[138].mxu0  ;;  %v5720_v36 = vld [vmem:[%s6951_s1 + $0x1f0] ss:$8 sps:$4 sm:$0xff]  }
 0x24e   :  { %v977_v12 = vpack.c.bf16 %v931_v49, %v928_v35  ;;  %v933_v33 = vpop.f32.mrb[139].mxu0  ;;  %4957 = vmatprep.subr.bf16.mxu1 %v5564_v26  ;;  %v5719_v35 = vld [vmem:[#allocation2 + $0x70] sm:$0xff]   ;;  %v5721_v49 = vld [vmem:[%s6951_s1 + $0x204] ss:$8 sps:$4 sm:$0xff]  }
 0x250   :  { %4950 = vmatmul.mubr.bf16.gmra.mrb[4].mxu1 %v974_v58  ;;  %2618 = vmatmul.mubr.bf16.gmra.mrb[244].mxu0 %v6971_v9 }
 0x251   :  { %4958 = vmatpush3.bf16.msra.mxu1 %v5564_v26  ;;  %4969 = vmatprep.mubr.bf16.mxu1 %v975_v1 }
 0x252   :  { %4959 = vmatprep.subr.bf16.mxu1 %v5565_v50  ;;  %2625 = vmatprep.mubr.bf16.mxu0 %v6972_v10 }
 0x253   :  { %v936_v38 = vpop.f32.mrb[140].mxu0 }
 0x254   :  { %v938_v51 = vpop.f32.mrb[141].mxu0 }
 0x255   :  { %4960 = vmatpush3.bf16.msra.mxu1 %v5565_v50  ;;  %v939_v47 = vpop.f32.mrb[142].mxu0  ;;  %v5724_v51 = vld [vmem:[%s6951_s1 + $0x200] ss:$8 sps:$4 sm:$0xff]  }
 0x256   :  { %v978_v8 = vpack.c.bf16 %v939_v47, %v936_v38  ;;  %v941_v13 = vpop.f32.mrb[143].mxu0  ;;  %4961 = vmatprep.subr.bf16.mxu1 %v5566_v27  ;;  %v5723_v38 = vld [vmem:[#allocation2] sm:$0xff]   ;;  %v5725_v47 = vld [vmem:[%s6951_s1 + $0x214] ss:$8 sps:$4 sm:$0xff]  }
 0x257   :  { %v5599_v13 = vld [vmem:[#allocation5 + $0x94] ss:$8 sps:$4 sm:$0xff]  }
 0x258   :  { %2626 = vmatmul.mubr.bf16.gmra.mrb[248].mxu0 %v5703_v14  ;;  %3881 = vmatprep.subr.bf16.mxu0 %v5599_v13  ;;  %v3504_v13 = vlaneseq }
 0x259   :  { %4962 = vmatpush3.bf16.msra.mxu1 %v5566_v27  ;;  %2633 = vmatprep.mubr.bf16.mxu0 %v5704_v53  ;;  %v5727_v53 = vld [vmem:[#allocation2 + $0x10] sm:$0xff]  }
 0x25a   :  { %4963 = vmatprep.subr.bf16.mxu1 %v5567_v39 }
 0x25b   :  { %v6592_v42 = vpop.f32.mrb[144].mxu0 }
 0x25c   :  { %v2421_v40 = vpop.f32.mrb[145].mxu0 }
 0x25d   :  { %4964 = vmatpush3.bf16.msra.mxu1 %v5567_v39  ;;  %v6594_v3 = vpop.f32.mrb[146].mxu0 }
 0x25e   :  { %v2706_v15 = vpack.c.bf16 %v6594_v3, %v6592_v42  ;;  %v2424_v0 = vpop.f32.mrb[147].mxu0  ;;  %4965 = vmatprep.subr.bf16.mxu1 %v5568_v31  ;;  %v5736_v42 = vld [vmem:[%s6951_s1 + $0x230] ss:$8 sps:$4 sm:$0xff]  }
 0x25f   :  { %v5728_v0 = vld [vmem:[%s6951_s1 + $0x210] ss:$8 sps:$4 sm:$0xff]  }
 0x260   :  { %2634 = vmatmul.mubr.bf16.gmra.mrb[252].mxu0 %v5705_v4  ;;  %v5730_v4 = vld [vmem:[#allocation2 + $0x18] sm:$0xff]  }
 0x261   :  { %4966 = vmatpush3.bf16.msra.mxu1 %v5568_v31  ;;  %2641 = vmatprep.mubr.bf16.mxu0 %v5706_v16  ;;  %v5737_v3 = vld [vmem:[#allocation2 + $0x38] sm:$0xff]  }
 0x262   :  { %4967 = vmatprep.subr.bf16.mxu1 %v5569_v41 }
 0x263   :  { %v6604_v55 = vpop.f32.mrb[148].mxu0 }
 0x264   :  { %v2429_v56 = vpop.f32.mrb[149].mxu0 }
 0x265   :  { %4968 = vmatpush3.bf16.msra.mxu1 %v5569_v41  ;;  %v6606_v17 = vpop.f32.mrb[150].mxu0  ;;  %v5729_v41 = vld [vmem:[%s6951_s1 + $0x224] ss:$8 sps:$4 sm:$0xff]  }
 0x266   :  { %v2707_v18 = vpack.c.bf16 %v6606_v17, %v6604_v55  ;;  %v2432_v62 = vpop.f32.mrb[151].mxu0  ;;  %4977 = vmatprep.subr.bf16.mxu1 %v5707_v37  ;;  %v5603_v17 = vld [vmem:[#allocation5 + $0xb0] ss:$8 sps:$4 sm:$0xff]  }
 0x268   :  { %4970 = vmatmul.mubr.bf16.vlgmr.msra.gmra.mrb[0].mxu1 %v976_v5  ;;  %2642 = vmatmul.mubr.bf16.gmra.mrb[0].mxu0 %v5708_v43  ;;  %v5731_v43 = vld [vmem:[#allocation2 + $0x20] sm:$0xff]  }
 0x269   :  { %4973 = vmatprep.mubr.bf16.mxu1 %v977_v12  ;;  %4978 = vmatpush3.bf16.msra.mxu1 %v5707_v37  ;;  %v5722_v12 = vld [vmem:[#allocation2 + $0x78] sm:$0xff]  }
 0x26a   :  { %4979 = vmatprep.subr.bf16.mxu1 %v5709_v19  ;;  %2649 = vmatprep.mubr.bf16.mxu0 %v5710_v59  ;;  %v5734_v59 = vld [vmem:[%s6951_s1 + $0x234] ss:$8 sps:$4 sm:$0xff]   ;;  %s5876_s1 = smov [#allocation7]  }
 0x26b   :  { %v6619_v28 = vpop.f32.mrb[152].mxu0  ;;  %s4237_s20 = sshll.u32 %s5876_s1, 4  ;;  %s4238_s20 = int_to_ptr.vmem [resolvable:$true] %s4237_s20 }
 0x26c   :  { %v2437_v20 = vpop.f32.mrb[153].mxu0  ;;  %p5843_p3 = scmp.lt.s32.totalorder %s4238_s20, %s4238_s20 }
 0x26d   :  { %4980 = vmatpush3.bf16.msra.mxu1 %v5709_v19  ;;  %v6621_v7 = vpop.f32.mrb[154].mxu0  ;;  %v5733_v19 = vld [vmem:[#allocation2 + $0x28] sm:$0xff]  }
 0x26e   :  { %v2708_v57 = vpack.c.bf16 %v6621_v7, %v6619_v28  ;;  %v2440_v58 = vpop.f32.mrb[155].mxu0  ;;  %4981 = vmatprep.subr.bf16.mxu1 %v5711_v60  ;;  %v5741_v28 = vld [vmem:[#allocation2 + $0x98] sm:$0xff]  }
 0x270   :  { %4974 = vmatmul.mubr.bf16.gmra.mrb[4].mxu1 %v978_v8  ;;  %2650 = vmatmul.mubr.bf16.gmra.mrb[4].mxu0 %v5712_v45  ;;  %v5597_v8 = vld [vmem:[#allocation5 + $0x90] ss:$8 sps:$4 sm:$0xff]   ;;  %v5600_v45 = vld [vmem:[#allocation5 + $0xa0] ss:$8 sps:$4 sm:$0xff]  }
 0x271   :  { %4982 = vmatpush3.bf16.msra.mxu1 %v5711_v60  ;;  %2657 = vmatprep.mubr.bf16.mxu0 %v5713_v21  ;;  %v5602_v21 = vld [vmem:[#allocation5 + $0xa4] ss:$8 sps:$4 sm:$0xff]  }
 0x272   :  { %4983 = vmatprep.subr.bf16.mxu1 %v5714_v54  ;;  %3882 = vmatpush1.bf16.msra.mxu0 %v5597_v8  ;;  %v5612_v8 = vld [vmem:[#allocation5 + $0xe0] ss:$8 sps:$4 sm:$0xff]  }
 0x273   :  { %v6631_v30 = vpop.f32.mrb[156].mxu0  ;;  %3883 = vmatprep.subr.bf16.mxu0 %v5602_v21  ;;  %v5621_v21 = vld [vmem:[#allocation5 + $0x110] ss:$8 sps:$4 sm:$0xff]  }
 0x274   :  { %v2445_v22 = vpop.f32.mrb[157].mxu0 }
 0x275   :  { %4984 = vmatpush3.bf16.msra.mxu1 %v5714_v54  ;;  %v6633_v1 = vpop.f32.mrb[158].mxu0  ;;  %v5735_v54 = vld [vmem:[#allocation2 + $0x30] sm:$0xff]  }
 0x276   :  { %v2709_v2 = vpack.c.bf16 %v6633_v1, %v6631_v30  ;;  %v2448_v46 = vpop.f32.mrb[159].mxu0  ;;  %4985 = vmatprep.subr.bf16.mxu1 %v5715_v23  ;;  %3884 = vmatpush1.bf16.msra.mxu0 %v5600_v45  ;;  %v5747_v45 = vld [vmem:[#allocation2 + $0xc8] sm:$0xff]  }
 0x278   :  { %2658 = vmatmul.mubr.bf16.gmra.mrb[8].mxu0 %v5716_v61 }
 0x279   :  { %4986 = vmatpush3.bf16.msra.mxu1 %v5715_v23  ;;  %2665 = vmatprep.mubr.bf16.mxu0 %v5717_v34  ;;  %v5738_v34 = vld [vmem:[#allocation2 + $0x80] sm:$0xff]  }
 0x27a   :  { %4987 = vmatprep.subr.bf16.mxu1 %v5718_v48 }
 0x27b   :  { %v2451_v5 = vpop.f32.mrb[160].mxu0 }
 0x27c   :  { %v2453_v6 = vpop.f32.mrb[161].mxu0 }
 0x27d   :  { %4988 = vmatpush3.bf16.msra.mxu1 %v5718_v48  ;;  %v2454_v25 = vpop.f32.mrb[162].mxu0  ;;  %v5739_v48 = vld [vmem:[#allocation2 + $0x88] sm:$0xff]  }
 0x27e   :  { %v2710_v26 = vpack.c.bf16 %v2454_v25, %v2451_v5  ;;  %v2456_v32 = vpop.f32.mrb[163].mxu0  ;;  %4989 = vmatprep.subr.bf16.mxu1 %v5719_v35 }
 0x280   :  { %4993 = vmatprep.mubr.bf16.mxu1 %v2710_v26  ;;  %2666 = vmatmul.mubr.bf16.gmra.mrb[12].mxu0 %v5720_v36  ;;  %v5740_v26 = vld [vmem:[#allocation2 + $0x90] sm:$0xff]   ;;  %v5608_v36 = vld [vmem:[#allocation5 + $0xc4] ss:$8 sps:$4 sm:$0xff]  }
 0x281   :  { %4990 = vmatpush3.bf16.msra.mxu1 %v5719_v35  ;;  %2673 = vmatprep.mubr.bf16.mxu0 %v5721_v49  ;;  %v5742_v49 = vld [vmem:[#allocation2 + $0xa0] sm:$0xff]  }
 0x282   :  { %4991 = vmatprep.subr.bf16.mxu1 %v5722_v12 }
 0x283   :  { %v2459_v33 = vpop.f32.mrb[164].mxu0 }
 0x284   :  { %v2461_v50 = vpop.f32.mrb[165].mxu0 }
 0x285   :  { %4992 = vmatpush3.bf16.msra.mxu1 %v5722_v12  ;;  %v2462_v9 = vpop.f32.mrb[166].mxu0  ;;  %v5611_v12 = vld [vmem:[#allocation5 + $0xd4] ss:$8 sps:$4 sm:$0xff]   ;;  %v5609_v50 = vld [vmem:[#allocation5 + $0xd0] ss:$8 sps:$4 sm:$0xff]  }
 0x286   :  { %v2711_v27 = vpack.c.bf16 %v2462_v9, %v2459_v33  ;;  %v2464_v10 = vpop.f32.mrb[167].mxu0  ;;  %5001 = vmatprep.subr.bf16.mxu1 %v5723_v38  ;;  %v5743_v33 = vld [vmem:[#allocation2 + $0xa8] sm:$0xff]  }
 0x288   :  { %4994 = vmatmul.mubr.bf16.vlgmr.msra.gmra.mrb[8].mxu1 %v2711_v27  ;;  %2674 = vmatmul.mubr.bf16.gmra.mrb[16].mxu0 %v5724_v51  ;;  %v5744_v51 = vld [vmem:[#allocation2 + $0xb0] sm:$0xff]  }
 0x289   :  { %5002 = vmatpush3.bf16.msra.mxu1 %v5723_v38  ;;  %2681 = vmatprep.mubr.bf16.mxu0 %v5725_v47  ;;  %v5614_v38 = vld [vmem:[#allocation5 + $0xe4] ss:$8 sps:$4 sm:$0xff]  }
 0x28a   :  { %5003 = vmatprep.subr.bf16.mxu1 %v5726_v63 }
 0x28b   :  { %v2467_v39 = vpop.f32.mrb[168].mxu0 }
 0x28c   :  { %v2469_v52 = vpop.f32.mrb[169].mxu0 }
 0x28d   :  { %5004 = vmatpush3.bf16.msra.mxu1 %v5726_v63  ;;  %v2470_v14 = vpop.f32.mrb[170].mxu0 }
 0x28e   :  { %5005 = vmatprep.subr.bf16.mxu1 %v5727_v53  ;;  %v2712_v31 = vpack.c.bf16 %v2470_v14, %v2467_v39  ;;  %v2472_v40 = vpop.f32.mrb[171].mxu0  ;;  %v5873_v39 = vmov 1966171168   ;;  %v5617_v14 = vld [vmem:[#allocation5 + $0xf4] ss:$8 sps:$4 sm:$0xff]  }
 0x28f   :  { %v3524_v52 = vunpack.c.l.s4 %v5873_v39  ;;  %v5745_v40 = vld [vmem:[#allocation2 + $0xb8] sm:$0xff]  }
 0x290   :  { %4997 = vmatprep.mubr.bf16.mxu1 %v2712_v31  ;;  %2682 = vmatmul.mubr.bf16.gmra.mrb[20].mxu0 %v5728_v0  ;;  %v5615_v0 = vld [vmem:[#allocation5 + $0xf0] ss:$8 sps:$4 sm:$0xff]   ;;  %v5647_v39 = vld [vmem:[#allocation5 + $0x194] ss:$8 sps:$4 sm:$0xff]  }
 0x291   :  { %5006 = vmatpush3.bf16.msra.mxu1 %v5727_v53  ;;  %2689 = vmatprep.mubr.bf16.mxu0 %v5729_v41  ;;  %v6703_v53 = vshrl.u32 %v3504_v13, 7  ;;  %v3525_v31 = vunpack.c.0.s8 %v3524_v52  ;;  %v4424_v41 = vld.sshfl [vmem:[%s6954_s4] sm:$0x33 pattern:$0x75316420]  ;;  %v5755_v52 = vld [vmem:[#allocation2 + $0x108] sm:$0xff]  }
 0x292   :  { %5007 = vmatprep.subr.bf16.mxu1 %v5730_v4  ;;  %v5642_v13 = vld [vmem:[#allocation5 + $0x180] ss:$8 sps:$4 sm:$0xff]  }
 0x293   :  { %v2475_v16 = vpop.f32.mrb[172].mxu0 }
 0x294   :  { %v2477_v56 = vpop.f32.mrb[173].mxu0 }
 0x295   :  { %5008 = vmatpush3.bf16.msra.mxu1 %v5730_v4  ;;  %v2478_v62 = vpop.f32.mrb[174].mxu0  ;;  %v3528_v56 = vsub.s32 %v3525_v31, %v6703_v53 }
 0x296   :  { %v2713_v37 = vpack.c.bf16 %v2478_v62, %v2475_v16  ;;  %5009 = vmatprep.subr.bf16.mxu1 %v5731_v43  ;;  %v2480_v44 = vpop.f32.mrb[175].mxu0  ;;  %v3522_v16 = vcombine.high %v4424_v41, %v4424_v41 }
 0x297   :  { %v5620_v44 = vld [vmem:[#allocation5 + $0x104] ss:$8 sps:$4 sm:$0xff]  }
 0x298   :  { %4998 = vmatmul.mubr.bf16.gmra.mrb[12].mxu1 %v2713_v37  ;;  %2690 = vmatmul.mubr.bf16.gmra.mrb[24].mxu0 %v5732_v29  ;;  %v5746_v29 = vld [vmem:[#allocation2 + $0xc0] sm:$0xff]  }
 0x299   :  { %5010 = vmatpush3.bf16.msra.mxu1 %v5731_v43  ;;  %5017 = vmatprep.mubr.bf16.mxu1 %v2706_v15  ;;  %v6713_v43 = vrot.slane %v3522_v16, %v3528_v56 }
 0x29a   :  { %5011 = vmatprep.subr.bf16.mxu1 %v5733_v19  ;;  %2697 = vmatprep.mubr.bf16.mxu0 %v5734_v59 }
 0x29b   :  { %v2483_v20 = vpop.f32.mrb[176].mxu0 }
 0x29c   :  { %v2485_v58 = vpop.f32.mrb[177].mxu0 }
 0x29d   :  { %5012 = vmatpush3.bf16.msra.mxu1 %v5733_v19  ;;  %v2486_v60 = vpop.f32.mrb[178].mxu0  ;;  %v5618_v58 = vld [vmem:[#allocation5 + $0x100] ss:$8 sps:$4 sm:$0xff]  }
 0x29e   :  { %5013 = vmatprep.subr.bf16.mxu1 %v5735_v54  ;;  %v2714_v22 = vpack.c.bf16 %v2486_v60, %v2483_v20  ;;  %v2488_v46 = vpop.f32.mrb[179].mxu0  ;;  %v6717_v20 = vrot.slane %v4424_v41, %v3528_v56  ;;  %v5623_v60 = vld [vmem:[#allocation5 + $0x114] ss:$8 sps:$4 sm:$0xff]   ;;  %v5650_v41 = vld [vmem:[#allocation5 + $0x1a4] ss:$8 sps:$4 sm:$0xff]  }
 0x2a0   :  { %2698 = vmatmul.mubr.bf16.gmra.mrb[28].mxu0 %v5736_v42  ;;  %v5626_v42 = vld [vmem:[#allocation5 + $0x124] ss:$8 sps:$4 sm:$0xff]  }
 0x2a1   :  { %5014 = vmatpush3.bf16.msra.mxu1 %v5735_v54  ;;  %3895 = vmatprep.mubr.bf16.mxu0 %v6713_v43 }
 0x2a2   :  { %5015 = vmatprep.subr.bf16.mxu1 %v5737_v3 }
 0x2a3   :  { %v6673_v15 = vpop.f32.mrb[180].mxu0 }
 0x2a4   :  { %v2493_v23 = vpop.f32.mrb[181].mxu0 }
 0x2a5   :  { %5016 = vmatpush3.bf16.msra.mxu1 %v5737_v3  ;;  %v6675_v61 = vpop.f32.mrb[182].mxu0  ;;  %v5748_v3 = vld [vmem:[#allocation2 + $0xd0] sm:$0xff]  }
 0x2a6   :  { %5025 = vmatprep.subr.bf16.mxu1 %v5738_v34  ;;  %v2715_v24 = vpack.c.bf16 %v6675_v61, %v6673_v15  ;;  %v2496_v11 = vpop.f32.mrb[183].mxu0  ;;  %v5624_v61 = vld [vmem:[#allocation5 + $0x120] ss:$8 sps:$4 sm:$0xff]  }
 0x2a7   :  { %v5627_v11 = vld [vmem:[#allocation5 + $0x130] ss:$8 sps:$4 sm:$0xff]  }
 0x2a8   :  { %5018 = vmatmul.mubr.bf16.vlgmr.msra.gmra.mrb[8].mxu1 %v2707_v18  ;;  %v5605_v18 = vld [vmem:[#allocation5 + $0xb4] ss:$8 sps:$4 sm:$0xff]  }
 0x2a9   :  { %5021 = vmatprep.mubr.bf16.mxu1 %v2708_v57  ;;  %5026 = vmatpush3.bf16.msra.mxu1 %v5738_v34  ;;  %v5629_v34 = vld [vmem:[#allocation5 + $0x134] ss:$8 sps:$4 sm:$0xff]  }
 0x2aa   :  { %5027 = vmatprep.subr.bf16.mxu1 %v5739_v48  ;;  %3885 = vmatprep.subr.bf16.mxu0 %v5605_v18  ;;  %v5635_v18 = vld [vmem:[#allocation5 + $0x154] ss:$8 sps:$4 sm:$0xff]  }
 0x2ab   :  { %v6685_v5 = vpop.f32.mrb[184].mxu0  ;;  %3886 = vmatpush1.bf16.msra.mxu0 %v5603_v17  ;;  %v5630_v17 = vld [vmem:[#allocation5 + $0x140] ss:$8 sps:$4 sm:$0xff]  }
 0x2ac   :  { %v2501_v6 = vpop.f32.mrb[185].mxu0  ;;  %3887 = vmatprep.subr.bf16.mxu0 %v5608_v36 }
 0x2ad   :  { %5028 = vmatpush3.bf16.msra.mxu1 %v5739_v48  ;;  %v6687_v25 = vpop.f32.mrb[186].mxu0 }
 0x2ae   :  { %5029 = vmatprep.subr.bf16.mxu1 %v5740_v26  ;;  %v2716_v32 = vpack.c.bf16 %v6687_v25, %v6685_v5  ;;  %v2504_v55 = vpop.f32.mrb[187].mxu0  ;;  %v5632_v25 = vld [vmem:[#allocation5 + $0x144] ss:$8 sps:$4 sm:$0xff]  }
 0x2b0   :  { %5022 = vmatmul.mubr.bf16.gmra.mrb[12].mxu1 %v2709_v2  ;;  %v5606_v2 = vld [vmem:[#allocation5 + $0xc0] ss:$8 sps:$4 sm:$0xff]  }
 0x2b1   :  { %5030 = vmatpush3.bf16.msra.mxu1 %v5740_v26  ;;  %5041 = vmatprep.mubr.bf16.mxu1 %v2714_v22  ;;  %v5750_v26 = vld [vmem:[#allocation2 + $0xe0] sm:$0xff]  }
 0x2b2   :  { %5031 = vmatprep.subr.bf16.mxu1 %v5741_v28  ;;  %3888 = vmatpush1.bf16.msra.mxu0 %v5606_v2 }
 0x2b3   :  { %v6694_v7 = vpop.f32.mrb[188].mxu0  ;;  %3889 = vmatprep.subr.bf16.mxu0 %v5611_v12  ;;  %v5636_v12 = vld [vmem:[#allocation5 + $0x160] ss:$8 sps:$4 sm:$0xff]  }
 0x2b4   :  { %v2509_v57 = vpop.f32.mrb[189].mxu0 }
 0x2b5   :  { %5032 = vmatpush3.bf16.msra.mxu1 %v5741_v28  ;;  %v6696_v35 = vpop.f32.mrb[190].mxu0  ;;  %v5751_v28 = vld [vmem:[#allocation2 + $0xe8] sm:$0xff]  }
 0x2b6   :  { %5033 = vmatprep.subr.bf16.mxu1 %v5742_v49  ;;  %v2717_v30 = vpack.c.bf16 %v6696_v35, %v6694_v7  ;;  %v2512_v1 = vpop.f32.mrb[191].mxu0  ;;  %3890 = vmatpush1.bf16.msra.mxu0 %v5609_v50  ;;  %v5633_v7 = vld [vmem:[#allocation5 + $0x150] ss:$8 sps:$4 sm:$0xff]  }
 0x2b7   :  { %3891 = vmatprep.subr.bf16.mxu0 %v5614_v38  ;;  %v5753_v50 = vld [vmem:[#allocation2 + $0xf8] sm:$0xff]  }
 0x2b9   :  { %5034 = vmatpush3.bf16.msra.mxu1 %v5742_v49  ;;  %v5638_v49 = vld [vmem:[#allocation5 + $0x164] ss:$8 sps:$4 sm:$0xff]  }
 0x2ba   :  { %5035 = vmatprep.subr.bf16.mxu1 %v5743_v33  ;;  %3892 = vmatpush1.bf16.msra.mxu0 %v5612_v8 }
 0x2bb   :  { %v6700_v9 = vpop.f32.mrb[192].mxu0  ;;  %3893 = vmatprep.subr.bf16.mxu0 %v5617_v14  ;;  %v5645_v14 = vld [vmem:[#allocation5 + $0x190] ss:$8 sps:$4 sm:$0xff]  }
 0x2bc   :  { %v2517_v27 = vpop.f32.mrb[193].mxu0 }
 0x2bd   :  { %5036 = vmatpush3.bf16.msra.mxu1 %v5743_v33  ;;  %v2518_v10 = vpop.f32.mrb[194].mxu0  ;;  %v5641_v33 = vld [vmem:[#allocation5 + $0x174] ss:$8 sps:$4 sm:$0xff]  }
 0x2be   :  { %5037 = vmatprep.subr.bf16.mxu1 %v5744_v51  ;;  %v2718_v47 = vpack.c.bf16 %v2518_v10, %v6700_v9  ;;  %v2520_v63 = vpop.f32.mrb[195].mxu0  ;;  %3894 = vmatpush1.bf16.msra.mxu0 %v5615_v0  ;;  %v5639_v9 = vld [vmem:[#allocation5 + $0x170] ss:$8 sps:$4 sm:$0xff]  }
 0x2bf   :  { %3904 = vmatprep.subr.bf16.mxu0 %v5620_v44  ;;  %v5757_v44 = vld [vmem:[#allocation2 + $0x118] sm:$0xff]  }
 0x2c1   :  { %5038 = vmatpush3.bf16.msra.mxu1 %v5744_v51  ;;  %3896 = vmatmul.mubr.bf16.vlgmr.msra.gmra.mrb[32].mxu0 %v6717_v20  ;;  %v5644_v51 = vld [vmem:[#allocation5 + $0x184] ss:$8 sps:$4 sm:$0xff]  }
 0x2c2   :  { %5039 = vmatprep.subr.bf16.mxu1 %v5745_v40  ;;  %3905 = vmatpush1.bf16.msra.mxu0 %v5618_v58 }
 0x2c3   :  { %v6708_v4 = vpop.f32.mrb[196].mxu0  ;;  %3906 = vmatprep.subr.bf16.mxu0 %v5623_v60  ;;  %v5656_v60 = vld [vmem:[#allocation5 + $0x1c4] ss:$8 sps:$4 sm:$0xff]  }
 0x2c4   :  { %v2525_v62 = vpop.f32.mrb[197].mxu0 }
 0x2c5   :  { %5040 = vmatpush3.bf16.msra.mxu1 %v5745_v40  ;;  %v6711_v37 = vpop.f32.mrb[198].mxu0  ;;  %v5648_v62 = vld [vmem:[#allocation5 + $0x1a0] ss:$8 sps:$4 sm:$0xff]  }
 0x2c6   :  { %5049 = vmatprep.subr.bf16.mxu1 %v5746_v29  ;;  %v2719_v19 = vpack.c.bf16 %v6711_v37, %v6708_v4  ;;  %v2528_v59 = vpop.f32.mrb[199].mxu0  ;;  %3907 = vmatpush1.bf16.msra.mxu0 %v5621_v21  ;;  %v5756_v4 = vld [vmem:[#allocation2 + $0x110] sm:$0xff]  }
 0x2c7   :  { %3908 = vmatprep.subr.bf16.mxu0 %v5626_v42  ;;  %v5653_v37 = vld [vmem:[#allocation5 + $0x1b4] ss:$8 sps:$4 sm:$0xff]   ;;  %v5759_v42 = vld [vmem:[#allocation2 + $0x128] sm:$0xff]  }
 0x2c8   :  { %5042 = vmatmul.mubr.bf16.vlgmr.msra.gmra.mrb[8].mxu1 %v2715_v24  ;;  %v5749_v24 = vld [vmem:[#allocation2 + $0xd8] sm:$0xff]  }
 0x2c9   :  { %5045 = vmatprep.mubr.bf16.mxu1 %v2716_v32  ;;  %5050 = vmatpush3.bf16.msra.mxu1 %v5746_v29  ;;  %v5651_v29 = vld [vmem:[#allocation5 + $0x1b0] ss:$8 sps:$4 sm:$0xff]  }
 0x2ca   :  { %5051 = vmatprep.subr.bf16.mxu1 %v5747_v45  ;;  %3909 = vmatpush1.bf16.msra.mxu0 %v5624_v61 }
 0x2cb   :  { %v6727_v54 = vpop.f32.mrb[200].mxu0  ;;  %3910 = vmatprep.subr.bf16.mxu0 %v5629_v34  ;;  %v5662_v34 = vld [vmem:[#allocation5 + $0x1e4] ss:$8 sps:$4 sm:$0xff]  }
 0x2cc   :  { %v2533_v22 = vpop.f32.mrb[201].mxu0 }
 0x2cd   :  { %5052 = vmatpush3.bf16.msra.mxu1 %v5747_v45  ;;  %v6729_v46 = vpop.f32.mrb[202].mxu0  ;;  %v5758_v45 = vld [vmem:[#allocation2 + $0x120] sm:$0xff]  }
 0x2ce   :  { %5053 = vmatprep.subr.bf16.mxu1 %v5748_v3  ;;  %v2720_v15 = vpack.c.bf16 %v6729_v46, %v6727_v54  ;;  %v2536_v23 = vpop.f32.mrb[203].mxu0  ;;  %3911 = vmatpush1.bf16.msra.mxu0 %v5627_v11  ;;  %v5654_v22 = vld [vmem:[#allocation5 + $0x1c0] ss:$8 sps:$4 sm:$0xff]   ;;  %v5659_v46 = vld [vmem:[#allocation5 + $0x1d4] ss:$8 sps:$4 sm:$0xff]  }
 0x2cf   :  { %3912 = vmatprep.subr.bf16.mxu0 %v5632_v25  ;;  %v5761_v25 = vld [vmem:[#allocation2 + $0x138] sm:$0xff]  }
 0x2d0   :  { %5046 = vmatmul.mubr.bf16.gmra.mrb[12].mxu1 %v2717_v30  ;;  %v5752_v30 = vld [vmem:[#allocation2 + $0xf0] sm:$0xff]  }
 0x2d1   :  { %5054 = vmatpush3.bf16.msra.mxu1 %v5748_v3  ;;  %5065 = vmatprep.mubr.bf16.mxu1 %v2718_v47  ;;  %v5754_v47 = vld [vmem:[#allocation2 + $0x100] sm:$0xff]   ;;  %v5657_v3 = vld [vmem:[#allocation5 + $0x1d0] ss:$8 sps:$4 sm:$0xff]  }
 0x2d2   :  { %5055 = vmatprep.subr.bf16.mxu1 %v5749_v24  ;;  %3913 = vmatpush1.bf16.msra.mxu0 %v5630_v17  ;;  %v3538_v17 = vcombine.high %v6713_v43, %v6713_v43  ;;  %v5763_v43 = vld [vmem:[#allocation2 + $0x148] sm:$0xff]  }
 0x2d3   :  { %v6736_v48 = vpop.f32.mrb[204].mxu0  ;;  %3914 = vmatprep.subr.bf16.mxu0 %v5635_v18 }
 0x2d4   :  { %v2541_v5 = vpop.f32.mrb[205].mxu0  ;;  %3936 = vmatprep.mubr.bf16.mxu0 %v3538_v17 }
 0x2d5   :  { %5056 = vmatpush3.bf16.msra.mxu1 %v5749_v24  ;;  %v6738_v6 = vpop.f32.mrb[206].mxu0  ;;  %v5760_v24 = vld [vmem:[#allocation2 + $0x130] sm:$0xff]   ;;  %v5660_v5 = vld [vmem:[#allocation5 + $0x1e0] ss:$8 sps:$4 sm:$0xff]  }
 0x2d6   :  { %5057 = vmatprep.subr.bf16.mxu1 %v5750_v26  ;;  %v2721_v32 = vpack.c.bf16 %v6738_v6, %v6736_v48  ;;  %v2544_v55 = vpop.f32.mrb[207].mxu0  ;;  %3915 = vmatpush1.bf16.msra.mxu0 %v5633_v7  ;;  %v5665_v6 = vld [vmem:[#allocation5 + $0x1f4] ss:$8 sps:$4 sm:$0xff]  }
 0x2d7   :  { %3916 = vmatprep.subr.bf16.mxu0 %v5638_v49 }
 0x2d9   :  { %5058 = vmatpush3.bf16.msra.mxu1 %v5750_v26  ;;  %v5663_v26 = vld [vmem:[#allocation5 + $0x1f0] ss:$8 sps:$4 sm:$0xff]  }
 0x2da   :  { %5059 = vmatprep.subr.bf16.mxu1 %v5751_v28  ;;  %3917 = vmatpush1.bf16.msra.mxu0 %v5636_v12  ;;  %v5765_v12 = vld [vmem:[#allocation2 + $0x158] sm:$0xff]  }
 0x2db   :  { %v2547_v57 = vpop.f32.mrb[208].mxu0  ;;  %3918 = vmatprep.subr.bf16.mxu0 %v5641_v33 }
 0x2dc   :  { %v2549_v35 = vpop.f32.mrb[209].mxu0 }
 0x2dd   :  { %5060 = vmatpush3.bf16.msra.mxu1 %v5751_v28  ;;  %v2550_v36 = vpop.f32.mrb[210].mxu0  ;;  %v5762_v28 = vld [vmem:[#allocation2 + $0x140] sm:$0xff]   ;;  %v3537_v35 = vcombine.high %v6717_v20, %v6717_v20 }
 0x2de   :  { %5061 = vmatprep.subr.bf16.mxu1 %v5752_v30  ;;  %v2722_v1 = vpack.c.bf16 %v2550_v36, %v2547_v57  ;;  %v2552_v2 = vpop.f32.mrb[211].mxu0  ;;  %3919 = vmatpush1.bf16.msra.mxu0 %v5639_v9 }
 0x2df   :  { %3920 = vmatprep.subr.bf16.mxu0 %v5644_v51  ;;  %v5767_v51 = vld [vmem:[#allocation2 + $0x168] sm:$0xff]  }
 0x2e1   :  { %5062 = vmatpush3.bf16.msra.mxu1 %v5752_v30 }
 0x2e2   :  { %5063 = vmatprep.subr.bf16.mxu1 %v5753_v50  ;;  %3921 = vmatpush1.bf16.msra.mxu0 %v5642_v13  ;;  %v5768_v13 = vld [vmem:[#allocation2 + $0x170] sm:$0xff]  }
 0x2e3   :  { %v6742_v27 = vpop.f32.mrb[212].mxu0  ;;  %3922 = vmatprep.subr.bf16.mxu0 %v5647_v39 }
 0x2e4   :  { %v2557_v10 = vpop.f32.mrb[213].mxu0 }
 0x2e5   :  { %5064 = vmatpush3.bf16.msra.mxu1 %v5753_v50  ;;  %v6744_v38 = vpop.f32.mrb[214].mxu0 }
 0x2e6   :  { %5073 = vmatprep.subr.bf16.mxu1 %v5754_v47  ;;  %v2723_v63 = vpack.c.bf16 %v6744_v38, %v6742_v27  ;;  %v2560_v8 = vpop.f32.mrb[215].mxu0  ;;  %3923 = vmatpush1.bf16.msra.mxu0 %v5645_v14  ;;  %v5766_v27 = vld [vmem:[#allocation2 + $0x160] sm:$0xff]   ;;  %v5769_v14 = vld [vmem:[#allocation2 + $0x178] sm:$0xff]  }
 0x2e7   :  { %3924 = vmatprep.subr.bf16.mxu0 %v5650_v41  ;;  %v5770_v41 = vld [vmem:[#allocation2 + $0x180] sm:$0xff]  }
 0x2e8   :  { %5066 = vmatmul.mubr.bf16.vlgmr.msra.gmra.mrb[8].mxu1 %v2719_v19 }
 0x2e9   :  { %5069 = vmatprep.mubr.bf16.mxu1 %v2720_v15  ;;  %5074 = vmatpush3.bf16.msra.mxu1 %v5754_v47 }
 0x2ea   :  { %5075 = vmatprep.subr.bf16.mxu1 %v5755_v52  ;;  %3925 = vmatpush1.bf16.msra.mxu0 %v5648_v62 }
 0x2eb   :  { %v6754_v31 = vpop.f32.mrb[216].mxu0  ;;  %3926 = vmatprep.subr.bf16.mxu0 %v5653_v37 }
 0x2ec   :  { %v2565_v40 = vpop.f32.mrb[217].mxu0 }
 0x2ed   :  { %5076 = vmatpush3.bf16.msra.mxu1 %v5755_v52  ;;  %v6756_v0 = vpop.f32.mrb[218].mxu0 }
 0x2ee   :  { %5077 = vmatprep.subr.bf16.mxu1 %v5756_v4  ;;  %v2724_v16 = vpack.c.bf16 %v6756_v0, %v6754_v31  ;;  %v2568_v56 = vpop.f32.mrb[219].mxu0  ;;  %3927 = vmatpush1.bf16.msra.mxu0 %v5651_v29  ;;  %v5772_v29 = vld [vmem:[#allocation2 + $0x190] sm:$0xff]  }
 0x2ef   :  { %3928 = vmatprep.subr.bf16.mxu0 %v5656_v60  ;;  %v5771_v56 = vld [vmem:[#allocation2 + $0x188] sm:$0xff]  }
 0x2f0   :  { %5070 = vmatmul.mubr.bf16.gmra.mrb[12].mxu1 %v2721_v32 }
 0x2f1   :  { %5078 = vmatpush3.bf16.msra.mxu1 %v5756_v4  ;;  %5089 = vmatprep.mubr.bf16.mxu1 %v2722_v1  ;;  %v5764_v1 = vld [vmem:[#allocation2 + $0x150] sm:$0xff]  }
 0x2f2   :  { %5079 = vmatprep.subr.bf16.mxu1 %v5757_v44  ;;  %3929 = vmatpush1.bf16.msra.mxu0 %v5654_v22 }
 0x2f3   :  { %v6763_v19 = vpop.f32.mrb[220].mxu0  ;;  %3930 = vmatprep.subr.bf16.mxu0 %v5659_v46 }
 0x2f4   :  { %v2573_v59 = vpop.f32.mrb[221].mxu0 }
 0x2f5   :  { %5080 = vmatpush3.bf16.msra.mxu1 %v5757_v44  ;;  %v2574_v58 = vpop.f32.mrb[222].mxu0 }
 0x2f6   :  { %5081 = vmatprep.subr.bf16.mxu1 %v5758_v45  ;;  %v2725_v21 = vpack.c.bf16 %v2574_v58, %v6763_v19  ;;  %v2576_v54 = vpop.f32.mrb[223].mxu0  ;;  %3931 = vmatpush1.bf16.msra.mxu0 %v5657_v3  ;;  %v5773_v58 = vld [vmem:[#allocation2 + $0x198] sm:$0xff]   ;;  %v5775_v3 = vld [vmem:[#allocation2 + $0x1a8] sm:$0xff]  }
 0x2f7   :  { %3932 = vmatprep.subr.bf16.mxu0 %v5662_v34  ;;  %v5774_v54 = vld [vmem:[#allocation2 + $0x1a0] sm:$0xff]  }
 0x2f9   :  { %5082 = vmatpush3.bf16.msra.mxu1 %v5758_v45 }
 0x2fa   :  { %5083 = vmatprep.subr.bf16.mxu1 %v5759_v42  ;;  %3933 = vmatpush1.bf16.msra.mxu0 %v5660_v5 }
 0x2fb   :  { %v2579_v15 = vpop.f32.mrb[224].mxu0  ;;  %3934 = vmatprep.subr.bf16.mxu0 %v5665_v6 }
 0x2fc   :  { %v2581_v23 = vpop.f32.mrb[225].mxu0 }
 0x2fd   :  { %5084 = vmatpush3.bf16.msra.mxu1 %v5759_v42  ;;  %v2582_v61 = vpop.f32.mrb[226].mxu0  ;;  %v6797_v42 = vld [vmem:[%s6953_s3] ss:$0 sm:$0xff] }
 0x2fe   :  { %5085 = vmatprep.subr.bf16.mxu1 %v5760_v24  ;;  %v2726_v11 = vpack.c.bf16 %v2582_v61, %v2579_v15  ;;  %v2584_v48 = vpop.f32.mrb[227].mxu0  ;;  %3935 = vmatpush1.bf16.msra.mxu0 %v5663_v26 }
 0x301   :  { %5086 = vmatpush3.bf16.msra.mxu1 %v5760_v24  ;;  %3937 = vmatmul.mubr.bf16.vlgmr.msra.gmra.mrb[32].mxu0 %v3537_v35 }
 0x302   :  { %5087 = vmatprep.subr.bf16.mxu1 %v5761_v25 }
 0x303   :  { %v2587_v32 = vpop.f32.mrb[228].mxu0 }
 0x304   :  { %v2589_v55 = vpop.f32.mrb[229].mxu0 }
 0x305   :  { %5088 = vmatpush3.bf16.msra.mxu1 %v5761_v25  ;;  %v2590_v18 = vpop.f32.mrb[230].mxu0 }
 0x306   :  { %5097 = vmatprep.subr.bf16.mxu1 %v5762_v28  ;;  %v2727_v7 = vpack.c.bf16 %v2590_v18, %v2587_v32  ;;  %v2592_v57 = vpop.f32.mrb[231].mxu0  ;;  %v5776_v32 = vld [vmem:[#allocation2 + $0x1b0] sm:$0xff]  }
 0x308   :  { %5090 = vmatmul.mubr.bf16.vlgmr.msra.gmra.mrb[8].mxu1 %v2723_v63 }
 0x309   :  { %5093 = vmatprep.mubr.bf16.mxu1 %v2724_v16  ;;  %5098 = vmatpush3.bf16.msra.mxu1 %v5762_v28 }
 0x30a   :  { %5099 = vmatprep.subr.bf16.mxu1 %v5763_v43 }
 0x30b   :  { %v2595_v36 = vpop.f32.mrb[232].mxu0 }
 0x30c   :  { %v2597_v49 = vpop.f32.mrb[233].mxu0 }
 0x30d   :  { %5100 = vmatpush3.bf16.msra.mxu1 %v5763_v43  ;;  %v2598_v30 = vpop.f32.mrb[234].mxu0 }
 0x30e   :  { %5101 = vmatprep.subr.bf16.mxu1 %v5764_v1  ;;  %v2728_v20 = vpack.c.bf16 %v2598_v30, %v2595_v36  ;;  %v2600_v2 = vpop.f32.mrb[235].mxu0  ;;  %v5777_v36 = vld [vmem:[#allocation2 + $0x1b8] sm:$0xff]  }
 0x310   :  { %5094 = vmatmul.mubr.bf16.gmra.mrb[12].mxu1 %v2725_v21 }
 0x311   :  { %5102 = vmatpush3.bf16.msra.mxu1 %v5764_v1  ;;  %5113 = vmatprep.mubr.bf16.mxu1 %v2726_v11 }
 0x312   :  { %5103 = vmatprep.subr.bf16.mxu1 %v5765_v12 }
 0x313   :  { %v2603_v33 = vpop.f32.mrb[236].mxu0 }
 0x314   :  { %v2605_v50 = vpop.f32.mrb[237].mxu0 }
 0x315   :  { %5104 = vmatpush3.bf16.msra.mxu1 %v5765_v12  ;;  %v2606_v9 = vpop.f32.mrb[238].mxu0 }
 0x316   :  { %5105 = vmatprep.subr.bf16.mxu1 %v5766_v27  ;;  %v2729_v10 = vpack.c.bf16 %v2606_v9, %v2603_v33  ;;  %v2608_v38 = vpop.f32.mrb[239].mxu0 }
 0x319   :  { %5106 = vmatpush3.bf16.msra.mxu1 %v5766_v27 }
 0x31a   :  { %5107 = vmatprep.subr.bf16.mxu1 %v5767_v51 }
 0x31b   :  { %v2611_v47 = vpop.f32.mrb[240].mxu0 }
 0x31c   :  { %v2613_v63 = vpop.f32.mrb[241].mxu0 }
 0x31d   :  { %5108 = vmatpush3.bf16.msra.mxu1 %v5767_v51  ;;  %v2614_v8 = vpop.f32.mrb[242].mxu0 }
 0x31e   :  { %5109 = vmatprep.subr.bf16.mxu1 %v5768_v13  ;;  %v2730_v39 = vpack.c.bf16 %v2614_v8, %v2611_v47  ;;  %v2616_v52 = vpop.f32.mrb[243].mxu0  ;;  %v5778_v8 = vld [vmem:[#allocation2 + $0x1c0] sm:$0xff]  }
 0x321   :  { %5110 = vmatpush3.bf16.msra.mxu1 %v5768_v13 }
 0x322   :  { %5111 = vmatprep.subr.bf16.mxu1 %v5769_v14 }
 0x323   :  { %v6776_v31 = vpop.f32.mrb[244].mxu0 }
 0x324   :  { %v2621_v40 = vpop.f32.mrb[245].mxu0 }
 0x325   :  { %5112 = vmatpush3.bf16.msra.mxu1 %v5769_v14  ;;  %v6778_v0 = vpop.f32.mrb[246].mxu0 }
 0x326   :  { %5121 = vmatprep.subr.bf16.mxu1 %v5770_v41  ;;  %v2731_v4 = vpack.c.bf16 %v6778_v0, %v6776_v31  ;;  %v2624_v16 = vpop.f32.mrb[247].mxu0 }
 0x328   :  { %5114 = vmatmul.mubr.bf16.vlgmr.msra.gmra.mrb[8].mxu1 %v2727_v7 }
 0x329   :  { %5117 = vmatprep.mubr.bf16.mxu1 %v2728_v20  ;;  %5122 = vmatpush3.bf16.msra.mxu1 %v5770_v41 }
 0x32a   :  { %5123 = vmatprep.subr.bf16.mxu1 %v5771_v56 }
 0x32b   :  { %v6782_v62 = vpop.f32.mrb[248].mxu0 }
 0x32c   :  { %v2629_v37 = vpop.f32.mrb[249].mxu0 }
 0x32d   :  { %5124 = vmatpush3.bf16.msra.mxu1 %v5771_v56  ;;  %v6784_v44 = vpop.f32.mrb[250].mxu0 }
 0x32e   :  { %5125 = vmatprep.subr.bf16.mxu1 %v5772_v29  ;;  %v2732_v19 = vpack.c.bf16 %v6784_v44, %v6782_v62  ;;  %v2632_v59 = vpop.f32.mrb[251].mxu0 }
 0x330   :  { %5118 = vmatmul.mubr.bf16.gmra.mrb[12].mxu1 %v2729_v10 }
 0x331   :  { %5126 = vmatpush3.bf16.msra.mxu1 %v5772_v29  ;;  %5137 = vmatprep.mubr.bf16.mxu1 %v2730_v39 }
 0x332   :  { %5127 = vmatprep.subr.bf16.mxu1 %v5773_v58 }
 0x333   :  { %v6788_v60 = vpop.f32.mrb[252].mxu0 }
 0x334   :  { %v2637_v45 = vpop.f32.mrb[253].mxu0 }
 0x335   :  { %5128 = vmatpush3.bf16.msra.mxu1 %v5773_v58  ;;  %v6790_v21 = vpop.f32.mrb[254].mxu0  ;;  %v5779_v58 = vld [vmem:[#allocation2 + $0x1c8] sm:$0xff]  }
 0x336   :  { %5129 = vmatprep.subr.bf16.mxu1 %v5774_v54  ;;  %v2733_v22 = vpack.c.bf16 %v6790_v21, %v6788_v60  ;;  %v2640_v46 = vpop.f32.mrb[255].mxu0  ;;  %v5783_v21 = vld [vmem:[#allocation2 + $0x1e8] sm:$0xff]  }
 0x339   :  { %5130 = vmatpush3.bf16.msra.mxu1 %v5774_v54 }
 0x33a   :  { %5131 = vmatprep.subr.bf16.mxu1 %v5775_v3 }
 0x33b   :  { %v4971_v15 = vpop.f32.mrb[0].mxu1  ;;  %v6799_v23 = vpop.f32.mrb[0].mxu0 }
 0x33c   :  { %v2213_v61 = vadd.f32 %v4971_v15, %v6797_v42  ;;  %v2165_v34 = vpop.f32.mrb[1].mxu1  ;;  %v2645_v24 = vpop.f32.mrb[1].mxu0 }
 0x33d   :  { %v2211_v11 = vadd.f32 %v6797_v42, %v2165_v34  ;;  %v4972_v48 = vpop.f32.mrb[2].mxu1  ;;  %5132 = vmatpush3.bf16.msra.mxu1 %v5775_v3  ;;  %v6803_v5 = vpop.f32.mrb[2].mxu0  ;;  %v5780_v24 = vld [vmem:[#allocation2 + $0x1d0] sm:$0xff]  }
 0x33e   :  { %v2221_v6 = vmax.f32 %v2213_v61, 1e-06  ;;  %v2214_v25 = vadd.f32 %v4972_v48, %v6797_v42  ;;  %v2168_v26 = vpop.f32.mrb[3].mxu1  ;;  %5133 = vmatprep.subr.bf16.mxu1 %v5776_v32  ;;  %v2734_v55 = vpack.c.bf16 %v6803_v5, %v6799_v23  ;;  %v2648_v17 = vpop.f32.mrb[3].mxu0  ;;  %v5784_v5 = vld [vmem:[#allocation2 + $0x1f0] sm:$0xff]  }
 0x33f   :  { %v2219_v18 = vmax.f32 %v2211_v11, 1e-06  ;;  %v2212_v28 = vadd.f32 %v6797_v42, %v2168_v26 }
 0x340   :  { %v2222_v7 = vmax.f32 %v2214_v25, 1e-06  ;;  %v2229_v43 = vmul.f32 %v2221_v6, %v2221_v6  ;;  %v5781_v25 = vld [vmem:[#allocation2 + $0x1d8] sm:$0xff]  }
 0x341   :  { %v2227_v57 = vmul.f32 %v2219_v18, %v2219_v18  ;;  %v2220_v35 = vmax.f32 %v2212_v28, 1e-06  ;;  %5134 = vmatpush3.bf16.msra.mxu1 %v5776_v32  ;;  %v5782_v28 = vld [vmem:[#allocation2 + $0x1e0] sm:$0xff]  }
 0x342   :  { %5135 = vmatprep.subr.bf16.mxu1 %v5777_v36  ;;  %v2230_v20 = vmul.f32 %v2222_v7, %v2222_v7  ;;  %v2237_v51 = vmul.f32 %v2229_v43, %v2221_v6  ;;  %v5785_v43 = vld [vmem:[#allocation2 + $0x1f8] sm:$0xff]  }
 0x343   :  { %v2228_v49 = vmul.f32 %v2220_v35, %v2220_v35  ;;  %v4975_v30 = vpop.f32.mrb[4].mxu1  ;;  %v6809_v1 = vpop.f32.mrb[4].mxu0  ;;  %v2235_v50 = vmul.f32 %v2227_v57, %v2219_v18 }
 0x344   :  { %v2217_v2 = vadd.f32 %v4975_v30, %v6797_v42  ;;  %v2181_v12 = vpop.f32.mrb[5].mxu1  ;;  %v2653_v33 = vpop.f32.mrb[5].mxu0  ;;  %v2238_v16 = vmul.f32 %v2230_v20, %v2222_v7  ;;  %v5786_v20 = vld [vmem:[#allocation2 + $0x200] sm:$0xff]  }
 0x345   :  { %v2236_v9 = vmul.f32 %v2228_v49, %v2220_v35  ;;  %v2215_v27 = vadd.f32 %v6797_v42, %v2181_v12  ;;  %v4976_v10 = vpop.f32.mrb[6].mxu1  ;;  %5136 = vmatpush3.bf16.msra.mxu1 %v5777_v36  ;;  %v6813_v38 = vpop.f32.mrb[6].mxu0  ;;  %v5787_v33 = vld [vmem:[#allocation2 + $0x208] sm:$0xff]  }
 0x346   :  { %v2218_v47 = vadd.f32 %v4976_v10, %v6797_v42  ;;  %v2184_v63 = vpop.f32.mrb[7].mxu1  ;;  %5145 = vmatprep.subr.bf16.mxu1 %v5778_v8  ;;  %v2735_v13 = vpack.c.bf16 %v6813_v38, %v6809_v1  ;;  %v2656_v39 = vpop.f32.mrb[7].mxu0  ;;  %v2225_v14 = vmax.f32 %v2217_v2, 1e-06  ;;  %v5788_v10 = vld [vmem:[#allocation2 + $0x210] sm:$0xff]  }
 0x347   :  { %v2243_v52 = vadd.f32 %v2236_v9, %v2235_v50  ;;  %v2223_v40 = vmax.f32 %v2215_v27, 1e-06  ;;  %v2216_v41 = vadd.f32 %v6797_v42, %v2184_v63  ;;  %v5789_v63 = vld [vmem:[#allocation2 + $0x218] sm:$0xff]  }
 0x348   :  { %5138 = vmatmul.mubr.bf16.vlgmr.msra.gmra.mrb[8].mxu1 %v2731_v4  ;;  %v2226_v29 = vmax.f32 %v2218_v47, 1e-06  ;;  %v2233_v45 = vmul.f32 %v2225_v14, %v2225_v14 }
 0x349   :  { %v2244_v56 = vadd.f32 %v2243_v52, %v2237_v51  ;;  %v2231_v37 = vmul.f32 %v2223_v40, %v2223_v40  ;;  %v2224_v59 = vmax.f32 %v2216_v41, 1e-06  ;;  %5141 = vmatprep.mubr.bf16.mxu1 %v2732_v19  ;;  %5146 = vmatpush3.bf16.msra.mxu1 %v5778_v8  ;;  %v5793_v41 = vld [vmem:[#allocation2 + $0x238] sm:$0xff]  }
 0x34a   :  { %5147 = vmatprep.subr.bf16.mxu1 %v5779_v58  ;;  %v2234_v31 = vmul.f32 %v2226_v29, %v2226_v29  ;;  %v2241_v62 = vmul.f32 %v2233_v45, %v2225_v14  ;;  %v5791_v14 = vld [vmem:[#allocation2 + $0x228] sm:$0xff]  }
 0x34b   :  { %v2239_v54 = vmul.f32 %v2231_v37, %v2223_v40  ;;  %v2245_v46 = vadd.f32 %v2244_v56, %v2238_v16  ;;  %v2232_v3 = vmul.f32 %v2224_v59, %v2224_v59  ;;  %v2659_v15 = vpop.f32.mrb[8].mxu0  ;;  %v5792_v40 = vld [vmem:[#allocation2 + $0x230] sm:$0xff]   ;;  %v3506_v16 = vsub.s32 0, %v6703_v53  ;;  %v3502_v37 = vld [vmem:[%s6956_s6] sm:$0x3] }
 0x34c   :  { %v2661_v61 = vpop.f32.mrb[9].mxu0  ;;  %v2242_v19 = vmul.f32 %v2234_v31, %v2226_v29  ;;  %v3510_v56 = vsub.s32 1, %v6703_v53  ;;  %v5666_v53 = vld [vmem:[%s6957_s7 + $0x40] sm:$0xff]  }
 0x34d   :  { %v2246_v34 = vadd.f32 %v2245_v46, %v2239_v54  ;;  %v2240_v0 = vmul.f32 %v2232_v3, %v2224_v59  ;;  %5148 = vmatpush3.bf16.msra.mxu1 %v5779_v58  ;;  %v2662_v4 = vpop.f32.mrb[10].mxu0  ;;  %v3507_v29 = vrot.slane %v3502_v37, %v3506_v16  ;;  %v5667_v31 = vld [vmem:[%s6957_s7] sm:$0xff]  }
 0x34e   :  { %5149 = vmatprep.subr.bf16.mxu1 %v5780_v24  ;;  %v2736_v11 = vpack.c.bf16 %v2662_v4, %v2659_v15  ;;  %v2664_v48 = vpop.f32.mrb[11].mxu0  ;;  %v3511_v59 = vrot.slane %v3502_v37, %v3510_v56  ;;  %v5669_v4 = vld [vmem:[%s6957_s7 + $0x8] sm:$0xff]  }
 0x34f   :  { %v2247_v44 = vadd.f32 %v2246_v34, %v2240_v0  ;;  %v5668_v0 = vld [vmem:[%s6957_s7 + $0x48] sm:$0xff]   ;;  %v5672_v48 = vld [vmem:[%s6957_s7 + $0x58] sm:$0xff]  }
 0x350   :  { %5142 = vmatmul.mubr.bf16.gmra.mrb[12].mxu1 %v2733_v22 }
 0x351   :  { %v2248_v6 = vadd.f32 %v2247_v44, %v2241_v62  ;;  %5150 = vmatpush3.bf16.msra.mxu1 %v5780_v24  ;;  %5161 = vmatprep.mubr.bf16.mxu1 %v2734_v55  ;;  %v5670_v24 = vld [vmem:[%s6957_s7 + $0x50] sm:$0xff]   ;;  %v5673_v62 = vld [vmem:[%s6957_s7 + $0x18] sm:$0xff]   ;;  %v5674_v44 = vld [vmem:[%s6957_s7 + $0x60] sm:$0xff]  }
 0x352   :  { %5151 = vmatprep.subr.bf16.mxu1 %v5781_v25 }
 0x353   :  { %v6831_v26 = vadd.f32 %v2248_v6, %v2242_v19  ;;  %v2667_v32 = vpop.f32.mrb[12].mxu0  ;;  %v5675_v19 = vld [vmem:[%s6957_s7 + $0x20] sm:$0xff]   ;;  %v5676_v6 = vld [vmem:[%s6957_s7 + $0x68] sm:$0xff]  }
 0x354   :  { %v2669_v17 = vpop.f32.mrb[13].mxu0 }
 0x355   :  { %5152 = vmatpush3.bf16.msra.mxu1 %v5781_v25  ;;  %v2670_v18 = vpop.f32.mrb[14].mxu0  ;;  %v5677_v25 = vld [vmem:[%s6957_s7 + $0x28] sm:$0xff]   ;;  %v5679_v17 = vld [vmem:[%s6957_s7 + $0x30] sm:$0xff]  }
 0x356   :  { %5153 = vmatprep.subr.bf16.mxu1 %v5782_v28  ;;  %v2737_v7 = vpack.c.bf16 %v2670_v18, %v2667_v32  ;;  %v2672_v60 = vpop.f32.mrb[15].mxu0  ;;  %v5678_v32 = vld [vmem:[%s6957_s7 + $0x70] sm:$0xff]   ;;  %v5680_v18 = vld [vmem:[%s6957_s7 + $0x78] sm:$0xff]  }
 0x359   :  { %5154 = vmatpush3.bf16.msra.mxu1 %v5782_v28  ;;  %v5681_v28 = vld [vmem:[%s6957_s7 + $0x38] sm:$0xff]  }
 0x35a   :  { %5155 = vmatprep.subr.bf16.mxu1 %v5783_v21 }
 0x35b   :  { %v2675_v22 = vpop.f32.mrb[16].mxu0 }
 0x35c   :  { %v2677_v57 = vpop.f32.mrb[17].mxu0 }
 0x35d   :  { %5156 = vmatpush3.bf16.msra.mxu1 %v5783_v21  ;;  %v2678_v23 = vpop.f32.mrb[18].mxu0 }
 0x35e   :  { %5157 = vmatprep.subr.bf16.mxu1 %v5784_v5  ;;  %v2738_v55 = vpack.c.bf16 %v2678_v23, %v2675_v22  ;;  %v2680_v35 = vpop.f32.mrb[19].mxu0 }
 0x361   :  { %5158 = vmatpush3.bf16.msra.mxu1 %v5784_v5 }
 0x362   :  { %5159 = vmatprep.subr.bf16.mxu1 %v5785_v43 }
 0x363   :  { %v2683_v36 = vpop.f32.mrb[20].mxu0 }
 0x364   :  { %v2685_v49 = vpop.f32.mrb[21].mxu0 }
 0x365   :  { %5160 = vmatpush3.bf16.msra.mxu1 %v5785_v43  ;;  %v2686_v30 = vpop.f32.mrb[22].mxu0 }
 0x366   :  { %5169 = vmatprep.subr.bf16.mxu1 %v5786_v20  ;;  %v2739_v2 = vpack.c.bf16 %v2686_v30, %v2683_v36  ;;  %v2688_v12 = vpop.f32.mrb[23].mxu0 }
 0x368   :  { %5162 = vmatmul.mubr.bf16.vlgmr.msra.gmra.mrb[8].mxu1 %v2735_v13  ;;  %v5790_v13 = vld [vmem:[#allocation2 + $0x220] sm:$0xff]  }
 0x369   :  { %5165 = vmatprep.mubr.bf16.mxu1 %v2736_v11  ;;  %5170 = vmatpush3.bf16.msra.mxu1 %v5786_v20  ;;  %v5671_v11 = vld [vmem:[%s6957_s7 + $0x10] sm:$0xff]  }
 0x36a   :  { %5171 = vmatprep.subr.bf16.mxu1 %v5787_v33 }
 0x36b   :  { %v2691_v50 = vpop.f32.mrb[24].mxu0 }
 0x36c   :  { %v2693_v9 = vpop.f32.mrb[25].mxu0 }
 0x36d   :  { %5172 = vmatpush3.bf16.msra.mxu1 %v5787_v33  ;;  %v2694_v27 = vpop.f32.mrb[26].mxu0 }
 0x36e   :  { %5173 = vmatprep.subr.bf16.mxu1 %v5788_v10  ;;  %v2740_v51 = vpack.c.bf16 %v2694_v27, %v2691_v50  ;;  %v2696_v47 = vpop.f32.mrb[27].mxu0 }
 0x370   :  { %5166 = vmatmul.mubr.bf16.gmra.mrb[12].mxu1 %v2737_v7  ;;  %v5874_v7 = vmov 0.0  }
 0x371   :  { %5174 = vmatpush3.bf16.msra.mxu1 %v5788_v10  ;;  %5185 = vmatprep.mubr.bf16.mxu1 %v2738_v55 }
 0x372   :  { %5175 = vmatprep.subr.bf16.mxu1 %v5789_v63 }
 0x373   :  { %v2699_v8 = vpop.f32.mrb[28].mxu0 }
 0x374   :  { %v2701_v1 = vpop.f32.mrb[29].mxu0 }
 0x375   :  { %5176 = vmatpush3.bf16.msra.mxu1 %v5789_v63  ;;  %v2702_v38 = vpop.f32.mrb[30].mxu0 }
 0x376   :  { %5177 = vmatprep.subr.bf16.mxu1 %v5790_v13  ;;  %v2741_v39 = vpack.c.bf16 %v2702_v38, %v2699_v8  ;;  %v2704_v52 = vpop.f32.mrb[31].mxu0 }
 0x379   :  { %5178 = vmatpush3.bf16.msra.mxu1 %v5790_v13 }
 0x37a   :  { %5179 = vmatprep.subr.bf16.mxu1 %v5791_v14 }
 0x37d   :  { %5180 = vmatpush3.bf16.msra.mxu1 %v5791_v14 }
 0x37e   :  { %5181 = vmatprep.subr.bf16.mxu1 %v5792_v40 }
 0x381   :  { %5182 = vmatpush3.bf16.msra.mxu1 %v5792_v40  ;;  %v2250_v40 = vrot.slane %v6831_v26, 4 }
 0x382   :  { %5183 = vmatprep.subr.bf16.mxu1 %v5793_v41 }
 0x385   :  { %5184 = vmatpush3.bf16.msra.mxu1 %v5793_v41 }
 0x386   :  { %4730 = vmatprep.subr.bf16.mxu1 %v5666_v53 }
 0x388   :  { %5186 = vmatmul.mubr.bf16.vlgmr.msra.gmra.mrb[8].mxu1 %v2739_v2 }
 0x389   :  { %5189 = vmatprep.mubr.bf16.mxu1 %v2740_v51  ;;  %4731 = vmatpush3.bf16.msra.mxu1 %v5667_v31 }
 0x38a   :  { %4732 = vmatprep.subr.bf16.mxu1 %v5668_v0 }
 0x38d   :  { %4733 = vmatpush3.bf16.msra.mxu1 %v5669_v4 }
 0x38e   :  { %4734 = vmatprep.subr.bf16.mxu1 %v5670_v24 }
 0x390   :  { %5190 = vmatmul.mubr.bf16.gmra.mrb[12].mxu1 %v2741_v39 }
 0x391   :  { %4735 = vmatpush3.bf16.msra.mxu1 %v5671_v11 }
 0x392   :  { %4736 = vmatprep.subr.bf16.mxu1 %v5672_v48 }
 0x395   :  { %4737 = vmatpush3.bf16.msra.mxu1 %v5673_v62 }
 0x396   :  { %4738 = vmatprep.subr.bf16.mxu1 %v5674_v44 }
 0x399   :  { %4739 = vmatpush3.bf16.msra.mxu1 %v5675_v19 }
 0x39a   :  { %4740 = vmatprep.subr.bf16.mxu1 %v5676_v6 }
 0x39d   :  { %4741 = vmatpush3.bf16.msra.mxu1 %v5677_v25 }
 0x39e   :  { %4742 = vmatprep.subr.bf16.mxu1 %v5678_v32 }
 0x3a1   :  { %4743 = vmatpush3.bf16.msra.mxu1 %v5679_v17 }
 0x3a2   :  { %4744 = vmatprep.subr.bf16.mxu1 %v5680_v18 }
 0x3a5   :  { %4745 = vmatpush3.bf16.msra.mxu1 %v5681_v28 }
 0x3a6   :  { %5193 = vmatprep.subr.bf16.mxu1 %v5874_v7 }
 0x3d4   :  { %v3938_v58 = vpop.f32.mrb[32].mxu0 }
 0x3d5   :  { %v5213_v45 = vadd.f32 %v3938_v58, %v3507_v29  ;;  %v3940_v54 = vpop.f32.mrb[33].mxu0 }
 0x3d6   :  { %v6841_v46 = vadd.f32 %v3940_v54, %v3511_v59  ;;  %v3942_v3 = vpop.f32.mrb[34].mxu0 }
 0x3d7   :  { %v3945_v15 = vmax.f32 %v5213_v45, 0.0  ;;  %v3943_v61 = vpop.f32.mrb[35].mxu0  ;;  %v2251_v3 = vadd.f32 %v2250_v40, %v6831_v26 }
 0x3d9   :  { %v3948_v34 = vpack.c.bf16 %v3945_v15, %v3945_v15  ;;  %v2252_v0 = vrot.slane %v2251_v3, 2 }
 0x3db   :  { %4181 = vmatprep.mubr.bf16.mxu1 %v3948_v34  ;;  %v2253_v11 = vadd.f32 %v2252_v0, %v2251_v3 }
 0x3dd   :  { %v2254_v44 = vrot.slane %v2253_v11, 1 }
 0x3df   :  { %v2255_v25 = vadd.f32 %v2254_v44, %v2253_v11 }
 0x3e1   :  { %v2256_v26 = vmul.f32 0.015625, %v2255_v25 }
 0x45b   :  { %v5187_v60 = vpop.f32.mrb[8].mxu1 }
 0x45c   :  { %v3385_v21 = vadd.f32 %v5187_v60, %v6797_v42  ;;  %v3344_v22 = vpop.f32.mrb[9].mxu1 }
 0x45d   :  { %v3383_v57 = vadd.f32 %v6797_v42, %v3344_v22  ;;  %v5188_v23 = vpop.f32.mrb[10].mxu1 }
 0x45e   :  { %v3393_v5 = vmax.f32 %v3385_v21, 1e-06  ;;  %v3386_v55 = vadd.f32 %v5188_v23, %v6797_v42  ;;  %v3347_v35 = vpop.f32.mrb[11].mxu1 }
 0x45f   :  { %v3391_v43 = vmax.f32 %v3383_v57, 1e-06  ;;  %v3384_v36 = vadd.f32 %v6797_v42, %v3347_v35 }
 0x460   :  { %v3394_v49 = vmax.f32 %v3386_v55, 1e-06  ;;  %v3401_v2 = vmul.f32 %v3393_v5, %v3393_v5  ;;  %v5682_v55 = vld [vmem:[%s6957_s7 + $0x80] sm:$0xff]  }
 0x461   :  { %v3399_v30 = vmul.f32 %v3391_v43, %v3391_v43  ;;  %v3392_v20 = vmax.f32 %v3384_v36, 1e-06  ;;  %v5684_v36 = vld [vmem:[%s6957_s7 + $0x90] sm:$0xff]  }
 0x462   :  { %v3402_v50 = vmul.f32 %v3394_v49, %v3394_v49  ;;  %v3409_v8 = vmul.f32 %v3401_v2, %v3393_v5  ;;  %v5688_v2 = vld [vmem:[%s6957_s7 + $0xb0] sm:$0xff]  }
 0x463   :  { %v3400_v12 = vmul.f32 %v3392_v20, %v3392_v20  ;;  %v5191_v33 = vpop.f32.mrb[12].mxu1  ;;  %v3407_v10 = vmul.f32 %v3399_v30, %v3391_v43  ;;  %v5683_v43 = vld [vmem:[%s6957_s7 + $0x88] sm:$0xff]   ;;  %v5686_v30 = vld [vmem:[%s6957_s7 + $0xa0] sm:$0xff]  }
 0x464   :  { %v3389_v9 = vadd.f32 %v5191_v33, %v6797_v42  ;;  %v3360_v27 = vpop.f32.mrb[13].mxu1  ;;  %v3410_v41 = vmul.f32 %v3402_v50, %v3394_v49  ;;  %v5685_v49 = vld [vmem:[%s6957_s7 + $0x98] sm:$0xff]   ;;  %v3946_v33 = vmax.f32 %v6841_v46, 0.0 }
 0x465   :  { %v3408_v51 = vmul.f32 %v3400_v12, %v3392_v20  ;;  %v3387_v47 = vadd.f32 %v6797_v42, %v3360_v27  ;;  %v5192_v63 = vpop.f32.mrb[14].mxu1  ;;  %v5687_v20 = vld [vmem:[%s6957_s7 + $0xa8] sm:$0xff]   ;;  %v5689_v12 = vld [vmem:[%s6957_s7 + $0xb8] sm:$0xff]   ;;  %s5838_s7 = scalar_lea.vmem %s4238_s20, 32 }
 0x466   :  { %v3390_v1 = vadd.f32 %v5192_v63, %v6797_v42  ;;  %v3363_v38 = vpop.f32.mrb[15].mxu1  ;;  %v3397_v39 = vmax.f32 %v3389_v9, 1e-06  ;;  %v3949_v50 = vpack.c.bf16 %v3946_v33, %v3946_v33  ;;  %v4489_v63 = vld [vmem:[%s6958_s8] ss:$0 sm:$0xff]  ;;  %p5839_p2 = scmp.ne.s32.totalorder %s4238_s20, %s5838_s7  ;;  %p5844_p4 = scmp.lt.s32.totalorder %s5838_s7, %s5838_s7 }
 0x467   :  { %v3415_v13 = vadd.f32 %v3408_v51, %v3407_v10  ;;  %v3395_v52 = vmax.f32 %v3387_v47, 1e-06  ;;  %v3388_v14 = vadd.f32 %v6797_v42, %v3363_v38 }
 0x468   :  { %v3398_v37 = vmax.f32 %v3390_v1, 1e-06  ;;  %v3405_v59 = vmul.f32 %v3397_v39, %v3397_v39  ;;  %p5845_p5 = por %p5844_p4, %p5843_p3 }
 0x469   :  { %v3416_v16 = vadd.f32 %v3415_v13, %v3409_v8  ;;  %v3403_v56 = vmul.f32 %v3395_v52, %v3395_v52  ;;  %v3396_v29 = vmax.f32 %v3388_v14, 1e-06 }
 0x46a   :  { %v3406_v61 = vmul.f32 %v3398_v37, %v3398_v37  ;;  %v3413_v53 = vmul.f32 %v3405_v59, %v3397_v39  ;;  %p5846_p6 = pnand %p5845_p5, %p5839_p2 }
 0x46b   :  { %v3411_v58 = vmul.f32 %v3403_v56, %v3395_v52  ;;  %v3417_v45 = vadd.f32 %v3416_v16, %v3410_v41  ;;  %v3404_v54 = vmul.f32 %v3396_v29, %v3396_v29 }
 0x46c   :  { %v3414_v42 = vmul.f32 %v3406_v61, %v3398_v37 }
 0x46d   :  { %v3418_v15 = vadd.f32 %v3417_v45, %v3411_v58  ;;  %v3412_v34 = vmul.f32 %v3404_v54, %v3396_v29 }
 0x46f   :  { %v3419_v31 = vadd.f32 %v3418_v15, %v3412_v34 }
 0x471   :  { %v3420_v4 = vadd.f32 %v3419_v31, %v3413_v53 }
 0x473   :  { %v3421_v24 = vadd.f32 %v3420_v4, %v3414_v42 }
 0x475   :  { %v3422_v48 = vrot.slane %v3421_v24, 4 }
 0x477   :  { %v3423_v62 = vadd.f32 %v3422_v48, %v3421_v24 }
 0x479   :  { %v3424_v19 = vrot.slane %v3423_v62, 2 }
 0x47b   :  { %v3425_v6 = vadd.f32 %v3424_v19, %v3423_v62 }
 0x47d   :  { %v3426_v32 = vrot.slane %v3425_v6, 1 }
 0x47f   :  { %v3427_v17 = vadd.f32 %v3426_v32, %v3425_v6 }
 0x481   :  { %v3428_v18 = vmul.f32 0.015625, %v3427_v17 }
 0x483   :  { %v3430_v28 = vsel %vm3429_vm0, %v2256_v26, %v3428_v18 }
 0x484   :  { %v3431_v60 = vmax.f32 %v3430_v28, 1e-30 }
 0x486   :  { %5690 = vlog2.f32 %v3431_v60 }
 0x490   :  { %v5691_v21 = vpop.eup %5690 }
 0x491   :  { %v3433_v22 = vmul.f32 0.6931472, %v5691_v21 }
 0x493   :  { %v3434_v57 = vmul.f32 0.33333334, %v3433_v22 }
 0x495   :  { %v3435_v23 = vmul.f32 1.442695, %v3434_v57 }
 0x497   :  { %5692 = vpow2.f32 %v3435_v23 }
 0x4a1   :  { %v5693_v5 = vpop.eup %5692 }
 0x4a2   :  { %v3947_v35 = vpack.c.bf16 %v5693_v5, %v5693_v5 }
 0x4a4   :  { %4182 = vmatmul.mubr.bf16.vlgmr.msra.gmra.mrb[16].mxu1 %v3947_v35 }
 0x4a5   :  { %5194 = vmatpush3.bf16.msra.mxu1 %v5682_v55  ;;  %5209 = vmatprep.mubr.msk.bf16.mxu1 %vm5875_vm1, %v5874_v7 }
 0x4a6   :  { %5195 = vmatprep.subr.bf16.mxu1 %v5874_v7 }
 0x4a9   :  { %5196 = vmatpush3.bf16.msra.mxu1 %v5683_v43 }
 0x4aa   :  { %5197 = vmatprep.subr.bf16.mxu1 %v5874_v7 }
 0x4ad   :  { %5198 = vmatpush3.bf16.msra.mxu1 %v5684_v36 }
 0x4ae   :  { %5199 = vmatprep.subr.bf16.mxu1 %v5874_v7 }
 0x4b1   :  { %5200 = vmatpush3.bf16.msra.mxu1 %v5685_v49 }
 0x4b2   :  { %5201 = vmatprep.subr.bf16.mxu1 %v5874_v7 }
 0x4b5   :  { %5202 = vmatpush3.bf16.msra.mxu1 %v5686_v30 }
 0x4b6   :  { %5203 = vmatprep.subr.bf16.mxu1 %v5874_v7 }
 0x4b9   :  { %5204 = vmatpush3.bf16.msra.mxu1 %v5687_v20 }
 0x4ba   :  { %5205 = vmatprep.subr.bf16.mxu1 %v5874_v7 }
 0x4bd   :  { %5206 = vmatpush3.bf16.msra.mxu1 %v5688_v2 }
 0x4be   :  { %5207 = vmatprep.subr.bf16.mxu1 %v5874_v7 }
 0x4c1   :  { %5208 = vmatpush3.bf16.msra.mxu1 %v5689_v12 }
 0x4c4   :  { %5210 = vmatmul.mubr.bf16.vlgmr.msra.gmra.mrb[20].mxu1 %v3949_v50 }
 0x577   :  { %v4746_v9 = vpop.f32.mrb[16].mxu1 }
 0x578   :  { %v4747_v27 = vpop.f32.mrb[17].mxu1 }
 0x579   :  { %v4748_v10 = vadd.f32 %v4747_v27, %v4746_v9  ;;  %v4749_v51 = vpop.f32.mrb[18].mxu1 }
 0x57a   :  { %v4750_v47 = vpop.f32.mrb[19].mxu1 }
 0x57b   :  { %v4184_v8 = vadd.f32 %v4748_v10, %v4489_v63 }
 0x597   :  { %v4223_v1 = vpop.f32.mrb[20].mxu1 }
 0x598   :  { %v4224_v46 = vadd.f32 %v4223_v1, %v4184_v8  ;;  %v5211_v38 = vpop.f32.mrb[21].mxu1 }
 0x599   :  { %v4226_v7 = vpop.f32.mrb[22].mxu1 }
 0x59a   :  { %v5212_v13 = vpop.f32.mrb[23].mxu1  ;;  %4230 = vst.msk [vmem:[#allocation7] sm:$0x3] %vm4229_vm2, %v4224_v46 }
 0x59b   :  { %5849 = shalt.err (!%p5846_p6)
}
 0x59c   :  { %s5850_s21 = scalar_lea.hbm %s6959_s9, 32 }
 0x59d   :  { %p5851_p7 = scmp.ne.s32.totalorder %s6959_s9, %s5850_s21  ;;  %p5854_p8 = scmp.lt.u32.totalorder %s5850_s21, %s6959_s9 }
 0x59f   :  { %p5856_p9 = pnand %p5854_p8, %p5851_p7 }
 0x5a1   :  { %5859 = shalt.err (!%p5856_p9)
}
 0x5a2   :  { %4240 = dma.vmem_to_hbm [thread:$0]  %s4238_s20, 32, %s6959_s9, [#allocation4]  }
 0x5a3   :  { %5864 = dma.done.wait [#allocation4], 32  }
 0x5a4   :  { %5865 = vsyncadd [#allocation4], 4294967264 }
 0x5a5   :  { %4244 = vsyncpa [#allocation3], 1 }
 0x5a6   :  { %4245 = vsyncpa [#allocation6], 1 }
 0x5a7   :  { %4246 = vsyncpa [#allocation4], 1 }

</bundles_post_ra>
